<compile_context>
chip_gen: v5e
topology: v5e:2x2
jax: 0.10.0
libtpu: 0.0.40
codegen_flags: <defaults>
</compile_context>

<pallas_src>
import functools

import jax
import jax.numpy as jnp
from jax.experimental import pallas as pl
from jax.experimental.pallas import tpu as pltpu

_LN_EPS = 1e-5
F32 = jnp.float32
BF16 = jnp.bfloat16
_NEG_INF = -1e30


# ---------------------------------------------------------------------------
# Small helpers
# ---------------------------------------------------------------------------

def _round_up(n, m):
    return ((n + m - 1) // m) * m


def _pick_tile(n, max_tile, align):
    """Largest `align`-multiple divisor of n that is <= max_tile (n itself if it fits)."""
    if n <= max_tile:
        return n
    t = (max_tile // align) * align
    while t >= align:
        if n % t == 0:
            return t
        t -= align
    # No aligned divisor <= max_tile. Sequence dims are padded to multiples of 8 by the
    # wrapper, so this only triggers for odd hidden sizes; fall back to the whole dim.
    return n


def _seq_tile(lp, batch, max_tile=256):
    """Query-length tile: <=256 keeps v5e's 16 MiB scoped default happy and feeds the
    256-wide MXU on v6e/v7x; with batch==1, split so >=2 parallel grid points exist and
    both v7x TensorCores get work."""
    if batch == 1 and lp >= 16:
        max_tile = min(max_tile, lp // 2)
    return _pick_tile(lp, max_tile, 8)


def _nbytes(shape, dtype):
    n = 1
    for d in shape:
        n *= int(d)
    return n * jnp.dtype(dtype).itemsize


def _block_bytes(entries, scratch=(), slack=0):
    """Double-buffered pipeline blocks + scratch + intermediate slack."""
    total = sum(2 * _nbytes(s, d) for s, d in entries)
    total += sum(_nbytes(s, d) for s, d in scratch)
    return total + slack


def _vmem_limit(block_bytes):
    """Explicit per-kernel VMEM budget: default scoped limits (16/32/32 MiB on
    v5e/v6e/v7x) are too small at realistic model sizes; clamp to ~85% of physical."""
    try:
        cap = int(pltpu.get_tpu_info().vmem_capacity_bytes)
    except Exception:  # conservative fallback (v7x per-TC physical)
        cap = 64 * 2**20
    want = int(block_bytes * 1.5) + (4 << 20)
    return max(16 << 20, min(want, int(cap * 0.85)))


# ---------------------------------------------------------------------------
# Kernel A: K/V projection, hoisted out of the query-tile loop.
#           Output is head-major (B, H, S, hd) bf16.
# ---------------------------------------------------------------------------

def _kv_proj_kernel(*refs, nhead, has_pos):
    if has_pos:
        x_ref, pos_ref, wk_ref, wv_ref, bk_ref, bv_ref, k_out, v_out = refs
    else:
        x_ref, wk_ref, wv_ref, bk_ref, bv_ref, k_out, v_out = refs
        pos_ref = None

    x = x_ref[0]                                               # (St, D) f32
    xk = ((x + pos_ref[0]) if has_pos else x).astype(BF16)     # key gets +pos
    xv = x.astype(BF16)                                        # value does not

    # Heads are major-axis slices of head-major weights: no lane slicing, no transposes.
    for h in range(nhead):
        k_out[0, h] = (jnp.dot(xk, wk_ref[h], preferred_element_type=F32)
                       + bk_ref[h]).astype(BF16)
        v_out[0, h] = (jnp.dot(xv, wv_ref[h], preferred_element_type=F32)
                       + bv_ref[h]).astype(BF16)


def kv_project(kv_x, kv_pos, attn_p, nhead):
    """kv_x/kv_pos: (B, S, D) -> K, V: (B, H, S, hd) bf16 (projected once per source)."""
    B, S, D = kv_x.shape
    hd = D // nhead
    tile_s = _pick_tile(S, 256, 8)
    grid = (B, S // tile_s)
    has_pos = kv_pos is not None

    x_map = lambda b, st: (b, st, 0)
    w_map = lambda b, st: (0, 0, 0)
    out_map = lambda b, st: (b, 0, st, 0)

    in_specs = [pl.BlockSpec((1, tile_s, D), x_map)]
    args = [kv_x]
    if has_pos:
        in_specs.append(pl.BlockSpec((1, tile_s, D), x_map))
        args.append(kv_pos)
    in_specs += [
        pl.BlockSpec((nhead, D, hd), w_map),       # wk (head-major, bf16)
        pl.BlockSpec((nhead, D, hd), w_map),       # wv
        pl.BlockSpec((nhead, 1, hd), w_map),       # bk (f32)
        pl.BlockSpec((nhead, 1, hd), w_map),       # bv
    ]
    args += [attn_p["wk_t"], attn_p["wv_t"], attn_p["b_k"], attn_p["b_v"]]

    out_shape = (jax.ShapeDtypeStruct((B, nhead, S, hd), BF16),
                 jax.ShapeDtypeStruct((B, nhead, S, hd), BF16))
    out_specs = (pl.BlockSpec((1, nhead, tile_s, hd), out_map),
                 pl.BlockSpec((1, nhead, tile_s, hd), out_map))

    needed = _block_bytes(
        [((1, tile_s, D), F32)] * (2 if has_pos else 1)
        + [((nhead, D, hd), BF16)] * 2 + [((nhead, 1, hd), F32)] * 2
        + [((1, nhead, tile_s, hd), BF16)] * 2,
        slack=4 * tile_s * D * 4)

    cost = pl.CostEstimate(
        flops=int(4 * B * S * D * D),
        transcendentals=0,
        bytes_accessed=int(4 * B * S * D * (2 if has_pos else 1)
                           + 2 * 2 * B * S * D + 2 * 2 * D * D))

    return pl.pallas_call(
        functools.partial(_kv_proj_kernel, nhead=nhead, has_pos=has_pos),
        out_shape=out_shape,
        grid=grid,
        in_specs=in_specs,
        out_specs=out_specs,
        compiler_params=pltpu.CompilerParams(
            dimension_semantics=("parallel", "parallel"),
            vmem_limit_bytes=_vmem_limit(needed)),
        cost_estimate=cost,
    )(*args)


# ---------------------------------------------------------------------------
# Kernel B: fused attention block (Q proj + attn + out-proj accumulation + add + LN)
# ---------------------------------------------------------------------------

def _mha_block_kernel(*refs, nhead, eps, valid_kv, has_qpos):
    if has_qpos:
        (qx_ref, qpos_ref, k_ref, v_ref, wq_ref, bq_ref,
         wo_ref, bo_ref, g_ref, b_ref, o_ref, acc_ref) = refs
    else:
        (qx_ref, k_ref, v_ref, wq_ref, bq_ref,
         wo_ref, bo_ref, g_ref, b_ref, o_ref, acc_ref) = refs
        qpos_ref = None

    resid = qx_ref[0]                                          # (Lt, D) f32 residual source
    xq = ((resid + qpos_ref[0]) if has_qpos else resid).astype(BF16)

    s_pad = k_ref.shape[2]
    masked = valid_kv < s_pad                                  # static
    if masked:
        kv_mask = jax.lax.broadcasted_iota(jnp.int32, (1, s_pad), 1) < valid_kv

    acc_ref[...] = jnp.zeros_like(acc_ref)

    # Per-head work on major-axis slices of head-major weights / KV: no sub-128-lane
    # column slicing, no concat; out-projection partials accumulate into the
    # preallocated (Lt, D) f32 VMEM scratch.  1/sqrt(hd) is pre-folded into wq/bq.
    for h in range(nhead):
        qh = jnp.dot(xq, wq_ref[h], preferred_element_type=F32) + bq_ref[h]   # (Lt, hd)
        kh = k_ref[0, h]                                                      # (S, hd) bf16
        vh = v_ref[0, h]
        s = jax.lax.dot_general(qh.astype(BF16), kh, (((1,), (1,)), ((), ())),
                                preferred_element_type=F32)                   # (Lt, S)
        if masked:
            s = jnp.where(kv_mask, s, _NEG_INF)
        m = jnp.max(s, axis=-1, keepdims=True)
        p = jnp.exp(s - m)
        denom = jnp.sum(p, axis=-1, keepdims=True)
        p = (p * pl.reciprocal(denom, approx=True)).astype(BF16)
        oh = jnp.dot(p, vh, preferred_element_type=F32)                       # (Lt, hd)
        acc_ref[...] += jnp.dot(oh.astype(BF16), wo_ref[h],
                                preferred_element_type=F32)                   # (Lt, D)

    # residual + LayerNorm epilogue, f32.
    y = resid + acc_ref[...] + bo_ref[...]
    mean = jnp.mean(y, axis=-1, keepdims=True)
    yc = y - mean
    var = jnp.mean(yc * yc, axis=-1, keepdims=True)
    o_ref[0] = (yc * jax.lax.rsqrt(var + eps) * g_ref[...] + b_ref[...]).astype(o_ref.dtype)


def mha_block(q_x, q_pos, k_heads, v_heads, attn_p, gamma, beta, nhead, valid_kv,
              eps=_LN_EPS):
    """q_x/q_pos: (B, L, D); k_heads/v_heads: (B, H, S, hd) bf16.
    Returns LayerNorm(q_x + MHA(q_x + q_pos, K, V)) : (B, L, D)."""
    B, L, D = q_x.shape
    hd = D // nhead
    S = k_heads.shape[2]
    tile_l = _seq_tile(L, B)
    grid = (B, L // tile_l)
    has_qpos = q_pos is not None

    q_map = lambda b, lt: (b, lt, 0)
    kv_map = lambda b, lt: (b, 0, 0, 0)
    w3_map = lambda b, lt: (0, 0, 0)
    w2_map = lambda b, lt: (0, 0)

    in_specs = [pl.BlockSpec((1, tile_l, D), q_map)]
    args = [q_x]
    if has_qpos:
        in_specs.append(pl.BlockSpec((1, tile_l, D), q_map))
        args.append(q_pos)
    in_specs += [
        pl.BlockSpec((1, nhead, S, hd), kv_map),   # K (bf16, head-major)
        pl.BlockSpec((1, nhead, S, hd), kv_map),   # V
        pl.BlockSpec((nhead, D, hd), w3_map),      # wq (scale folded in, bf16)
        pl.BlockSpec((nhead, 1, hd), w3_map),      # bq (scale folded in, f32)
        pl.BlockSpec((nhead, hd, D), w3_map),      # wo (head-major rows, bf16)
        pl.BlockSpec((1, D), w2_map),              # bo
        pl.BlockSpec((1, D), w2_map),              # LN gamma
        pl.BlockSpec((1, D), w2_map),              # LN beta
    ]
    args += [k_heads, v_heads, attn_p["wq_t"], attn_p["b_q"], attn_p["wo_t"],
             attn_p["b_o"], gamma, beta]

    needed = _block_bytes(
        [((1, tile_l, D), F32)] * ((2 if has_qpos else 1) + 1)
        + [((1, nhead, S, hd), BF16)] * 2
        + [((nhead, D, hd), BF16), ((nhead, hd, D), BF16)]
        + [((nhead, 1, hd), F32)] + [((1, D), F32)] * 3,
        scratch=[((tile_l, D), F32)],
        slack=4 * tile_l * S * 4)                   # f32 score/prob temporaries

    cost = pl.CostEstimate(
        flops=int(4 * B * L * D * (D + S)),
        transcendentals=int(B * nhead * L * S),
        bytes_accessed=int(3 * 4 * B * L * D + 2 * 2 * B * S * D + 2 * 2 * D * D))

    return pl.pallas_call(
        functools.partial(_mha_block_kernel, nhead=nhead, eps=eps,
                          valid_kv=valid_kv, has_qpos=has_qpos),
        out_shape=jax.ShapeDtypeStruct((B, L, D), q_x.dtype),
        grid=grid,
        in_specs=in_specs,
        out_specs=pl.BlockSpec((1, tile_l, D), q_map),
        scratch_shapes=[pltpu.VMEM((tile_l, D), F32)],
        compiler_params=pltpu.CompilerParams(
            dimension_semantics=("parallel", "parallel"),
            vmem_limit_bytes=_vmem_limit(needed)),
        cost_estimate=cost,
    )(*args)


# ---------------------------------------------------------------------------
# Kernel C: fused FFN block, F chunked as a reduction grid axis
#           (linear1 + ReLU + linear2-accumulate + add + LN + final "+ q")
# ---------------------------------------------------------------------------

def _ffn_block_kernel(*refs, eps, has_qpos):
    if has_qpos:
        (x_ref, t0_ref, qpos_ref, w1_ref, b1_ref, w2_ref, b2_ref,
         g_ref, b_ref, o_ref, acc_ref) = refs
    else:
        (x_ref, t0_ref, w1_ref, b1_ref, w2_ref, b2_ref,
         g_ref, b_ref, o_ref, acc_ref) = refs
        qpos_ref = None

    ft = pl.program_id(2)

    @pl.when(ft == 0)
    def _():
        acc_ref[...] = jnp.zeros_like(acc_ref)

    x = x_ref[0]                                                             # (Lt, D) f32
    hidden = (jnp.dot(x.astype(BF16), w1_ref[...], preferred_element_type=F32)
              + b1_ref[...])
    hidden = jnp.maximum(hidden, 0.0)                                        # ReLU
    acc_ref[...] += jnp.dot(hidden.astype(BF16), w2_ref[...],
                            preferred_element_type=F32)

    @pl.when(ft == pl.num_programs(2) - 1)
    def _():
        z = x + acc_ref[...] + b2_ref[...]
        mean = jnp.mean(z, axis=-1, keepdims=True)
        zc = z - mean
        var = jnp.mean(zc * zc, axis=-1, keepdims=True)
        z = zc * jax.lax.rsqrt(var + eps) * g_ref[...] + b_ref[...]
        # forward_post quirk: final residual with q = tgt_original + query_pos
        z = z + t0_ref[0]
        if has_qpos:
            z = z + qpos_ref[0]
        o_ref[0] = z.astype(o_ref.dtype)


def ffn_block(x, tgt0, q_pos, params, eps=_LN_EPS):
    """x/tgt0/q_pos: (B, L, D) -> (B, L, D)."""
    B, L, D = x.shape
    F = params["w1_t"].shape[1]
    tile_l = _seq_tile(L, B)
    tile_f = _pick_tile(F, 512, 128)
    grid = (B, L // tile_l, F // tile_f)              # F chunks = reduction axis (last)
    has_qpos = q_pos is not None

    x_map = lambda b, lt, ft: (b, lt, 0)
    w1_map = lambda b, lt, ft: (0, ft)
    w2_map = lambda b, lt, ft: (ft, 0)
    c_map = lambda b, lt, ft: (0, 0)

    in_specs = [pl.BlockSpec((1, tile_l, D), x_map),
                pl.BlockSpec((1, tile_l, D), x_map)]
    args = [x, tgt0]
    if has_qpos:
        in_specs.append(pl.BlockSpec((1, tile_l, D), x_map))
        args.append(q_pos)
    in_specs += [
        pl.BlockSpec((D, tile_f), w1_map),        # linear1^T chunk (bf16)
        pl.BlockSpec((1, tile_f), w1_map),        # linear1 bias chunk
        pl.BlockSpec((tile_f, D), w2_map),        # linear2^T chunk (bf16)
        pl.BlockSpec((1, D), c_map),              # linear2 bias
        pl.BlockSpec((1, D), c_map),              # norm3 gamma
        pl.BlockSpec((1, D), c_map),              # norm3 beta
    ]
    args += [params["w1_t"], params["b1"], params["w2_t"], params["b2"],
             params["norm3_w"], params["norm3_b"]]

    needed = _block_bytes(
        [((1, tile_l, D), F32)] * ((3 if has_qpos else 2) + 1)
        + [((D, tile_f), BF16), ((1, tile_f), F32), ((tile_f, D), BF16)]
        + [((1, D), F32)] * 3,
        scratch=[((tile_l, D), F32)],
        slack=2 * tile_l * tile_f * 4)

    cost = pl.CostEstimate(
        flops=int(4 * B * L * D * F),
        transcendentals=0,
        bytes_accessed=int(4 * 4 * B * L * D + 2 * 2 * D * F))

    return pl.pallas_call(
        functools.partial(_ffn_block_kernel, eps=eps, has_qpos=has_qpos),
        out_shape=jax.ShapeDtypeStruct((B, L, D), x.dtype),
        grid=grid,
        in_specs=in_specs,
        out_specs=pl.BlockSpec((1, tile_l, D), x_map),
        scratch_shapes=[pltpu.VMEM((tile_l, D), F32)],
        compiler_params=pltpu.CompilerParams(
            dimension_semantics=("parallel", "parallel", "arbitrary"),
            vmem_limit_bytes=_vmem_limit(needed)),
        cost_estimate=cost,
    )(*args)


# ---------------------------------------------------------------------------
# Layer composition (forward_post, dropout = identity)
# ---------------------------------------------------------------------------

def transformer_decoder_layer(tgt, memory, params, nhead, pos=None, query_pos=None):
    """tgt: (L, B, D), memory: (S, B, D) -> (L, B, D). forward_post semantics."""
    L, B, D = tgt.shape
    S = memory.shape[0]

    # Batch-first internal layout (one boundary transpose per tensor; a native
    # (tile_l, 1, D) block would put a size-1 sublane dim against B>1, violating the
    # (8,128) block rule, so the transpose is the cheaper/safer option).
    tgt_b = jnp.transpose(tgt, (1, 0, 2))
    mem_b = jnp.transpose(memory, (1, 0, 2))
    qpos_b = None if query_pos is None else jnp.transpose(query_pos, (1, 0, 2))
    pos_b = None if pos is None else jnp.transpose(pos, (1, 0, 2))

    # Pad sequence dims to multiples of 8; padded keys are masked inside the attention
    # kernel, padded query rows are sliced off at the end.
    Lp, Sp = _round_up(L, 8), _round_up(S, 8)
    if Lp != L:
        pad = [(0, 0), (0, Lp - L), (0, 0)]
        tgt_b = jnp.pad(tgt_b, pad)
        if qpos_b is not None:
            qpos_b = jnp.pad(qpos_b, pad)
    if Sp != S:
        pad = [(0, 0), (0, Sp - S), (0, 0)]
        mem_b = jnp.pad(mem_b, pad)
        if pos_b is not None:
            pos_b = jnp.pad(pos_b, pad)

    # TODO(synk): attn_mask / key_padding_mask not implemented (module is used with None).
    # TODO(synk): for very long memory a KV-tiled (flash-style) attention variant is needed.

    # self-attention: q = k = tgt + query_pos, v = tgt; + residual + norm1
    k_sa, v_sa = kv_project(tgt_b, qpos_b, params["self_attn"], nhead)
    t = mha_block(tgt_b, qpos_b, k_sa, v_sa, params["self_attn"],
                  params["norm1_w"], params["norm1_b"], nhead, valid_kv=L)
    # cross-attention: q = t + query_pos, k = memory + pos, v = memory; + residual + norm2
    k_ca, v_ca = kv_project(mem_b, pos_b, params["multihead_attn"], nhead)
    t = mha_block(t, qpos_b, k_ca, v_ca, params["multihead_attn"],
                  params["norm2_w"], params["norm2_b"], nhead, valid_kv=S)
    # FFN + residual + norm3 + final "+ q" (q = original tgt + query_pos)
    t = ffn_block(t, tgt_b, qpos_b, params)

    if Lp != L:
        t = t[:, :L, :]
    return jnp.transpose(t, (1, 0, 2))


# ---------------------------------------------------------------------------
# Parameter init (PyTorch layout) + one-time kernel-layout preparation
# ---------------------------------------------------------------------------

def init_params(key, d_model, nhead, dim_feedforward):
    keys = jax.random.split(key, 6)

    def w(k, shape, scale=0.02):
        return (scale * jax.random.normal(k, shape)).astype(F32)

    def attn_params(k):
        k1, k2, k3 = jax.random.split(k, 3)
        return {
            "in_proj_weight": w(k1, (3 * d_model, d_model)),
            "in_proj_bias": (0.01 * jax.random.normal(k2, (3 * d_model,))).astype(F32),
            "out_proj_weight": w(k3, (d_model, d_model)),
            "out_proj_bias": jnp.zeros((d_model,), F32),
        }

    return {
        "self_attn": attn_params(keys[0]),
        "multihead_attn": attn_params(keys[1]),
        "linear1_w": w(keys[2], (dim_feedforward, d_model)),
        "linear1_b": jnp.zeros((dim_feedforward,), F32),
        "linear2_w": w(keys[3], (d_model, dim_feedforward)),
        "linear2_b": jnp.zeros((d_model,), F32),
        "norm1_w": jnp.ones((1, d_model), F32), "norm1_b": jnp.zeros((1, d_model), F32),
        "norm2_w": jnp.ones((1, d_model), F32), "norm2_b": jnp.zeros((1, d_model), F32),
        "norm3_w": jnp.ones((1, d_model), F32), "norm3_b": jnp.zeros((1, d_model), F32),
    }


def prepare_params(raw, nhead):
    """One-time repack: head-major weight layouts (per-head access = free major-axis slice),
    bf16 MXU operands, 1/sqrt(hd) folded into the Q projection."""
    def attn(p):
        d_model = p["out_proj_weight"].shape[0]
        hd = d_model // nhead
        scale = 1.0 / float(hd) ** 0.5
        wq, wk, wv = jnp.split(p["in_proj_weight"], 3, axis=0)
        bq, bk, bv = jnp.split(p["in_proj_bias"], 3, axis=0)

        def head_major(w_):          # (D_out, D_in) -> (H, D_in, hd)
            return jnp.transpose(w_.T.reshape(d_model, nhead, hd), (1, 0, 2))

        return {
            "wq_t": (head_major(wq) * scale).astype(BF16),
            "b_q": (bq * scale).reshape(nhead, 1, hd).astype(F32),
            "wk_t": head_major(wk).astype(BF16),
            "b_k": bk.reshape(nhead, 1, hd).astype(F32),
            "wv_t": head_major(wv).astype(BF16),
            "b_v": bv.reshape(nhead, 1, hd).astype(F32),
            # out_proj input features are the concatenated head outputs -> (H, hd, D)
            "wo_t": p["out_proj_weight"].T.reshape(nhead, hd, d_model).astype(BF16),
            "b_o": p["out_proj_bias"].reshape(1, -1).astype(F32),
        }

    return {
        "self_attn": attn(raw["self_attn"]),
        "multihead_attn": attn(raw["multihead_attn"]),
        "w1_t": raw["linear1_w"].T.astype(BF16),
        "b1": raw["linear1_b"].reshape(1, -1).astype(F32),
        "w2_t": raw["linear2_w"].T.astype(BF16),
        "b2": raw["linear2_b"].reshape(1, -1).astype(F32),
        "norm1_w": raw["norm1_w"], "norm1_b": raw["norm1_b"],
        "norm2_w": raw["norm2_w"], "norm2_b": raw["norm2_b"],
        "norm3_w": raw["norm3_w"], "norm3_b": raw["norm3_b"],
    }


# ---------------------------------------------------------------------------
# Pure-JAX f32 reference (forward_post) for numerical sanity check
# ---------------------------------------------------------------------------

def _reference(tgt, memory, raw, nhead, pos, query_pos):
    def ln(x, w, b, eps=_LN_EPS):
        m = x.mean(-1, keepdims=True)
        v = ((x - m) ** 2).mean(-1, keepdims=True)
        return (x - m) / jnp.sqrt(v + eps) * w.reshape(-1) + b.reshape(-1)

    def mha(q_in, k_in, v_in, p):
        L, B, D = q_in.shape
        S = k_in.shape[0]
        hd = D // nhead
        wq, wk, wv = jnp.split(p["in_proj_weight"], 3, axis=0)
        bq, bk, bv = jnp.split(p["in_proj_bias"], 3, axis=0)
        q = q_in @ wq.T + bq
        k = k_in @ wk.T + bk
        v = v_in @ wv.T + bv
        q = q.reshape(L, B, nhead, hd).transpose(1, 2, 0, 3)
        k = k.reshape(S, B, nhead, hd).transpose(1, 2, 0, 3)
        v = v.reshape(S, B, nhead, hd).transpose(1, 2, 0, 3)
        s = jnp.einsum("bhld,bhsd->bhls", q, k) / jnp.sqrt(float(hd))
        a = jax.nn.softmax(s, axis=-1)
        o = jnp.einsum("bhls,bhsd->bhld", a, v)
        o = o.transpose(2, 0, 1, 3).reshape(L, B, D)
        return o @ p["out_proj_weight"].T + p["out_proj_bias"]

    q = tgt + query_pos
    t = ln(tgt + mha(q, q, tgt, raw["self_attn"]), raw["norm1_w"], raw["norm1_b"])
    t2 = mha(t + query_pos, memory + pos, memory, raw["multihead_attn"])
    t = ln(t + t2, raw["norm2_w"], raw["norm2_b"])
    h = jnp.maximum(t @ raw["linear1_w"].T + raw["linear1_b"], 0.0)
    t2 = h @ raw["linear2_w"].T + raw["linear2_b"]
    t = ln(t + t2, raw["norm3_w"], raw["norm3_b"])
    return t + q


# ---------------------------------------------------------------------------
# Example run
# ---------------------------------------------------------------------------

if __name__ == "__main__":
    # Small but lane-dense config: D=128 keeps VPU lanes / vst stores fully utilized,
    # T=12 and S=20 exercise the pad-to-8 + key-mask paths.
    d_model, nhead, dim_ff = 128, 4, 256
    T, S, B = 12, 20, 2
    assert d_model % nhead == 0

    root = jax.random.PRNGKey(0)
    kp, kt, km, kpos, kqpos = jax.random.split(root, 5)

    raw = init_params(kp, d_model, nhead, dim_ff)
    params = prepare_params(raw, nhead)

    tgt = jax.random.normal(kt, (T, B, d_model), jnp.float32)
    memory = jax.random.normal(km, (S, B, d_model), jnp.float32)
    pos = jax.random.normal(kpos, (S, B, d_model), jnp.float32)
    query_pos = jax.random.normal(kqpos, (T, B, d_model), jnp.float32)

    fwd = jax.jit(functools.partial(transformer_decoder_layer, nhead=nhead))
    out = jax.block_until_ready(fwd(tgt, memory, params, pos=pos, query_pos=query_pos))

    assert out.shape == (T, B, d_model) and out.dtype == jnp.float32

    # bf16 MXU operands + approx reciprocal vs pure-f32 reference: abs + relative check.
    ref = _reference(tgt, memory, raw, nhead, pos, query_pos)
    max_abs = float(jnp.max(jnp.abs(out - ref)))
    rel = max_abs / (float(jnp.max(jnp.abs(ref))) + 1e-6)
    assert max_abs < 0.3 and rel < 0.1, f"max abs {max_abs}, rel {rel}"

    print("KERNEL_OK")
</pallas_src>

<mosaic_0001>
module attributes {stable_mosaic.version = 11 : i64} {
  func.func @_kv_proj_kernel(%arg0: i32, %arg1: i32, %arg2: memref<1x16x128xf32, #tpu.memory_space<vmem>>, %arg3: memref<1x16x128xf32, #tpu.memory_space<vmem>>, %arg4: memref<4x128x32xbf16, #tpu.memory_space<vmem>>, %arg5: memref<4x128x32xbf16, #tpu.memory_space<vmem>>, %arg6: memref<4x1x32xf32, #tpu.memory_space<vmem>>, %arg7: memref<4x1x32xf32, #tpu.memory_space<vmem>>, %arg8: memref<1x4x16x32xbf16, #tpu.memory_space<vmem>>, %arg9: memref<1x4x16x32xbf16, #tpu.memory_space<vmem>>) attributes {dimension_semantics = [#tpu.dimension_semantics<parallel>, #tpu.dimension_semantics<parallel>], iteration_bounds = array<i64: 2, 1>, scalar_prefetch = 0 : i64, scratch_operands = 0 : i64, tpu.core_type = #tpu.core_type<tc>, window_params = [{transform_indices = @transform_0, window_bounds = array<i64: 1, 16, 128>}, {transform_indices = @transform_1, window_bounds = array<i64: 1, 16, 128>}, {pipeline_mode = #tpu.pipeline_mode<synchronous>, transform_indices = @transform_2, window_bounds = array<i64: 4, 128, 32>}, {pipeline_mode = #tpu.pipeline_mode<synchronous>, transform_indices = @transform_3, window_bounds = array<i64: 4, 128, 32>}, {pipeline_mode = #tpu.pipeline_mode<synchronous>, transform_indices = @transform_4, window_bounds = array<i64: 4, 1, 32>}, {pipeline_mode = #tpu.pipeline_mode<synchronous>, transform_indices = @transform_5, window_bounds = array<i64: 4, 1, 32>}, {transform_indices = @transform_6, window_bounds = array<i64: 1, 4, 16, 32>}, {transform_indices = @transform_7, window_bounds = array<i64: 1, 4, 16, 32>}]} {
    %c0 = arith.constant 0 : index
    %c0_0 = arith.constant 0 : index
    %c0_1 = arith.constant 0 : index
    %0 = vector.load %arg2[%c0, %c0_0, %c0_1] : memref<1x16x128xf32, #tpu.memory_space<vmem>>, vector<1x16x128xf32>
    %1 = vector.shape_cast %0 : vector<1x16x128xf32> to vector<16x128xf32>
    %c0_2 = arith.constant 0 : index
    %c0_3 = arith.constant 0 : index
    %c0_4 = arith.constant 0 : index
    %2 = vector.load %arg3[%c0_2, %c0_3, %c0_4] : memref<1x16x128xf32, #tpu.memory_space<vmem>>, vector<1x16x128xf32>
    %3 = vector.shape_cast %2 : vector<1x16x128xf32> to vector<16x128xf32>
    %4 = arith.addf %1, %3 : vector<16x128xf32>
    %5 = arith.truncf %4 : vector<16x128xf32> to vector<16x128xbf16>
    %6 = arith.truncf %1 : vector<16x128xf32> to vector<16x128xbf16>
    %c0_5 = arith.constant 0 : index
    %c0_6 = arith.constant 0 : index
    %c0_7 = arith.constant 0 : index
    %7 = vector.load %arg4[%c0_5, %c0_6, %c0_7] : memref<4x128x32xbf16, #tpu.memory_space<vmem>>, vector<1x128x32xbf16>
    %8 = vector.shape_cast %7 : vector<1x128x32xbf16> to vector<128x32xbf16>
    %cst = arith.constant dense<0.000000e+00> : vector<16x32xf32>
    %9 = tpu.matmul %5, %8, %cst {dimension_numbers = #tpu.dot_dimension_numbers<[1], [0], [0], [1], [0, 0, 1, 1], [], []>} : vector<16x128xbf16>, vector<128x32xbf16>, vector<16x32xf32> -> vector<16x32xf32>
    %c0_8 = arith.constant 0 : index
    %c0_9 = arith.constant 0 : index
    %c0_10 = arith.constant 0 : index
    %10 = vector.load %arg6[%c0_8, %c0_9, %c0_10] : memref<4x1x32xf32, #tpu.memory_space<vmem>>, vector<1x1x32xf32>
    %11 = vector.shape_cast %10 : vector<1x1x32xf32> to vector<1x32xf32>
    %12 = vector.broadcast %11 : vector<1x32xf32> to vector<16x32xf32>
    %13 = arith.addf %9, %12 : vector<16x32xf32>
    %14 = arith.truncf %13 : vector<16x32xf32> to vector<16x32xbf16>
    %c0_11 = arith.constant 0 : index
    %c0_12 = arith.constant 0 : index
    %c0_13 = arith.constant 0 : index
    %c0_14 = arith.constant 0 : index
    %15 = vector.load %arg8[%c0_11, %c0_12, %c0_13, %c0_14] : memref<1x4x16x32xbf16, #tpu.memory_space<vmem>>, vector<1x1x16x32xbf16>
    %16 = vector.shape_cast %15 : vector<1x1x16x32xbf16> to vector<16x32xbf16>
    %17 = vector.shape_cast %14 : vector<16x32xbf16> to vector<1x1x16x32xbf16>
    tpu.vector_store %arg8[%c0_11, %c0_12, %c0_13, %c0_14], %17 {strides = array<i32>} : memref<1x4x16x32xbf16, #tpu.memory_space<vmem>>, vector<1x1x16x32xbf16>,
    %c0_15 = arith.constant 0 : index
    %c0_16 = arith.constant 0 : index
    %c0_17 = arith.constant 0 : index
    %18 = vector.load %arg5[%c0_15, %c0_16, %c0_17] : memref<4x128x32xbf16, #tpu.memory_space<vmem>>, vector<1x128x32xbf16>
    %19 = vector.shape_cast %18 : vector<1x128x32xbf16> to vector<128x32xbf16>
    %cst_18 = arith.constant dense<0.000000e+00> : vector<16x32xf32>
    %20 = tpu.matmul %6, %19, %cst_18 {dimension_numbers = #tpu.dot_dimension_numbers<[1], [0], [0], [1], [0, 0, 1, 1], [], []>} : vector<16x128xbf16>, vector<128x32xbf16>, vector<16x32xf32> -> vector<16x32xf32>
    %c0_19 = arith.constant 0 : index
    %c0_20 = arith.constant 0 : index
    %c0_21 = arith.constant 0 : index
    %21 = vector.load %arg7[%c0_19, %c0_20, %c0_21] : memref<4x1x32xf32, #tpu.memory_space<vmem>>, vector<1x1x32xf32>
    %22 = vector.shape_cast %21 : vector<1x1x32xf32> to vector<1x32xf32>
    %23 = vector.broadcast %22 : vector<1x32xf32> to vector<16x32xf32>
    %24 = arith.addf %20, %23 : vector<16x32xf32>
    %25 = arith.truncf %24 : vector<16x32xf32> to vector<16x32xbf16>
    %c0_22 = arith.constant 0 : index
    %c0_23 = arith.constant 0 : index
    %c0_24 = arith.constant 0 : index
    %c0_25 = arith.constant 0 : index
    %26 = vector.load %arg9[%c0_22, %c0_23, %c0_24, %c0_25] : memref<1x4x16x32xbf16, #tpu.memory_space<vmem>>, vector<1x1x16x32xbf16>
    %27 = vector.shape_cast %26 : vector<1x1x16x32xbf16> to vector<16x32xbf16>
    %28 = vector.shape_cast %25 : vector<16x32xbf16> to vector<1x1x16x32xbf16>
    tpu.vector_store %arg9[%c0_22, %c0_23, %c0_24, %c0_25], %28 {strides = array<i32>} : memref<1x4x16x32xbf16, #tpu.memory_space<vmem>>, vector<1x1x16x32xbf16>,
    %c1 = arith.constant 1 : index
    %c0_26 = arith.constant 0 : index
    %c0_27 = arith.constant 0 : index
    %29 = vector.load %arg4[%c1, %c0_26, %c0_27] : memref<4x128x32xbf16, #tpu.memory_space<vmem>>, vector<1x128x32xbf16>
    %30 = vector.shape_cast %29 : vector<1x128x32xbf16> to vector<128x32xbf16>
    %cst_28 = arith.constant dense<0.000000e+00> : vector<16x32xf32>
    %31 = tpu.matmul %5, %30, %cst_28 {dimension_numbers = #tpu.dot_dimension_numbers<[1], [0], [0], [1], [0, 0, 1, 1], [], []>} : vector<16x128xbf16>, vector<128x32xbf16>, vector<16x32xf32> -> vector<16x32xf32>
    %c1_29 = arith.constant 1 : index
    %c0_30 = arith.constant 0 : index
    %c0_31 = arith.constant 0 : index
    %32 = vector.load %arg6[%c1_29, %c0_30, %c0_31] : memref<4x1x32xf32, #tpu.memory_space<vmem>>, vector<1x1x32xf32>
    %33 = vector.shape_cast %32 : vector<1x1x32xf32> to vector<1x32xf32>
    %34 = vector.broadcast %33 : vector<1x32xf32> to vector<16x32xf32>
    %35 = arith.addf %31, %34 : vector<16x32xf32>
    %36 = arith.truncf %35 : vector<16x32xf32> to vector<16x32xbf16>
    %c0_32 = arith.constant 0 : index
    %c1_33 = arith.constant 1 : index
    %c0_34 = arith.constant 0 : index
    %c0_35 = arith.constant 0 : index
    %37 = vector.load %arg8[%c0_32, %c1_33, %c0_34, %c0_35] : memref<1x4x16x32xbf16, #tpu.memory_space<vmem>>, vector<1x1x16x32xbf16>
    %38 = vector.shape_cast %37 : vector<1x1x16x32xbf16> to vector<16x32xbf16>
    %39 = vector.shape_cast %36 : vector<16x32xbf16> to vector<1x1x16x32xbf16>
    tpu.vector_store %arg8[%c0_32, %c1_33, %c0_34, %c0_35], %39 {strides = array<i32>} : memref<1x4x16x32xbf16, #tpu.memory_space<vmem>>, vector<1x1x16x32xbf16>,
    %c1_36 = arith.constant 1 : index
    %c0_37 = arith.constant 0 : index
    %c0_38 = arith.constant 0 : index
    %40 = vector.load %arg5[%c1_36, %c0_37, %c0_38] : memref<4x128x32xbf16, #tpu.memory_space<vmem>>, vector<1x128x32xbf16>
    %41 = vector.shape_cast %40 : vector<1x128x32xbf16> to vector<128x32xbf16>
    %cst_39 = arith.constant dense<0.000000e+00> : vector<16x32xf32>
    %42 = tpu.matmul %6, %41, %cst_39 {dimension_numbers = #tpu.dot_dimension_numbers<[1], [0], [0], [1], [0, 0, 1, 1], [], []>} : vector<16x128xbf16>, vector<128x32xbf16>, vector<16x32xf32> -> vector<16x32xf32>
    %c1_40 = arith.constant 1 : index
    %c0_41 = arith.constant 0 : index
    %c0_42 = arith.constant 0 : index
    %43 = vector.load %arg7[%c1_40, %c0_41, %c0_42] : memref<4x1x32xf32, #tpu.memory_space<vmem>>, vector<1x1x32xf32>
    %44 = vector.shape_cast %43 : vector<1x1x32xf32> to vector<1x32xf32>
    %45 = vector.broadcast %44 : vector<1x32xf32> to vector<16x32xf32>
    %46 = arith.addf %42, %45 : vector<16x32xf32>
    %47 = arith.truncf %46 : vector<16x32xf32> to vector<16x32xbf16>
    %c0_43 = arith.constant 0 : index
    %c1_44 = arith.constant 1 : index
    %c0_45 = arith.constant 0 : index
    %c0_46 = arith.constant 0 : index
    %48 = vector.load %arg9[%c0_43, %c1_44, %c0_45, %c0_46] : memref<1x4x16x32xbf16, #tpu.memory_space<vmem>>, vector<1x1x16x32xbf16>
    %49 = vector.shape_cast %48 : vector<1x1x16x32xbf16> to vector<16x32xbf16>
    %50 = vector.shape_cast %47 : vector<16x32xbf16> to vector<1x1x16x32xbf16>
    tpu.vector_store %arg9[%c0_43, %c1_44, %c0_45, %c0_46], %50 {strides = array<i32>} : memref<1x4x16x32xbf16, #tpu.memory_space<vmem>>, vector<1x1x16x32xbf16>,
    %c2 = arith.constant 2 : index
    %c0_47 = arith.constant 0 : index
    %c0_48 = arith.constant 0 : index
    %51 = vector.load %arg4[%c2, %c0_47, %c0_48] : memref<4x128x32xbf16, #tpu.memory_space<vmem>>, vector<1x128x32xbf16>
    %52 = vector.shape_cast %51 : vector<1x128x32xbf16> to vector<128x32xbf16>
    %cst_49 = arith.constant dense<0.000000e+00> : vector<16x32xf32>
    %53 = tpu.matmul %5, %52, %cst_49 {dimension_numbers = #tpu.dot_dimension_numbers<[1], [0], [0], [1], [0, 0, 1, 1], [], []>} : vector<16x128xbf16>, vector<128x32xbf16>, vector<16x32xf32> -> vector<16x32xf32>
    %c2_50 = arith.constant 2 : index
    %c0_51 = arith.constant 0 : index
    %c0_52 = arith.constant 0 : index
    %54 = vector.load %arg6[%c2_50, %c0_51, %c0_52] : memref<4x1x32xf32, #tpu.memory_space<vmem>>, vector<1x1x32xf32>
    %55 = vector.shape_cast %54 : vector<1x1x32xf32> to vector<1x32xf32>
    %56 = vector.broadcast %55 : vector<1x32xf32> to vector<16x32xf32>
    %57 = arith.addf %53, %56 : vector<16x32xf32>
    %58 = arith.truncf %57 : vector<16x32xf32> to vector<16x32xbf16>
    %c0_53 = arith.constant 0 : index
    %c2_54 = arith.constant 2 : index
    %c0_55 = arith.constant 0 : index
    %c0_56 = arith.constant 0 : index
    %59 = vector.load %arg8[%c0_53, %c2_54, %c0_55, %c0_56] : memref<1x4x16x32xbf16, #tpu.memory_space<vmem>>, vector<1x1x16x32xbf16>
    %60 = vector.shape_cast %59 : vector<1x1x16x32xbf16> to vector<16x32xbf16>
    %61 = vector.shape_cast %58 : vector<16x32xbf16> to vector<1x1x16x32xbf16>
    tpu.vector_store %arg8[%c0_53, %c2_54, %c0_55, %c0_56], %61 {strides = array<i32>} : memref<1x4x16x32xbf16, #tpu.memory_space<vmem>>, vector<1x1x16x32xbf16>,
    %c2_57 = arith.constant 2 : index
    %c0_58 = arith.constant 0 : index
    %c0_59 = arith.constant 0 : index
    %62 = vector.load %arg5[%c2_57, %c0_58, %c0_59] : memref<4x128x32xbf16, #tpu.memory_space<vmem>>, vector<1x128x32xbf16>
    %63 = vector.shape_cast %62 : vector<1x128x32xbf16> to vector<128x32xbf16>
    %cst_60 = arith.constant dense<0.000000e+00> : vector<16x32xf32>
    %64 = tpu.matmul %6, %63, %cst_60 {dimension_numbers = #tpu.dot_dimension_numbers<[1], [0], [0], [1], [0, 0, 1, 1], [], []>} : vector<16x128xbf16>, vector<128x32xbf16>, vector<16x32xf32> -> vector<16x32xf32>
    %c2_61 = arith.constant 2 : index
    %c0_62 = arith.constant 0 : index
    %c0_63 = arith.constant 0 : index
    %65 = vector.load %arg7[%c2_61, %c0_62, %c0_63] : memref<4x1x32xf32, #tpu.memory_space<vmem>>, vector<1x1x32xf32>
    %66 = vector.shape_cast %65 : vector<1x1x32xf32> to vector<1x32xf32>
    %67 = vector.broadcast %66 : vector<1x32xf32> to vector<16x32xf32>
    %68 = arith.addf %64, %67 : vector<16x32xf32>
    %69 = arith.truncf %68 : vector<16x32xf32> to vector<16x32xbf16>
    %c0_64 = arith.constant 0 : index
    %c2_65 = arith.constant 2 : index
    %c0_66 = arith.constant 0 : index
    %c0_67 = arith.constant 0 : index
    %70 = vector.load %arg9[%c0_64, %c2_65, %c0_66, %c0_67] : memref<1x4x16x32xbf16, #tpu.memory_space<vmem>>, vector<1x1x16x32xbf16>
    %71 = vector.shape_cast %70 : vector<1x1x16x32xbf16> to vector<16x32xbf16>
    %72 = vector.shape_cast %69 : vector<16x32xbf16> to vector<1x1x16x32xbf16>
    tpu.vector_store %arg9[%c0_64, %c2_65, %c0_66, %c0_67], %72 {strides = array<i32>} : memref<1x4x16x32xbf16, #tpu.memory_space<vmem>>, vector<1x1x16x32xbf16>,
    %c3 = arith.constant 3 : index
    %c0_68 = arith.constant 0 : index
    %c0_69 = arith.constant 0 : index
    %73 = vector.load %arg4[%c3, %c0_68, %c0_69] : memref<4x128x32xbf16, #tpu.memory_space<vmem>>, vector<1x128x32xbf16>
    %74 = vector.shape_cast %73 : vector<1x128x32xbf16> to vector<128x32xbf16>
    %cst_70 = arith.constant dense<0.000000e+00> : vector<16x32xf32>
    %75 = tpu.matmul %5, %74, %cst_70 {dimension_numbers = #tpu.dot_dimension_numbers<[1], [0], [0], [1], [0, 0, 1, 1], [], []>} : vector<16x128xbf16>, vector<128x32xbf16>, vector<16x32xf32> -> vector<16x32xf32>
    %c3_71 = arith.constant 3 : index
    %c0_72 = arith.constant 0 : index
    %c0_73 = arith.constant 0 : index
    %76 = vector.load %arg6[%c3_71, %c0_72, %c0_73] : memref<4x1x32xf32, #tpu.memory_space<vmem>>, vector<1x1x32xf32>
    %77 = vector.shape_cast %76 : vector<1x1x32xf32> to vector<1x32xf32>
    %78 = vector.broadcast %77 : vector<1x32xf32> to vector<16x32xf32>
    %79 = arith.addf %75, %78 : vector<16x32xf32>
    %80 = arith.truncf %79 : vector<16x32xf32> to vector<16x32xbf16>
    %c0_74 = arith.constant 0 : index
    %c3_75 = arith.constant 3 : index
    %c0_76 = arith.constant 0 : index
    %c0_77 = arith.constant 0 : index
    %81 = vector.load %arg8[%c0_74, %c3_75, %c0_76, %c0_77] : memref<1x4x16x32xbf16, #tpu.memory_space<vmem>>, vector<1x1x16x32xbf16>
    %82 = vector.shape_cast %81 : vector<1x1x16x32xbf16> to vector<16x32xbf16>
    %83 = vector.shape_cast %80 : vector<16x32xbf16> to vector<1x1x16x32xbf16>
    tpu.vector_store %arg8[%c0_74, %c3_75, %c0_76, %c0_77], %83 {strides = array<i32>} : memref<1x4x16x32xbf16, #tpu.memory_space<vmem>>, vector<1x1x16x32xbf16>,
    %c3_78 = arith.constant 3 : index
    %c0_79 = arith.constant 0 : index
    %c0_80 = arith.constant 0 : index
    %84 = vector.load %arg5[%c3_78, %c0_79, %c0_80] : memref<4x128x32xbf16, #tpu.memory_space<vmem>>, vector<1x128x32xbf16>
    %85 = vector.shape_cast %84 : vector<1x128x32xbf16> to vector<128x32xbf16>
    %cst_81 = arith.constant dense<0.000000e+00> : vector<16x32xf32>
    %86 = tpu.matmul %6, %85, %cst_81 {dimension_numbers = #tpu.dot_dimension_numbers<[1], [0], [0], [1], [0, 0, 1, 1], [], []>} : vector<16x128xbf16>, vector<128x32xbf16>, vector<16x32xf32> -> vector<16x32xf32>
    %c3_82 = arith.constant 3 : index
    %c0_83 = arith.constant 0 : index
    %c0_84 = arith.constant 0 : index
    %87 = vector.load %arg7[%c3_82, %c0_83, %c0_84] : memref<4x1x32xf32, #tpu.memory_space<vmem>>, vector<1x1x32xf32>
    %88 = vector.shape_cast %87 : vector<1x1x32xf32> to vector<1x32xf32>
    %89 = vector.broadcast %88 : vector<1x32xf32> to vector<16x32xf32>
    %90 = arith.addf %86, %89 : vector<16x32xf32>
    %91 = arith.truncf %90 : vector<16x32xf32> to vector<16x32xbf16>
    %c0_85 = arith.constant 0 : index
    %c3_86 = arith.constant 3 : index
    %c0_87 = arith.constant 0 : index
    %c0_88 = arith.constant 0 : index
    %92 = vector.load %arg9[%c0_85, %c3_86, %c0_87, %c0_88] : memref<1x4x16x32xbf16, #tpu.memory_space<vmem>>, vector<1x1x16x32xbf16>
    %93 = vector.shape_cast %92 : vector<1x1x16x32xbf16> to vector<16x32xbf16>
    %94 = vector.shape_cast %91 : vector<16x32xbf16> to vector<1x1x16x32xbf16>
    tpu.vector_store %arg9[%c0_85, %c3_86, %c0_87, %c0_88], %94 {strides = array<i32>} : memref<1x4x16x32xbf16, #tpu.memory_space<vmem>>, vector<1x1x16x32xbf16>,
    return
  }
  func.func @transform_0(%arg0: i32, %arg1: i32) -> (i32, i32, i32) {
    %c0_i32 = arith.constant 0 : i32
    %c0_i32_0 = arith.constant 0 : i32
    return %arg0, %arg1, %c0_i32 : i32, i32, i32
  }
  func.func @transform_1(%arg0: i32, %arg1: i32) -> (i32, i32, i32) {
    %c0_i32 = arith.constant 0 : i32
    %c0_i32_0 = arith.constant 0 : i32
    return %arg0, %arg1, %c0_i32 : i32, i32, i32
  }
  func.func @transform_2(%arg0: i32, %arg1: i32) -> (i32, i32, i32) {
    %c0_i32 = arith.constant 0 : i32
    %c0_i32_0 = arith.constant 0 : i32
    %c0_i32_1 = arith.constant 0 : i32
    %c0_i32_2 = arith.constant 0 : i32
    return %c0_i32, %c0_i32_0, %c0_i32_1 : i32, i32, i32
  }
  func.func @transform_3(%arg0: i32, %arg1: i32) -> (i32, i32, i32) {
    %c0_i32 = arith.constant 0 : i32
    %c0_i32_0 = arith.constant 0 : i32
    %c0_i32_1 = arith.constant 0 : i32
    %c0_i32_2 = arith.constant 0 : i32
    return %c0_i32, %c0_i32_0, %c0_i32_1 : i32, i32, i32
  }
  func.func @transform_4(%arg0: i32, %arg1: i32) -> (i32, i32, i32) {
    %c0_i32 = arith.constant 0 : i32
    %c0_i32_0 = arith.constant 0 : i32
    %c0_i32_1 = arith.constant 0 : i32
    %c0_i32_2 = arith.constant 0 : i32
    return %c0_i32, %c0_i32_0, %c0_i32_1 : i32, i32, i32
  }
  func.func @transform_5(%arg0: i32, %arg1: i32) -> (i32, i32, i32) {
    %c0_i32 = arith.constant 0 : i32
    %c0_i32_0 = arith.constant 0 : i32
    %c0_i32_1 = arith.constant 0 : i32
    %c0_i32_2 = arith.constant 0 : i32
    return %c0_i32, %c0_i32_0, %c0_i32_1 : i32, i32, i32
  }
  func.func @transform_6(%arg0: i32, %arg1: i32) -> (i32, i32, i32, i32) {
    %c0_i32 = arith.constant 0 : i32
    %c0_i32_0 = arith.constant 0 : i32
    %c0_i32_1 = arith.constant 0 : i32
    return %arg0, %c0_i32, %arg1, %c0_i32_0 : i32, i32, i32, i32
  }
  func.func @transform_7(%arg0: i32, %arg1: i32) -> (i32, i32, i32, i32) {
    %c0_i32 = arith.constant 0 : i32
    %c0_i32_0 = arith.constant 0 : i32
    %c0_i32_1 = arith.constant 0 : i32
    return %arg0, %c0_i32, %arg1, %c0_i32_0 : i32, i32, i32, i32
  }
}

module attributes {stable_mosaic.version = 11 : i64} {
  func.func @_mha_block_kernel(%arg0: i32, %arg1: i32, %arg2: memref<1x16x128xf32, #tpu.memory_space<vmem>>, %arg3: memref<1x16x128xf32, #tpu.memory_space<vmem>>, %arg4: memref<1x4x16x32xbf16, #tpu.memory_space<vmem>>, %arg5: memref<1x4x16x32xbf16, #tpu.memory_space<vmem>>, %arg6: memref<4x128x32xbf16, #tpu.memory_space<vmem>>, %arg7: memref<4x1x32xf32, #tpu.memory_space<vmem>>, %arg8: memref<4x32x128xbf16, #tpu.memory_space<vmem>>, %arg9: memref<1x128xf32, #tpu.memory_space<vmem>>, %arg10: memref<1x128xf32, #tpu.memory_space<vmem>>, %arg11: memref<1x128xf32, #tpu.memory_space<vmem>>, %arg12: memref<1x16x128xf32, #tpu.memory_space<vmem>>, %arg13: memref<16x128xf32, #tpu.memory_space<vmem>>) attributes {dimension_semantics = [#tpu.dimension_semantics<parallel>, #tpu.dimension_semantics<parallel>], iteration_bounds = array<i64: 2, 1>, scalar_prefetch = 0 : i64, scratch_operands = 1 : i64, tpu.core_type = #tpu.core_type<tc>, window_params = [{transform_indices = @transform_0, window_bounds = array<i64: 1, 16, 128>}, {transform_indices = @transform_1, window_bounds = array<i64: 1, 16, 128>}, {transform_indices = @transform_2, window_bounds = array<i64: 1, 4, 16, 32>}, {transform_indices = @transform_3, window_bounds = array<i64: 1, 4, 16, 32>}, {pipeline_mode = #tpu.pipeline_mode<synchronous>, transform_indices = @transform_4, window_bounds = array<i64: 4, 128, 32>}, {pipeline_mode = #tpu.pipeline_mode<synchronous>, transform_indices = @transform_5, window_bounds = array<i64: 4, 1, 32>}, {pipeline_mode = #tpu.pipeline_mode<synchronous>, transform_indices = @transform_6, window_bounds = array<i64: 4, 32, 128>}, {pipeline_mode = #tpu.pipeline_mode<synchronous>, transform_indices = @transform_7, window_bounds = array<i64: 1, 128>}, {pipeline_mode = #tpu.pipeline_mode<synchronous>, transform_indices = @transform_8, window_bounds = array<i64: 1, 128>}, {pipeline_mode = #tpu.pipeline_mode<synchronous>, transform_indices = @transform_9, window_bounds = array<i64: 1, 128>}, {transform_indices = @transform_10, window_bounds = array<i64: 1, 16, 128>}]} {
    %c0 = arith.constant 0 : index
    %c0_0 = arith.constant 0 : index
    %c0_1 = arith.constant 0 : index
    %0 = vector.load %arg2[%c0, %c0_0, %c0_1] : memref<1x16x128xf32, #tpu.memory_space<vmem>>, vector<1x16x128xf32>
    %1 = vector.shape_cast %0 : vector<1x16x128xf32> to vector<16x128xf32>
    %c0_2 = arith.constant 0 : index
    %c0_3 = arith.constant 0 : index
    %c0_4 = arith.constant 0 : index
    %2 = vector.load %arg3[%c0_2, %c0_3, %c0_4] : memref<1x16x128xf32, #tpu.memory_space<vmem>>, vector<1x16x128xf32>
    %3 = vector.shape_cast %2 : vector<1x16x128xf32> to vector<16x128xf32>
    %4 = arith.addf %1, %3 : vector<16x128xf32>
    %5 = arith.truncf %4 : vector<16x128xf32> to vector<16x128xbf16>
    %6 = tpu.iota {dimensions = array<i32: 1>} : vector<1x16xi32>
    %c12_i32 = arith.constant 12 : i32
    %7 = vector.broadcast %c12_i32 : i32 to vector<1x16xi32>
    %8 = arith.cmpi slt, %6, %7 : vector<1x16xi32>
    %cst = arith.constant 0.000000e+00 : f32
    %9 = vector.broadcast %cst : f32 to vector<16x128xf32>
    %c0_5 = arith.constant 0 : index
    %c0_6 = arith.constant 0 : index
    %10 = vector.load %arg13[%c0_5, %c0_6] : memref<16x128xf32, #tpu.memory_space<vmem>>, vector<16x128xf32>
    tpu.vector_store %arg13[%c0_5, %c0_6], %9 {strides = array<i32>} : memref<16x128xf32, #tpu.memory_space<vmem>>, vector<16x128xf32>,
    %c0_7 = arith.constant 0 : index
    %c0_8 = arith.constant 0 : index
    %c0_9 = arith.constant 0 : index
    %11 = vector.load %arg6[%c0_7, %c0_8, %c0_9] : memref<4x128x32xbf16, #tpu.memory_space<vmem>>, vector<1x128x32xbf16>
    %12 = vector.shape_cast %11 : vector<1x128x32xbf16> to vector<128x32xbf16>
    %cst_10 = arith.constant dense<0.000000e+00> : vector<16x32xf32>
    %13 = tpu.matmul %5, %12, %cst_10 {dimension_numbers = #tpu.dot_dimension_numbers<[1], [0], [0], [1], [0, 0, 1, 1], [], []>} : vector<16x128xbf16>, vector<128x32xbf16>, vector<16x32xf32> -> vector<16x32xf32>
    %c0_11 = arith.constant 0 : index
    %c0_12 = arith.constant 0 : index
    %c0_13 = arith.constant 0 : index
    %14 = vector.load %arg7[%c0_11, %c0_12, %c0_13] : memref<4x1x32xf32, #tpu.memory_space<vmem>>, vector<1x1x32xf32>
    %15 = vector.shape_cast %14 : vector<1x1x32xf32> to vector<1x32xf32>
    %16 = vector.broadcast %15 : vector<1x32xf32> to vector<16x32xf32>
    %17 = arith.addf %13, %16 : vector<16x32xf32>
    %c0_14 = arith.constant 0 : index
    %c0_15 = arith.constant 0 : index
    %c0_16 = arith.constant 0 : index
    %c0_17 = arith.constant 0 : index
    %18 = vector.load %arg4[%c0_14, %c0_15, %c0_16, %c0_17] : memref<1x4x16x32xbf16, #tpu.memory_space<vmem>>, vector<1x1x16x32xbf16>
    %19 = vector.shape_cast %18 : vector<1x1x16x32xbf16> to vector<16x32xbf16>
    %c0_18 = arith.constant 0 : index
    %c0_19 = arith.constant 0 : index
    %c0_20 = arith.constant 0 : index
    %c0_21 = arith.constant 0 : index
    %20 = vector.load %arg5[%c0_18, %c0_19, %c0_20, %c0_21] : memref<1x4x16x32xbf16, #tpu.memory_space<vmem>>, vector<1x1x16x32xbf16>
    %21 = vector.shape_cast %20 : vector<1x1x16x32xbf16> to vector<16x32xbf16>
    %22 = arith.truncf %17 : vector<16x32xf32> to vector<16x32xbf16>
    %cst_22 = arith.constant dense<0.000000e+00> : vector<16x16xf32>
    %23 = tpu.matmul %22, %19, %cst_22 {dimension_numbers = #tpu.dot_dimension_numbers<[1], [1], [0], [0], [0, 0, 1, 0], [], []>} : vector<16x32xbf16>, vector<16x32xbf16>, vector<16x16xf32> -> vector<16x16xf32>
    %cst_23 = arith.constant -1.000000e+30 : f32
    %24 = vector.shape_cast %8 : vector<1x16xi1> to vector<1x16xi1>
    %25 = vector.broadcast %24 : vector<1x16xi1> to vector<16x16xi1>
    %26 = vector.broadcast %cst_23 : f32 to vector<16x16xf32>
    %27 = arith.select %25, %23, %26 : vector<16x16xi1>, vector<16x16xf32>
    %cst_24 = arith.constant dense<0xFF800000> : vector<16xf32>
    %28 = vector.multi_reduction <maximumf>, %27, %cst_24 [1] : vector<16x16xf32> to vector<16xf32>
    %29 = vector.shape_cast %28 : vector<16xf32> to vector<16x1xf32>
    %30 = vector.broadcast %29 : vector<16x1xf32> to vector<16x16xf32>
    %31 = arith.subf %27, %30 : vector<16x16xf32>
    %32 = math.exp %31 : vector<16x16xf32>
    %cst_25 = arith.constant dense<0.000000e+00> : vector<16xf32>
    %33 = vector.multi_reduction <add>, %32, %cst_25 [1] : vector<16x16xf32> to vector<16xf32>
    %34 = vector.shape_cast %33 : vector<16xf32> to vector<16x1xf32>
    %35 = tpu.reciprocal %34 {approx = true} : vector<16x1xf32> -> vector<16x1xf32>
    %36 = vector.broadcast %35 : vector<16x1xf32> to vector<16x16xf32>
    %37 = arith.mulf %32, %36 : vector<16x16xf32>
    %38 = arith.truncf %37 : vector<16x16xf32> to vector<16x16xbf16>
    %cst_26 = arith.constant dense<0.000000e+00> : vector<16x32xf32>
    %39 = tpu.matmul %38, %21, %cst_26 {dimension_numbers = #tpu.dot_dimension_numbers<[1], [0], [0], [1], [0, 0, 1, 1], [], []>} : vector<16x16xbf16>, vector<16x32xbf16>, vector<16x32xf32> -> vector<16x32xf32>
    %c0_27 = arith.constant 0 : index
    %c0_28 = arith.constant 0 : index
    %40 = vector.load %arg13[%c0_27, %c0_28] : memref<16x128xf32, #tpu.memory_space<vmem>>, vector<16x128xf32>
    %41 = arith.truncf %39 : vector<16x32xf32> to vector<16x32xbf16>
    %c0_29 = arith.constant 0 : index
    %c0_30 = arith.constant 0 : index
    %c0_31 = arith.constant 0 : index
    %42 = vector.load %arg8[%c0_29, %c0_30, %c0_31] : memref<4x32x128xbf16, #tpu.memory_space<vmem>>, vector<1x32x128xbf16>
    %43 = vector.shape_cast %42 : vector<1x32x128xbf16> to vector<32x128xbf16>
    %cst_32 = arith.constant dense<0.000000e+00> : vector<16x128xf32>
    %44 = tpu.matmul %41, %43, %cst_32 {dimension_numbers = #tpu.dot_dimension_numbers<[1], [0], [0], [1], [0, 0, 1, 1], [], []>} : vector<16x32xbf16>, vector<32x128xbf16>, vector<16x128xf32> -> vector<16x128xf32>
    %45 = arith.addf %40, %44 : vector<16x128xf32>
    %c0_33 = arith.constant 0 : index
    %c0_34 = arith.constant 0 : index
    %46 = vector.load %arg13[%c0_33, %c0_34] : memref<16x128xf32, #tpu.memory_space<vmem>>, vector<16x128xf32>
    tpu.vector_store %arg13[%c0_33, %c0_34], %45 {strides = array<i32>} : memref<16x128xf32, #tpu.memory_space<vmem>>, vector<16x128xf32>,
    %c1 = arith.constant 1 : index
    %c0_35 = arith.constant 0 : index
    %c0_36 = arith.constant 0 : index
    %47 = vector.load %arg6[%c1, %c0_35, %c0_36] : memref<4x128x32xbf16, #tpu.memory_space<vmem>>, vector<1x128x32xbf16>
    %48 = vector.shape_cast %47 : vector<1x128x32xbf16> to vector<128x32xbf16>
    %cst_37 = arith.constant dense<0.000000e+00> : vector<16x32xf32>
    %49 = tpu.matmul %5, %48, %cst_37 {dimension_numbers = #tpu.dot_dimension_numbers<[1], [0], [0], [1], [0, 0, 1, 1], [], []>} : vector<16x128xbf16>, vector<128x32xbf16>, vector<16x32xf32> -> vector<16x32xf32>
    %c1_38 = arith.constant 1 : index
    %c0_39 = arith.constant 0 : index
    %c0_40 = arith.constant 0 : index
    %50 = vector.load %arg7[%c1_38, %c0_39, %c0_40] : memref<4x1x32xf32, #tpu.memory_space<vmem>>, vector<1x1x32xf32>
    %51 = vector.shape_cast %50 : vector<1x1x32xf32> to vector<1x32xf32>
    %52 = vector.broadcast %51 : vector<1x32xf32> to vector<16x32xf32>
    %53 = arith.addf %49, %52 : vector<16x32xf32>
    %c0_41 = arith.constant 0 : index
    %c1_42 = arith.constant 1 : index
    %c0_43 = arith.constant 0 : index
    %c0_44 = arith.constant 0 : index
    %54 = vector.load %arg4[%c0_41, %c1_42, %c0_43, %c0_44] : memref<1x4x16x32xbf16, #tpu.memory_space<vmem>>, vector<1x1x16x32xbf16>
    %55 = vector.shape_cast %54 : vector<1x1x16x32xbf16> to vector<16x32xbf16>
    %c0_45 = arith.constant 0 : index
    %c1_46 = arith.constant 1 : index
    %c0_47 = arith.constant 0 : index
    %c0_48 = arith.constant 0 : index
    %56 = vector.load %arg5[%c0_45, %c1_46, %c0_47, %c0_48] : memref<1x4x16x32xbf16, #tpu.memory_space<vmem>>, vector<1x1x16x32xbf16>
    %57 = vector.shape_cast %56 : vector<1x1x16x32xbf16> to vector<16x32xbf16>
    %58 = arith.truncf %53 : vector<16x32xf32> to vector<16x32xbf16>
    %cst_49 = arith.constant dense<0.000000e+00> : vector<16x16xf32>
    %59 = tpu.matmul %58, %55, %cst_49 {dimension_numbers = #tpu.dot_dimension_numbers<[1], [1], [0], [0], [0, 0, 1, 0], [], []>} : vector<16x32xbf16>, vector<16x32xbf16>, vector<16x16xf32> -> vector<16x16xf32>
    %cst_50 = arith.constant -1.000000e+30 : f32
    %60 = vector.shape_cast %8 : vector<1x16xi1> to vector<1x16xi1>
    %61 = vector.broadcast %60 : vector<1x16xi1> to vector<16x16xi1>
    %62 = vector.broadcast %cst_50 : f32 to vector<16x16xf32>
    %63 = arith.select %61, %59, %62 : vector<16x16xi1>, vector<16x16xf32>
    %cst_51 = arith.constant dense<0xFF800000> : vector<16xf32>
    %64 = vector.multi_reduction <maximumf>, %63, %cst_51 [1] : vector<16x16xf32> to vector<16xf32>
    %65 = vector.shape_cast %64 : vector<16xf32> to vector<16x1xf32>
    %66 = vector.broadcast %65 : vector<16x1xf32> to vector<16x16xf32>
    %67 = arith.subf %63, %66 : vector<16x16xf32>
    %68 = math.exp %67 : vector<16x16xf32>
    %cst_52 = arith.constant dense<0.000000e+00> : vector<16xf32>
    %69 = vector.multi_reduction <add>, %68, %cst_52 [1] : vector<16x16xf32> to vector<16xf32>
    %70 = vector.shape_cast %69 : vector<16xf32> to vector<16x1xf32>
    %71 = tpu.reciprocal %70 {approx = true} : vector<16x1xf32> -> vector<16x1xf32>
    %72 = vector.broadcast %71 : vector<16x1xf32> to vector<16x16xf32>
    %73 = arith.mulf %68, %72 : vector<16x16xf32>
    %74 = arith.truncf %73 : vector<16x16xf32> to vector<16x16xbf16>
    %cst_53 = arith.constant dense<0.000000e+00> : vector<16x32xf32>
    %75 = tpu.matmul %74, %57, %cst_53 {dimension_numbers = #tpu.dot_dimension_numbers<[1], [0], [0], [1], [0, 0, 1, 1], [], []>} : vector<16x16xbf16>, vector<16x32xbf16>, vector<16x32xf32> -> vector<16x32xf32>
    %c0_54 = arith.constant 0 : index
    %c0_55 = arith.constant 0 : index
    %76 = vector.load %arg13[%c0_54, %c0_55] : memref<16x128xf32, #tpu.memory_space<vmem>>, vector<16x128xf32>
    %77 = arith.truncf %75 : vector<16x32xf32> to vector<16x32xbf16>
    %c1_56 = arith.constant 1 : index
    %c0_57 = arith.constant 0 : index
    %c0_58 = arith.constant 0 : index
    %78 = vector.load %arg8[%c1_56, %c0_57, %c0_58] : memref<4x32x128xbf16, #tpu.memory_space<vmem>>, vector<1x32x128xbf16>
    %79 = vector.shape_cast %78 : vector<1x32x128xbf16> to vector<32x128xbf16>
    %cst_59 = arith.constant dense<0.000000e+00> : vector<16x128xf32>
    %80 = tpu.matmul %77, %79, %cst_59 {dimension_numbers = #tpu.dot_dimension_numbers<[1], [0], [0], [1], [0, 0, 1, 1], [], []>} : vector<16x32xbf16>, vector<32x128xbf16>, vector<16x128xf32> -> vector<16x128xf32>
    %81 = arith.addf %76, %80 : vector<16x128xf32>
    %c0_60 = arith.constant 0 : index
    %c0_61 = arith.constant 0 : index
    %82 = vector.load %arg13[%c0_60, %c0_61] : memref<16x128xf32, #tpu.memory_space<vmem>>, vector<16x128xf32>
    tpu.vector_store %arg13[%c0_60, %c0_61], %81 {strides = array<i32>} : memref<16x128xf32, #tpu.memory_space<vmem>>, vector<16x128xf32>,
    %c2 = arith.constant 2 : index
    %c0_62 = arith.constant 0 : index
    %c0_63 = arith.constant 0 : index
    %83 = vector.load %arg6[%c2, %c0_62, %c0_63] : memref<4x128x32xbf16, #tpu.memory_space<vmem>>, vector<1x128x32xbf16>
    %84 = vector.shape_cast %83 : vector<1x128x32xbf16> to vector<128x32xbf16>
    %cst_64 = arith.constant dense<0.000000e+00> : vector<16x32xf32>
    %85 = tpu.matmul %5, %84, %cst_64 {dimension_numbers = #tpu.dot_dimension_numbers<[1], [0], [0], [1], [0, 0, 1, 1], [], []>} : vector<16x128xbf16>, vector<128x32xbf16>, vector<16x32xf32> -> vector<16x32xf32>
    %c2_65 = arith.constant 2 : index
    %c0_66 = arith.constant 0 : index
    %c0_67 = arith.constant 0 : index
    %86 = vector.load %arg7[%c2_65, %c0_66, %c0_67] : memref<4x1x32xf32, #tpu.memory_space<vmem>>, vector<1x1x32xf32>
    %87 = vector.shape_cast %86 : vector<1x1x32xf32> to vector<1x32xf32>
    %88 = vector.broadcast %87 : vector<1x32xf32> to vector<16x32xf32>
    %89 = arith.addf %85, %88 : vector<16x32xf32>
    %c0_68 = arith.constant 0 : index
    %c2_69 = arith.constant 2 : index
    %c0_70 = arith.constant 0 : index
    %c0_71 = arith.constant 0 : index
    %90 = vector.load %arg4[%c0_68, %c2_69, %c0_70, %c0_71] : memref<1x4x16x32xbf16, #tpu.memory_space<vmem>>, vector<1x1x16x32xbf16>
    %91 = vector.shape_cast %90 : vector<1x1x16x32xbf16> to vector<16x32xbf16>
    %c0_72 = arith.constant 0 : index
    %c2_73 = arith.constant 2 : index
    %c0_74 = arith.constant 0 : index
    %c0_75 = arith.constant 0 : index
    %92 = vector.load %arg5[%c0_72, %c2_73, %c0_74, %c0_75] : memref<1x4x16x32xbf16, #tpu.memory_space<vmem>>, vector<1x1x16x32xbf16>
    %93 = vector.shape_cast %92 : vector<1x1x16x32xbf16> to vector<16x32xbf16>
    %94 = arith.truncf %89 : vector<16x32xf32> to vector<16x32xbf16>
    %cst_76 = arith.constant dense<0.000000e+00> : vector<16x16xf32>
    %95 = tpu.matmul %94, %91, %cst_76 {dimension_numbers = #tpu.dot_dimension_numbers<[1], [1], [0], [0], [0, 0, 1, 0], [], []>} : vector<16x32xbf16>, vector<16x32xbf16>, vector<16x16xf32> -> vector<16x16xf32>
    %cst_77 = arith.constant -1.000000e+30 : f32
    %96 = vector.shape_cast %8 : vector<1x16xi1> to vector<1x16xi1>
    %97 = vector.broadcast %96 : vector<1x16xi1> to vector<16x16xi1>
    %98 = vector.broadcast %cst_77 : f32 to vector<16x16xf32>
    %99 = arith.select %97, %95, %98 : vector<16x16xi1>, vector<16x16xf32>
    %cst_78 = arith.constant dense<0xFF800000> : vector<16xf32>
    %100 = vector.multi_reduction <maximumf>, %99, %cst_78 [1] : vector<16x16xf32> to vector<16xf32>
    %101 = vector.shape_cast %100 : vector<16xf32> to vector<16x1xf32>
    %102 = vector.broadcast %101 : vector<16x1xf32> to vector<16x16xf32>
    %103 = arith.subf %99, %102 : vector<16x16xf32>
    %104 = math.exp %103 : vector<16x16xf32>
    %cst_79 = arith.constant dense<0.000000e+00> : vector<16xf32>
    %105 = vector.multi_reduction <add>, %104, %cst_79 [1] : vector<16x16xf32> to vector<16xf32>
    %106 = vector.shape_cast %105 : vector<16xf32> to vector<16x1xf32>
    %107 = tpu.reciprocal %106 {approx = true} : vector<16x1xf32> -> vector<16x1xf32>
    %108 = vector.broadcast %107 : vector<16x1xf32> to vector<16x16xf32>
    %109 = arith.mulf %104, %108 : vector<16x16xf32>
    %110 = arith.truncf %109 : vector<16x16xf32> to vector<16x16xbf16>
    %cst_80 = arith.constant dense<0.000000e+00> : vector<16x32xf32>
    %111 = tpu.matmul %110, %93, %cst_80 {dimension_numbers = #tpu.dot_dimension_numbers<[1], [0], [0], [1], [0, 0, 1, 1], [], []>} : vector<16x16xbf16>, vector<16x32xbf16>, vector<16x32xf32> -> vector<16x32xf32>
    %c0_81 = arith.constant 0 : index
    %c0_82 = arith.constant 0 : index
    %112 = vector.load %arg13[%c0_81, %c0_82] : memref<16x128xf32, #tpu.memory_space<vmem>>, vector<16x128xf32>
    %113 = arith.truncf %111 : vector<16x32xf32> to vector<16x32xbf16>
    %c2_83 = arith.constant 2 : index
    %c0_84 = arith.constant 0 : index
    %c0_85 = arith.constant 0 : index
    %114 = vector.load %arg8[%c2_83, %c0_84, %c0_85] : memref<4x32x128xbf16, #tpu.memory_space<vmem>>, vector<1x32x128xbf16>
    %115 = vector.shape_cast %114 : vector<1x32x128xbf16> to vector<32x128xbf16>
    %cst_86 = arith.constant dense<0.000000e+00> : vector<16x128xf32>
    %116 = tpu.matmul %113, %115, %cst_86 {dimension_numbers = #tpu.dot_dimension_numbers<[1], [0], [0], [1], [0, 0, 1, 1], [], []>} : vector<16x32xbf16>, vector<32x128xbf16>, vector<16x128xf32> -> vector<16x128xf32>
    %117 = arith.addf %112, %116 : vector<16x128xf32>
    %c0_87 = arith.constant 0 : index
    %c0_88 = arith.constant 0 : index
    %118 = vector.load %arg13[%c0_87, %c0_88] : memref<16x128xf32, #tpu.memory_space<vmem>>, vector<16x128xf32>
    tpu.vector_store %arg13[%c0_87, %c0_88], %117 {strides = array<i32>} : memref<16x128xf32, #tpu.memory_space<vmem>>, vector<16x128xf32>,
    %c3 = arith.constant 3 : index
    %c0_89 = arith.constant 0 : index
    %c0_90 = arith.constant 0 : index
    %119 = vector.load %arg6[%c3, %c0_89, %c0_90] : memref<4x128x32xbf16, #tpu.memory_space<vmem>>, vector<1x128x32xbf16>
    %120 = vector.shape_cast %119 : vector<1x128x32xbf16> to vector<128x32xbf16>
    %cst_91 = arith.constant dense<0.000000e+00> : vector<16x32xf32>
    %121 = tpu.matmul %5, %120, %cst_91 {dimension_numbers = #tpu.dot_dimension_numbers<[1], [0], [0], [1], [0, 0, 1, 1], [], []>} : vector<16x128xbf16>, vector<128x32xbf16>, vector<16x32xf32> -> vector<16x32xf32>
    %c3_92 = arith.constant 3 : index
    %c0_93 = arith.constant 0 : index
    %c0_94 = arith.constant 0 : index
    %122 = vector.load %arg7[%c3_92, %c0_93, %c0_94] : memref<4x1x32xf32, #tpu.memory_space<vmem>>, vector<1x1x32xf32>
    %123 = vector.shape_cast %122 : vector<1x1x32xf32> to vector<1x32xf32>
    %124 = vector.broadcast %123 : vector<1x32xf32> to vector<16x32xf32>
    %125 = arith.addf %121, %124 : vector<16x32xf32>
    %c0_95 = arith.constant 0 : index
    %c3_96 = arith.constant 3 : index
    %c0_97 = arith.constant 0 : index
    %c0_98 = arith.constant 0 : index
    %126 = vector.load %arg4[%c0_95, %c3_96, %c0_97, %c0_98] : memref<1x4x16x32xbf16, #tpu.memory_space<vmem>>, vector<1x1x16x32xbf16>
    %127 = vector.shape_cast %126 : vector<1x1x16x32xbf16> to vector<16x32xbf16>
    %c0_99 = arith.constant 0 : index
    %c3_100 = arith.constant 3 : index
    %c0_101 = arith.constant 0 : index
    %c0_102 = arith.constant 0 : index
    %128 = vector.load %arg5[%c0_99, %c3_100, %c0_101, %c0_102] : memref<1x4x16x32xbf16, #tpu.memory_space<vmem>>, vector<1x1x16x32xbf16>
    %129 = vector.shape_cast %128 : vector<1x1x16x32xbf16> to vector<16x32xbf16>
    %130 = arith.truncf %125 : vector<16x32xf32> to vector<16x32xbf16>
    %cst_103 = arith.constant dense<0.000000e+00> : vector<16x16xf32>
    %131 = tpu.matmul %130, %127, %cst_103 {dimension_numbers = #tpu.dot_dimension_numbers<[1], [1], [0], [0], [0, 0, 1, 0], [], []>} : vector<16x32xbf16>, vector<16x32xbf16>, vector<16x16xf32> -> vector<16x16xf32>
    %cst_104 = arith.constant -1.000000e+30 : f32
    %132 = vector.shape_cast %8 : vector<1x16xi1> to vector<1x16xi1>
    %133 = vector.broadcast %132 : vector<1x16xi1> to vector<16x16xi1>
    %134 = vector.broadcast %cst_104 : f32 to vector<16x16xf32>
    %135 = arith.select %133, %131, %134 : vector<16x16xi1>, vector<16x16xf32>
    %cst_105 = arith.constant dense<0xFF800000> : vector<16xf32>
    %136 = vector.multi_reduction <maximumf>, %135, %cst_105 [1] : vector<16x16xf32> to vector<16xf32>
    %137 = vector.shape_cast %136 : vector<16xf32> to vector<16x1xf32>
    %138 = vector.broadcast %137 : vector<16x1xf32> to vector<16x16xf32>
    %139 = arith.subf %135, %138 : vector<16x16xf32>
    %140 = math.exp %139 : vector<16x16xf32>
    %cst_106 = arith.constant dense<0.000000e+00> : vector<16xf32>
    %141 = vector.multi_reduction <add>, %140, %cst_106 [1] : vector<16x16xf32> to vector<16xf32>
    %142 = vector.shape_cast %141 : vector<16xf32> to vector<16x1xf32>
    %143 = tpu.reciprocal %142 {approx = true} : vector<16x1xf32> -> vector<16x1xf32>
    %144 = vector.broadcast %143 : vector<16x1xf32> to vector<16x16xf32>
    %145 = arith.mulf %140, %144 : vector<16x16xf32>
    %146 = arith.truncf %145 : vector<16x16xf32> to vector<16x16xbf16>
    %cst_107 = arith.constant dense<0.000000e+00> : vector<16x32xf32>
    %147 = tpu.matmul %146, %129, %cst_107 {dimension_numbers = #tpu.dot_dimension_numbers<[1], [0], [0], [1], [0, 0, 1, 1], [], []>} : vector<16x16xbf16>, vector<16x32xbf16>, vector<16x32xf32> -> vector<16x32xf32>
    %c0_108 = arith.constant 0 : index
    %c0_109 = arith.constant 0 : index
    %148 = vector.load %arg13[%c0_108, %c0_109] : memref<16x128xf32, #tpu.memory_space<vmem>>, vector<16x128xf32>
    %149 = arith.truncf %147 : vector<16x32xf32> to vector<16x32xbf16>
    %c3_110 = arith.constant 3 : index
    %c0_111 = arith.constant 0 : index
    %c0_112 = arith.constant 0 : index
    %150 = vector.load %arg8[%c3_110, %c0_111, %c0_112] : memref<4x32x128xbf16, #tpu.memory_space<vmem>>, vector<1x32x128xbf16>
    %151 = vector.shape_cast %150 : vector<1x32x128xbf16> to vector<32x128xbf16>
    %cst_113 = arith.constant dense<0.000000e+00> : vector<16x128xf32>
    %152 = tpu.matmul %149, %151, %cst_113 {dimension_numbers = #tpu.dot_dimension_numbers<[1], [0], [0], [1], [0, 0, 1, 1], [], []>} : vector<16x32xbf16>, vector<32x128xbf16>, vector<16x128xf32> -> vector<16x128xf32>
    %153 = arith.addf %148, %152 : vector<16x128xf32>
    %c0_114 = arith.constant 0 : index
    %c0_115 = arith.constant 0 : index
    %154 = vector.load %arg13[%c0_114, %c0_115] : memref<16x128xf32, #tpu.memory_space<vmem>>, vector<16x128xf32>
    tpu.vector_store %arg13[%c0_114, %c0_115], %153 {strides = array<i32>} : memref<16x128xf32, #tpu.memory_space<vmem>>, vector<16x128xf32>,
    %c0_116 = arith.constant 0 : index
    %c0_117 = arith.constant 0 : index
    %155 = vector.load %arg13[%c0_116, %c0_117] : memref<16x128xf32, #tpu.memory_space<vmem>>, vector<16x128xf32>
    %156 = arith.addf %1, %155 : vector<16x128xf32>
    %c0_118 = arith.constant 0 : index
    %c0_119 = arith.constant 0 : index
    %157 = vector.load %arg9[%c0_118, %c0_119] : memref<1x128xf32, #tpu.memory_space<vmem>>, vector<1x128xf32>
    %158 = vector.broadcast %157 : vector<1x128xf32> to vector<16x128xf32>
    %159 = arith.addf %156, %158 : vector<16x128xf32>
    %cst_120 = arith.constant dense<0.000000e+00> : vector<16xf32>
    %160 = vector.multi_reduction <add>, %159, %cst_120 [1] : vector<16x128xf32> to vector<16xf32>
    %161 = vector.shape_cast %160 : vector<16xf32> to vector<16x1xf32>
    %cst_121 = arith.constant 1.280000e+02 : f32
    %162 = vector.broadcast %cst_121 : f32 to vector<16x1xf32>
    %163 = arith.divf %161, %162 : vector<16x1xf32>
    %164 = vector.broadcast %163 : vector<16x1xf32> to vector<16x128xf32>
    %165 = arith.subf %159, %164 : vector<16x128xf32>
    %166 = arith.mulf %165, %165 : vector<16x128xf32>
    %cst_122 = arith.constant dense<0.000000e+00> : vector<16xf32>
    %167 = vector.multi_reduction <add>, %166, %cst_122 [1] : vector<16x128xf32> to vector<16xf32>
    %168 = vector.shape_cast %167 : vector<16xf32> to vector<16x1xf32>
    %cst_123 = arith.constant 1.280000e+02 : f32
    %169 = vector.broadcast %cst_123 : f32 to vector<16x1xf32>
    %170 = arith.divf %168, %169 : vector<16x1xf32>
    %cst_124 = arith.constant 9.99999974E-6 : f32
    %171 = vector.broadcast %cst_124 : f32 to vector<16x1xf32>
    %172 = arith.addf %170, %171 : vector<16x1xf32>
    %173 = math.rsqrt %172 : vector<16x1xf32>
    %174 = vector.broadcast %173 : vector<16x1xf32> to vector<16x128xf32>
    %175 = arith.mulf %165, %174 : vector<16x128xf32>
    %c0_125 = arith.constant 0 : index
    %c0_126 = arith.constant 0 : index
    %176 = vector.load %arg10[%c0_125, %c0_126] : memref<1x128xf32, #tpu.memory_space<vmem>>, vector<1x128xf32>
    %177 = vector.broadcast %176 : vector<1x128xf32> to vector<16x128xf32>
    %178 = arith.mulf %175, %177 : vector<16x128xf32>
    %c0_127 = arith.constant 0 : index
    %c0_128 = arith.constant 0 : index
    %179 = vector.load %arg11[%c0_127, %c0_128] : memref<1x128xf32, #tpu.memory_space<vmem>>, vector<1x128xf32>
    %180 = vector.broadcast %179 : vector<1x128xf32> to vector<16x128xf32>
    %181 = arith.addf %178, %180 : vector<16x128xf32>
    %c0_129 = arith.constant 0 : index
    %c0_130 = arith.constant 0 : index
    %c0_131 = arith.constant 0 : index
    %182 = vector.load %arg12[%c0_129, %c0_130, %c0_131] : memref<1x16x128xf32, #tpu.memory_space<vmem>>, vector<1x16x128xf32>
    %183 = vector.shape_cast %182 : vector<1x16x128xf32> to vector<16x128xf32>
    %184 = vector.shape_cast %181 : vector<16x128xf32> to vector<1x16x128xf32>
    tpu.vector_store %arg12[%c0_129, %c0_130, %c0_131], %184 {strides = array<i32>} : memref<1x16x128xf32, #tpu.memory_space<vmem>>, vector<1x16x128xf32>,
    return
  }
  func.func @transform_0(%arg0: i32, %arg1: i32) -> (i32, i32, i32) {
    %c0_i32 = arith.constant 0 : i32
    %c0_i32_0 = arith.constant 0 : i32
    return %arg0, %arg1, %c0_i32 : i32, i32, i32
  }
  func.func @transform_1(%arg0: i32, %arg1: i32) -> (i32, i32, i32) {
    %c0_i32 = arith.constant 0 : i32
    %c0_i32_0 = arith.constant 0 : i32
    return %arg0, %arg1, %c0_i32 : i32, i32, i32
  }
  func.func @transform_2(%arg0: i32, %arg1: i32) -> (i32, i32, i32, i32) {
    %c0_i32 = arith.constant 0 : i32
    %c0_i32_0 = arith.constant 0 : i32
    %c0_i32_1 = arith.constant 0 : i32
    %c0_i32_2 = arith.constant 0 : i32
    return %arg0, %c0_i32, %c0_i32_0, %c0_i32_1 : i32, i32, i32, i32
  }
  func.func @transform_3(%arg0: i32, %arg1: i32) -> (i32, i32, i32, i32) {
    %c0_i32 = arith.constant 0 : i32
    %c0_i32_0 = arith.constant 0 : i32
    %c0_i32_1 = arith.constant 0 : i32
    %c0_i32_2 = arith.constant 0 : i32
    return %arg0, %c0_i32, %c0_i32_0, %c0_i32_1 : i32, i32, i32, i32
  }
  func.func @transform_4(%arg0: i32, %arg1: i32) -> (i32, i32, i32) {
    %c0_i32 = arith.constant 0 : i32
    %c0_i32_0 = arith.constant 0 : i32
    %c0_i32_1 = arith.constant 0 : i32
    %c0_i32_2 = arith.constant 0 : i32
    return %c0_i32, %c0_i32_0, %c0_i32_1 : i32, i32, i32
  }
  func.func @transform_5(%arg0: i32, %arg1: i32) -> (i32, i32, i32) {
    %c0_i32 = arith.constant 0 : i32
    %c0_i32_0 = arith.constant 0 : i32
    %c0_i32_1 = arith.constant 0 : i32
    %c0_i32_2 = arith.constant 0 : i32
    return %c0_i32, %c0_i32_0, %c0_i32_1 : i32, i32, i32
  }
  func.func @transform_6(%arg0: i32, %arg1: i32) -> (i32, i32, i32) {
    %c0_i32 = arith.constant 0 : i32
    %c0_i32_0 = arith.constant 0 : i32
    %c0_i32_1 = arith.constant 0 : i32
    %c0_i32_2 = arith.constant 0 : i32
    return %c0_i32, %c0_i32_0, %c0_i32_1 : i32, i32, i32
  }
  func.func @transform_7(%arg0: i32, %arg1: i32) -> (i32, i32) {
    %c0_i32 = arith.constant 0 : i32
    %c0_i32_0 = arith.constant 0 : i32
    %c0_i32_1 = arith.constant 0 : i32
    return %c0_i32, %c0_i32_0 : i32, i32
  }
  func.func @transform_8(%arg0: i32, %arg1: i32) -> (i32, i32) {
    %c0_i32 = arith.constant 0 : i32
    %c0_i32_0 = arith.constant 0 : i32
    %c0_i32_1 = arith.constant 0 : i32
    return %c0_i32, %c0_i32_0 : i32, i32
  }
  func.func @transform_9(%arg0: i32, %arg1: i32) -> (i32, i32) {
    %c0_i32 = arith.constant 0 : i32
    %c0_i32_0 = arith.constant 0 : i32
    %c0_i32_1 = arith.constant 0 : i32
    return %c0_i32, %c0_i32_0 : i32, i32
  }
  func.func @transform_10(%arg0: i32, %arg1: i32) -> (i32, i32, i32) {
    %c0_i32 = arith.constant 0 : i32
    %c0_i32_0 = arith.constant 0 : i32
    return %arg0, %arg1, %c0_i32 : i32, i32, i32
  }
}

module attributes {stable_mosaic.version = 11 : i64} {
  func.func @_kv_proj_kernel(%arg0: i32, %arg1: i32, %arg2: memref<1x24x128xf32, #tpu.memory_space<vmem>>, %arg3: memref<1x24x128xf32, #tpu.memory_space<vmem>>, %arg4: memref<4x128x32xbf16, #tpu.memory_space<vmem>>, %arg5: memref<4x128x32xbf16, #tpu.memory_space<vmem>>, %arg6: memref<4x1x32xf32, #tpu.memory_space<vmem>>, %arg7: memref<4x1x32xf32, #tpu.memory_space<vmem>>, %arg8: memref<1x4x24x32xbf16, #tpu.memory_space<vmem>>, %arg9: memref<1x4x24x32xbf16, #tpu.memory_space<vmem>>) attributes {dimension_semantics = [#tpu.dimension_semantics<parallel>, #tpu.dimension_semantics<parallel>], iteration_bounds = array<i64: 2, 1>, scalar_prefetch = 0 : i64, scratch_operands = 0 : i64, tpu.core_type = #tpu.core_type<tc>, window_params = [{transform_indices = @transform_0, window_bounds = array<i64: 1, 24, 128>}, {transform_indices = @transform_1, window_bounds = array<i64: 1, 24, 128>}, {pipeline_mode = #tpu.pipeline_mode<synchronous>, transform_indices = @transform_2, window_bounds = array<i64: 4, 128, 32>}, {pipeline_mode = #tpu.pipeline_mode<synchronous>, transform_indices = @transform_3, window_bounds = array<i64: 4, 128, 32>}, {pipeline_mode = #tpu.pipeline_mode<synchronous>, transform_indices = @transform_4, window_bounds = array<i64: 4, 1, 32>}, {pipeline_mode = #tpu.pipeline_mode<synchronous>, transform_indices = @transform_5, window_bounds = array<i64: 4, 1, 32>}, {transform_indices = @transform_6, window_bounds = array<i64: 1, 4, 24, 32>}, {transform_indices = @transform_7, window_bounds = array<i64: 1, 4, 24, 32>}]} {
    %c0 = arith.constant 0 : index
    %c0_0 = arith.constant 0 : index
    %c0_1 = arith.constant 0 : index
    %0 = vector.load %arg2[%c0, %c0_0, %c0_1] : memref<1x24x128xf32, #tpu.memory_space<vmem>>, vector<1x24x128xf32>
    %1 = vector.shape_cast %0 : vector<1x24x128xf32> to vector<24x128xf32>
    %c0_2 = arith.constant 0 : index
    %c0_3 = arith.constant 0 : index
    %c0_4 = arith.constant 0 : index
    %2 = vector.load %arg3[%c0_2, %c0_3, %c0_4] : memref<1x24x128xf32, #tpu.memory_space<vmem>>, vector<1x24x128xf32>
    %3 = vector.shape_cast %2 : vector<1x24x128xf32> to vector<24x128xf32>
    %4 = arith.addf %1, %3 : vector<24x128xf32>
    %5 = arith.truncf %4 : vector<24x128xf32> to vector<24x128xbf16>
    %6 = arith.truncf %1 : vector<24x128xf32> to vector<24x128xbf16>
    %c0_5 = arith.constant 0 : index
    %c0_6 = arith.constant 0 : index
    %c0_7 = arith.constant 0 : index
    %7 = vector.load %arg4[%c0_5, %c0_6, %c0_7] : memref<4x128x32xbf16, #tpu.memory_space<vmem>>, vector<1x128x32xbf16>
    %8 = vector.shape_cast %7 : vector<1x128x32xbf16> to vector<128x32xbf16>
    %cst = arith.constant dense<0.000000e+00> : vector<24x32xf32>
    %9 = tpu.matmul %5, %8, %cst {dimension_numbers = #tpu.dot_dimension_numbers<[1], [0], [0], [1], [0, 0, 1, 1], [], []>} : vector<24x128xbf16>, vector<128x32xbf16>, vector<24x32xf32> -> vector<24x32xf32>
    %c0_8 = arith.constant 0 : index
    %c0_9 = arith.constant 0 : index
    %c0_10 = arith.constant 0 : index
    %10 = vector.load %arg6[%c0_8, %c0_9, %c0_10] : memref<4x1x32xf32, #tpu.memory_space<vmem>>, vector<1x1x32xf32>
    %11 = vector.shape_cast %10 : vector<1x1x32xf32> to vector<1x32xf32>
    %12 = vector.broadcast %11 : vector<1x32xf32> to vector<24x32xf32>
    %13 = arith.addf %9, %12 : vector<24x32xf32>
    %14 = arith.truncf %13 : vector<24x32xf32> to vector<24x32xbf16>
    %c0_11 = arith.constant 0 : index
    %c0_12 = arith.constant 0 : index
    %c0_13 = arith.constant 0 : index
    %c0_14 = arith.constant 0 : index
    %15 = vector.load %arg8[%c0_11, %c0_12, %c0_13, %c0_14] : memref<1x4x24x32xbf16, #tpu.memory_space<vmem>>, vector<1x1x24x32xbf16>
    %16 = vector.shape_cast %15 : vector<1x1x24x32xbf16> to vector<24x32xbf16>
    %17 = vector.shape_cast %14 : vector<24x32xbf16> to vector<1x1x24x32xbf16>
    tpu.vector_store %arg8[%c0_11, %c0_12, %c0_13, %c0_14], %17 {strides = array<i32>} : memref<1x4x24x32xbf16, #tpu.memory_space<vmem>>, vector<1x1x24x32xbf16>,
    %c0_15 = arith.constant 0 : index
    %c0_16 = arith.constant 0 : index
    %c0_17 = arith.constant 0 : index
    %18 = vector.load %arg5[%c0_15, %c0_16, %c0_17] : memref<4x128x32xbf16, #tpu.memory_space<vmem>>, vector<1x128x32xbf16>
    %19 = vector.shape_cast %18 : vector<1x128x32xbf16> to vector<128x32xbf16>
    %cst_18 = arith.constant dense<0.000000e+00> : vector<24x32xf32>
    %20 = tpu.matmul %6, %19, %cst_18 {dimension_numbers = #tpu.dot_dimension_numbers<[1], [0], [0], [1], [0, 0, 1, 1], [], []>} : vector<24x128xbf16>, vector<128x32xbf16>, vector<24x32xf32> -> vector<24x32xf32>
    %c0_19 = arith.constant 0 : index
    %c0_20 = arith.constant 0 : index
    %c0_21 = arith.constant 0 : index
    %21 = vector.load %arg7[%c0_19, %c0_20, %c0_21] : memref<4x1x32xf32, #tpu.memory_space<vmem>>, vector<1x1x32xf32>
    %22 = vector.shape_cast %21 : vector<1x1x32xf32> to vector<1x32xf32>
    %23 = vector.broadcast %22 : vector<1x32xf32> to vector<24x32xf32>
    %24 = arith.addf %20, %23 : vector<24x32xf32>
    %25 = arith.truncf %24 : vector<24x32xf32> to vector<24x32xbf16>
    %c0_22 = arith.constant 0 : index
    %c0_23 = arith.constant 0 : index
    %c0_24 = arith.constant 0 : index
    %c0_25 = arith.constant 0 : index
    %26 = vector.load %arg9[%c0_22, %c0_23, %c0_24, %c0_25] : memref<1x4x24x32xbf16, #tpu.memory_space<vmem>>, vector<1x1x24x32xbf16>
    %27 = vector.shape_cast %26 : vector<1x1x24x32xbf16> to vector<24x32xbf16>
    %28 = vector.shape_cast %25 : vector<24x32xbf16> to vector<1x1x24x32xbf16>
    tpu.vector_store %arg9[%c0_22, %c0_23, %c0_24, %c0_25], %28 {strides = array<i32>} : memref<1x4x24x32xbf16, #tpu.memory_space<vmem>>, vector<1x1x24x32xbf16>,
    %c1 = arith.constant 1 : index
    %c0_26 = arith.constant 0 : index
    %c0_27 = arith.constant 0 : index
    %29 = vector.load %arg4[%c1, %c0_26, %c0_27] : memref<4x128x32xbf16, #tpu.memory_space<vmem>>, vector<1x128x32xbf16>
    %30 = vector.shape_cast %29 : vector<1x128x32xbf16> to vector<128x32xbf16>
    %cst_28 = arith.constant dense<0.000000e+00> : vector<24x32xf32>
    %31 = tpu.matmul %5, %30, %cst_28 {dimension_numbers = #tpu.dot_dimension_numbers<[1], [0], [0], [1], [0, 0, 1, 1], [], []>} : vector<24x128xbf16>, vector<128x32xbf16>, vector<24x32xf32> -> vector<24x32xf32>
    %c1_29 = arith.constant 1 : index
    %c0_30 = arith.constant 0 : index
    %c0_31 = arith.constant 0 : index
    %32 = vector.load %arg6[%c1_29, %c0_30, %c0_31] : memref<4x1x32xf32, #tpu.memory_space<vmem>>, vector<1x1x32xf32>
    %33 = vector.shape_cast %32 : vector<1x1x32xf32> to vector<1x32xf32>
    %34 = vector.broadcast %33 : vector<1x32xf32> to vector<24x32xf32>
    %35 = arith.addf %31, %34 : vector<24x32xf32>
    %36 = arith.truncf %35 : vector<24x32xf32> to vector<24x32xbf16>
    %c0_32 = arith.constant 0 : index
    %c1_33 = arith.constant 1 : index
    %c0_34 = arith.constant 0 : index
    %c0_35 = arith.constant 0 : index
    %37 = vector.load %arg8[%c0_32, %c1_33, %c0_34, %c0_35] : memref<1x4x24x32xbf16, #tpu.memory_space<vmem>>, vector<1x1x24x32xbf16>
    %38 = vector.shape_cast %37 : vector<1x1x24x32xbf16> to vector<24x32xbf16>
    %39 = vector.shape_cast %36 : vector<24x32xbf16> to vector<1x1x24x32xbf16>
    tpu.vector_store %arg8[%c0_32, %c1_33, %c0_34, %c0_35], %39 {strides = array<i32>} : memref<1x4x24x32xbf16, #tpu.memory_space<vmem>>, vector<1x1x24x32xbf16>,
    %c1_36 = arith.constant 1 : index
    %c0_37 = arith.constant 0 : index
    %c0_38 = arith.constant 0 : index
    %40 = vector.load %arg5[%c1_36, %c0_37, %c0_38] : memref<4x128x32xbf16, #tpu.memory_space<vmem>>, vector<1x128x32xbf16>
    %41 = vector.shape_cast %40 : vector<1x128x32xbf16> to vector<128x32xbf16>
    %cst_39 = arith.constant dense<0.000000e+00> : vector<24x32xf32>
    %42 = tpu.matmul %6, %41, %cst_39 {dimension_numbers = #tpu.dot_dimension_numbers<[1], [0], [0], [1], [0, 0, 1, 1], [], []>} : vector<24x128xbf16>, vector<128x32xbf16>, vector<24x32xf32> -> vector<24x32xf32>
    %c1_40 = arith.constant 1 : index
    %c0_41 = arith.constant 0 : index
    %c0_42 = arith.constant 0 : index
    %43 = vector.load %arg7[%c1_40, %c0_41, %c0_42] : memref<4x1x32xf32, #tpu.memory_space<vmem>>, vector<1x1x32xf32>
    %44 = vector.shape_cast %43 : vector<1x1x32xf32> to vector<1x32xf32>
    %45 = vector.broadcast %44 : vector<1x32xf32> to vector<24x32xf32>
    %46 = arith.addf %42, %45 : vector<24x32xf32>
    %47 = arith.truncf %46 : vector<24x32xf32> to vector<24x32xbf16>
    %c0_43 = arith.constant 0 : index
    %c1_44 = arith.constant 1 : index
    %c0_45 = arith.constant 0 : index
    %c0_46 = arith.constant 0 : index
    %48 = vector.load %arg9[%c0_43, %c1_44, %c0_45, %c0_46] : memref<1x4x24x32xbf16, #tpu.memory_space<vmem>>, vector<1x1x24x32xbf16>
    %49 = vector.shape_cast %48 : vector<1x1x24x32xbf16> to vector<24x32xbf16>
    %50 = vector.shape_cast %47 : vector<24x32xbf16> to vector<1x1x24x32xbf16>
    tpu.vector_store %arg9[%c0_43, %c1_44, %c0_45, %c0_46], %50 {strides = array<i32>} : memref<1x4x24x32xbf16, #tpu.memory_space<vmem>>, vector<1x1x24x32xbf16>,
    %c2 = arith.constant 2 : index
    %c0_47 = arith.constant 0 : index
    %c0_48 = arith.constant 0 : index
    %51 = vector.load %arg4[%c2, %c0_47, %c0_48] : memref<4x128x32xbf16, #tpu.memory_space<vmem>>, vector<1x128x32xbf16>
    %52 = vector.shape_cast %51 : vector<1x128x32xbf16> to vector<128x32xbf16>
    %cst_49 = arith.constant dense<0.000000e+00> : vector<24x32xf32>
    %53 = tpu.matmul %5, %52, %cst_49 {dimension_numbers = #tpu.dot_dimension_numbers<[1], [0], [0], [1], [0, 0, 1, 1], [], []>} : vector<24x128xbf16>, vector<128x32xbf16>, vector<24x32xf32> -> vector<24x32xf32>
    %c2_50 = arith.constant 2 : index
    %c0_51 = arith.constant 0 : index
    %c0_52 = arith.constant 0 : index
    %54 = vector.load %arg6[%c2_50, %c0_51, %c0_52] : memref<4x1x32xf32, #tpu.memory_space<vmem>>, vector<1x1x32xf32>
    %55 = vector.shape_cast %54 : vector<1x1x32xf32> to vector<1x32xf32>
    %56 = vector.broadcast %55 : vector<1x32xf32> to vector<24x32xf32>
    %57 = arith.addf %53, %56 : vector<24x32xf32>
    %58 = arith.truncf %57 : vector<24x32xf32> to vector<24x32xbf16>
    %c0_53 = arith.constant 0 : index
    %c2_54 = arith.constant 2 : index
    %c0_55 = arith.constant 0 : index
    %c0_56 = arith.constant 0 : index
    %59 = vector.load %arg8[%c0_53, %c2_54, %c0_55, %c0_56] : memref<1x4x24x32xbf16, #tpu.memory_space<vmem>>, vector<1x1x24x32xbf16>
    %60 = vector.shape_cast %59 : vector<1x1x24x32xbf16> to vector<24x32xbf16>
    %61 = vector.shape_cast %58 : vector<24x32xbf16> to vector<1x1x24x32xbf16>
    tpu.vector_store %arg8[%c0_53, %c2_54, %c0_55, %c0_56], %61 {strides = array<i32>} : memref<1x4x24x32xbf16, #tpu.memory_space<vmem>>, vector<1x1x24x32xbf16>,
    %c2_57 = arith.constant 2 : index
    %c0_58 = arith.constant 0 : index
    %c0_59 = arith.constant 0 : index
    %62 = vector.load %arg5[%c2_57, %c0_58, %c0_59] : memref<4x128x32xbf16, #tpu.memory_space<vmem>>, vector<1x128x32xbf16>
    %63 = vector.shape_cast %62 : vector<1x128x32xbf16> to vector<128x32xbf16>
    %cst_60 = arith.constant dense<0.000000e+00> : vector<24x32xf32>
    %64 = tpu.matmul %6, %63, %cst_60 {dimension_numbers = #tpu.dot_dimension_numbers<[1], [0], [0], [1], [0, 0, 1, 1], [], []>} : vector<24x128xbf16>, vector<128x32xbf16>, vector<24x32xf32> -> vector<24x32xf32>
    %c2_61 = arith.constant 2 : index
    %c0_62 = arith.constant 0 : index
    %c0_63 = arith.constant 0 : index
    %65 = vector.load %arg7[%c2_61, %c0_62, %c0_63] : memref<4x1x32xf32, #tpu.memory_space<vmem>>, vector<1x1x32xf32>
    %66 = vector.shape_cast %65 : vector<1x1x32xf32> to vector<1x32xf32>
    %67 = vector.broadcast %66 : vector<1x32xf32> to vector<24x32xf32>
    %68 = arith.addf %64, %67 : vector<24x32xf32>
    %69 = arith.truncf %68 : vector<24x32xf32> to vector<24x32xbf16>
    %c0_64 = arith.constant 0 : index
    %c2_65 = arith.constant 2 : index
    %c0_66 = arith.constant 0 : index
    %c0_67 = arith.constant 0 : index
    %70 = vector.load %arg9[%c0_64, %c2_65, %c0_66, %c0_67] : memref<1x4x24x32xbf16, #tpu.memory_space<vmem>>, vector<1x1x24x32xbf16>
    %71 = vector.shape_cast %70 : vector<1x1x24x32xbf16> to vector<24x32xbf16>
    %72 = vector.shape_cast %69 : vector<24x32xbf16> to vector<1x1x24x32xbf16>
    tpu.vector_store %arg9[%c0_64, %c2_65, %c0_66, %c0_67], %72 {strides = array<i32>} : memref<1x4x24x32xbf16, #tpu.memory_space<vmem>>, vector<1x1x24x32xbf16>,
    %c3 = arith.constant 3 : index
    %c0_68 = arith.constant 0 : index
    %c0_69 = arith.constant 0 : index
    %73 = vector.load %arg4[%c3, %c0_68, %c0_69] : memref<4x128x32xbf16, #tpu.memory_space<vmem>>, vector<1x128x32xbf16>
    %74 = vector.shape_cast %73 : vector<1x128x32xbf16> to vector<128x32xbf16>
    %cst_70 = arith.constant dense<0.000000e+00> : vector<24x32xf32>
    %75 = tpu.matmul %5, %74, %cst_70 {dimension_numbers = #tpu.dot_dimension_numbers<[1], [0], [0], [1], [0, 0, 1, 1], [], []>} : vector<24x128xbf16>, vector<128x32xbf16>, vector<24x32xf32> -> vector<24x32xf32>
    %c3_71 = arith.constant 3 : index
    %c0_72 = arith.constant 0 : index
    %c0_73 = arith.constant 0 : index
    %76 = vector.load %arg6[%c3_71, %c0_72, %c0_73] : memref<4x1x32xf32, #tpu.memory_space<vmem>>, vector<1x1x32xf32>
    %77 = vector.shape_cast %76 : vector<1x1x32xf32> to vector<1x32xf32>
    %78 = vector.broadcast %77 : vector<1x32xf32> to vector<24x32xf32>
    %79 = arith.addf %75, %78 : vector<24x32xf32>
    %80 = arith.truncf %79 : vector<24x32xf32> to vector<24x32xbf16>
    %c0_74 = arith.constant 0 : index
    %c3_75 = arith.constant 3 : index
    %c0_76 = arith.constant 0 : index
    %c0_77 = arith.constant 0 : index
    %81 = vector.load %arg8[%c0_74, %c3_75, %c0_76, %c0_77] : memref<1x4x24x32xbf16, #tpu.memory_space<vmem>>, vector<1x1x24x32xbf16>
    %82 = vector.shape_cast %81 : vector<1x1x24x32xbf16> to vector<24x32xbf16>
    %83 = vector.shape_cast %80 : vector<24x32xbf16> to vector<1x1x24x32xbf16>
    tpu.vector_store %arg8[%c0_74, %c3_75, %c0_76, %c0_77], %83 {strides = array<i32>} : memref<1x4x24x32xbf16, #tpu.memory_space<vmem>>, vector<1x1x24x32xbf16>,
    %c3_78 = arith.constant 3 : index
    %c0_79 = arith.constant 0 : index
    %c0_80 = arith.constant 0 : index
    %84 = vector.load %arg5[%c3_78, %c0_79, %c0_80] : memref<4x128x32xbf16, #tpu.memory_space<vmem>>, vector<1x128x32xbf16>
    %85 = vector.shape_cast %84 : vector<1x128x32xbf16> to vector<128x32xbf16>
    %cst_81 = arith.constant dense<0.000000e+00> : vector<24x32xf32>
    %86 = tpu.matmul %6, %85, %cst_81 {dimension_numbers = #tpu.dot_dimension_numbers<[1], [0], [0], [1], [0, 0, 1, 1], [], []>} : vector<24x128xbf16>, vector<128x32xbf16>, vector<24x32xf32> -> vector<24x32xf32>
    %c3_82 = arith.constant 3 : index
    %c0_83 = arith.constant 0 : index
    %c0_84 = arith.constant 0 : index
    %87 = vector.load %arg7[%c3_82, %c0_83, %c0_84] : memref<4x1x32xf32, #tpu.memory_space<vmem>>, vector<1x1x32xf32>
    %88 = vector.shape_cast %87 : vector<1x1x32xf32> to vector<1x32xf32>
    %89 = vector.broadcast %88 : vector<1x32xf32> to vector<24x32xf32>
    %90 = arith.addf %86, %89 : vector<24x32xf32>
    %91 = arith.truncf %90 : vector<24x32xf32> to vector<24x32xbf16>
    %c0_85 = arith.constant 0 : index
    %c3_86 = arith.constant 3 : index
    %c0_87 = arith.constant 0 : index
    %c0_88 = arith.constant 0 : index
    %92 = vector.load %arg9[%c0_85, %c3_86, %c0_87, %c0_88] : memref<1x4x24x32xbf16, #tpu.memory_space<vmem>>, vector<1x1x24x32xbf16>
    %93 = vector.shape_cast %92 : vector<1x1x24x32xbf16> to vector<24x32xbf16>
    %94 = vector.shape_cast %91 : vector<24x32xbf16> to vector<1x1x24x32xbf16>
    tpu.vector_store %arg9[%c0_85, %c3_86, %c0_87, %c0_88], %94 {strides = array<i32>} : memref<1x4x24x32xbf16, #tpu.memory_space<vmem>>, vector<1x1x24x32xbf16>,
    return
  }
  func.func @transform_0(%arg0: i32, %arg1: i32) -> (i32, i32, i32) {
    %c0_i32 = arith.constant 0 : i32
    %c0_i32_0 = arith.constant 0 : i32
    return %arg0, %arg1, %c0_i32 : i32, i32, i32
  }
  func.func @transform_1(%arg0: i32, %arg1: i32) -> (i32, i32, i32) {
    %c0_i32 = arith.constant 0 : i32
    %c0_i32_0 = arith.constant 0 : i32
    return %arg0, %arg1, %c0_i32 : i32, i32, i32
  }
  func.func @transform_2(%arg0: i32, %arg1: i32) -> (i32, i32, i32) {
    %c0_i32 = arith.constant 0 : i32
    %c0_i32_0 = arith.constant 0 : i32
    %c0_i32_1 = arith.constant 0 : i32
    %c0_i32_2 = arith.constant 0 : i32
    return %c0_i32, %c0_i32_0, %c0_i32_1 : i32, i32, i32
  }
  func.func @transform_3(%arg0: i32, %arg1: i32) -> (i32, i32, i32) {
    %c0_i32 = arith.constant 0 : i32
    %c0_i32_0 = arith.constant 0 : i32
    %c0_i32_1 = arith.constant 0 : i32
    %c0_i32_2 = arith.constant 0 : i32
    return %c0_i32, %c0_i32_0, %c0_i32_1 : i32, i32, i32
  }
  func.func @transform_4(%arg0: i32, %arg1: i32) -> (i32, i32, i32) {
    %c0_i32 = arith.constant 0 : i32
    %c0_i32_0 = arith.constant 0 : i32
    %c0_i32_1 = arith.constant 0 : i32
    %c0_i32_2 = arith.constant 0 : i32
    return %c0_i32, %c0_i32_0, %c0_i32_1 : i32, i32, i32
  }
  func.func @transform_5(%arg0: i32, %arg1: i32) -> (i32, i32, i32) {
    %c0_i32 = arith.constant 0 : i32
    %c0_i32_0 = arith.constant 0 : i32
    %c0_i32_1 = arith.constant 0 : i32
    %c0_i32_2 = arith.constant 0 : i32
    return %c0_i32, %c0_i32_0, %c0_i32_1 : i32, i32, i32
  }
  func.func @transform_6(%arg0: i32, %arg1: i32) -> (i32, i32, i32, i32) {
    %c0_i32 = arith.constant 0 : i32
    %c0_i32_0 = arith.constant 0 : i32
    %c0_i32_1 = arith.constant 0 : i32
    return %arg0, %c0_i32, %arg1, %c0_i32_0 : i32, i32, i32, i32
  }
  func.func @transform_7(%arg0: i32, %arg1: i32) -> (i32, i32, i32, i32) {
    %c0_i32 = arith.constant 0 : i32
    %c0_i32_0 = arith.constant 0 : i32
    %c0_i32_1 = arith.constant 0 : i32
    return %arg0, %c0_i32, %arg1, %c0_i32_0 : i32, i32, i32, i32
  }
}

module attributes {stable_mosaic.version = 11 : i64} {
  func.func @_mha_block_kernel(%arg0: i32, %arg1: i32, %arg2: memref<1x16x128xf32, #tpu.memory_space<vmem>>, %arg3: memref<1x16x128xf32, #tpu.memory_space<vmem>>, %arg4: memref<1x4x24x32xbf16, #tpu.memory_space<vmem>>, %arg5: memref<1x4x24x32xbf16, #tpu.memory_space<vmem>>, %arg6: memref<4x128x32xbf16, #tpu.memory_space<vmem>>, %arg7: memref<4x1x32xf32, #tpu.memory_space<vmem>>, %arg8: memref<4x32x128xbf16, #tpu.memory_space<vmem>>, %arg9: memref<1x128xf32, #tpu.memory_space<vmem>>, %arg10: memref<1x128xf32, #tpu.memory_space<vmem>>, %arg11: memref<1x128xf32, #tpu.memory_space<vmem>>, %arg12: memref<1x16x128xf32, #tpu.memory_space<vmem>>, %arg13: memref<16x128xf32, #tpu.memory_space<vmem>>) attributes {dimension_semantics = [#tpu.dimension_semantics<parallel>, #tpu.dimension_semantics<parallel>], iteration_bounds = array<i64: 2, 1>, scalar_prefetch = 0 : i64, scratch_operands = 1 : i64, tpu.core_type = #tpu.core_type<tc>, window_params = [{transform_indices = @transform_0, window_bounds = array<i64: 1, 16, 128>}, {transform_indices = @transform_1, window_bounds = array<i64: 1, 16, 128>}, {transform_indices = @transform_2, window_bounds = array<i64: 1, 4, 24, 32>}, {transform_indices = @transform_3, window_bounds = array<i64: 1, 4, 24, 32>}, {pipeline_mode = #tpu.pipeline_mode<synchronous>, transform_indices = @transform_4, window_bounds = array<i64: 4, 128, 32>}, {pipeline_mode = #tpu.pipeline_mode<synchronous>, transform_indices = @transform_5, window_bounds = array<i64: 4, 1, 32>}, {pipeline_mode = #tpu.pipeline_mode<synchronous>, transform_indices = @transform_6, window_bounds = array<i64: 4, 32, 128>}, {pipeline_mode = #tpu.pipeline_mode<synchronous>, transform_indices = @transform_7, window_bounds = array<i64: 1, 128>}, {pipeline_mode = #tpu.pipeline_mode<synchronous>, transform_indices = @transform_8, window_bounds = array<i64: 1, 128>}, {pipeline_mode = #tpu.pipeline_mode<synchronous>, transform_indices = @transform_9, window_bounds = array<i64: 1, 128>}, {transform_indices = @transform_10, window_bounds = array<i64: 1, 16, 128>}]} {
    %c0 = arith.constant 0 : index
    %c0_0 = arith.constant 0 : index
    %c0_1 = arith.constant 0 : index
    %0 = vector.load %arg2[%c0, %c0_0, %c0_1] : memref<1x16x128xf32, #tpu.memory_space<vmem>>, vector<1x16x128xf32>
    %1 = vector.shape_cast %0 : vector<1x16x128xf32> to vector<16x128xf32>
    %c0_2 = arith.constant 0 : index
    %c0_3 = arith.constant 0 : index
    %c0_4 = arith.constant 0 : index
    %2 = vector.load %arg3[%c0_2, %c0_3, %c0_4] : memref<1x16x128xf32, #tpu.memory_space<vmem>>, vector<1x16x128xf32>
    %3 = vector.shape_cast %2 : vector<1x16x128xf32> to vector<16x128xf32>
    %4 = arith.addf %1, %3 : vector<16x128xf32>
    %5 = arith.truncf %4 : vector<16x128xf32> to vector<16x128xbf16>
    %6 = tpu.iota {dimensions = array<i32: 1>} : vector<1x24xi32>
    %c20_i32 = arith.constant 20 : i32
    %7 = vector.broadcast %c20_i32 : i32 to vector<1x24xi32>
    %8 = arith.cmpi slt, %6, %7 : vector<1x24xi32>
    %cst = arith.constant 0.000000e+00 : f32
    %9 = vector.broadcast %cst : f32 to vector<16x128xf32>
    %c0_5 = arith.constant 0 : index
    %c0_6 = arith.constant 0 : index
    %10 = vector.load %arg13[%c0_5, %c0_6] : memref<16x128xf32, #tpu.memory_space<vmem>>, vector<16x128xf32>
    tpu.vector_store %arg13[%c0_5, %c0_6], %9 {strides = array<i32>} : memref<16x128xf32, #tpu.memory_space<vmem>>, vector<16x128xf32>,
    %c0_7 = arith.constant 0 : index
    %c0_8 = arith.constant 0 : index
    %c0_9 = arith.constant 0 : index
    %11 = vector.load %arg6[%c0_7, %c0_8, %c0_9] : memref<4x128x32xbf16, #tpu.memory_space<vmem>>, vector<1x128x32xbf16>
    %12 = vector.shape_cast %11 : vector<1x128x32xbf16> to vector<128x32xbf16>
    %cst_10 = arith.constant dense<0.000000e+00> : vector<16x32xf32>
    %13 = tpu.matmul %5, %12, %cst_10 {dimension_numbers = #tpu.dot_dimension_numbers<[1], [0], [0], [1], [0, 0, 1, 1], [], []>} : vector<16x128xbf16>, vector<128x32xbf16>, vector<16x32xf32> -> vector<16x32xf32>
    %c0_11 = arith.constant 0 : index
    %c0_12 = arith.constant 0 : index
    %c0_13 = arith.constant 0 : index
    %14 = vector.load %arg7[%c0_11, %c0_12, %c0_13] : memref<4x1x32xf32, #tpu.memory_space<vmem>>, vector<1x1x32xf32>
    %15 = vector.shape_cast %14 : vector<1x1x32xf32> to vector<1x32xf32>
    %16 = vector.broadcast %15 : vector<1x32xf32> to vector<16x32xf32>
    %17 = arith.addf %13, %16 : vector<16x32xf32>
    %c0_14 = arith.constant 0 : index
    %c0_15 = arith.constant 0 : index
    %c0_16 = arith.constant 0 : index
    %c0_17 = arith.constant 0 : index
    %18 = vector.load %arg4[%c0_14, %c0_15, %c0_16, %c0_17] : memref<1x4x24x32xbf16, #tpu.memory_space<vmem>>, vector<1x1x24x32xbf16>
    %19 = vector.shape_cast %18 : vector<1x1x24x32xbf16> to vector<24x32xbf16>
    %c0_18 = arith.constant 0 : index
    %c0_19 = arith.constant 0 : index
    %c0_20 = arith.constant 0 : index
    %c0_21 = arith.constant 0 : index
    %20 = vector.load %arg5[%c0_18, %c0_19, %c0_20, %c0_21] : memref<1x4x24x32xbf16, #tpu.memory_space<vmem>>, vector<1x1x24x32xbf16>
    %21 = vector.shape_cast %20 : vector<1x1x24x32xbf16> to vector<24x32xbf16>
    %22 = arith.truncf %17 : vector<16x32xf32> to vector<16x32xbf16>
    %cst_22 = arith.constant dense<0.000000e+00> : vector<16x24xf32>
    %23 = tpu.matmul %22, %19, %cst_22 {dimension_numbers = #tpu.dot_dimension_numbers<[1], [1], [0], [0], [0, 0, 1, 0], [], []>} : vector<16x32xbf16>, vector<24x32xbf16>, vector<16x24xf32> -> vector<16x24xf32>
    %cst_23 = arith.constant -1.000000e+30 : f32
    %24 = vector.shape_cast %8 : vector<1x24xi1> to vector<1x24xi1>
    %25 = vector.broadcast %24 : vector<1x24xi1> to vector<16x24xi1>
    %26 = vector.broadcast %cst_23 : f32 to vector<16x24xf32>
    %27 = arith.select %25, %23, %26 : vector<16x24xi1>, vector<16x24xf32>
    %cst_24 = arith.constant dense<0xFF800000> : vector<16xf32>
    %28 = vector.multi_reduction <maximumf>, %27, %cst_24 [1] : vector<16x24xf32> to vector<16xf32>
    %29 = vector.shape_cast %28 : vector<16xf32> to vector<16x1xf32>
    %30 = vector.broadcast %29 : vector<16x1xf32> to vector<16x24xf32>
    %31 = arith.subf %27, %30 : vector<16x24xf32>
    %32 = math.exp %31 : vector<16x24xf32>
    %cst_25 = arith.constant dense<0.000000e+00> : vector<16xf32>
    %33 = vector.multi_reduction <add>, %32, %cst_25 [1] : vector<16x24xf32> to vector<16xf32>
    %34 = vector.shape_cast %33 : vector<16xf32> to vector<16x1xf32>
    %35 = tpu.reciprocal %34 {approx = true} : vector<16x1xf32> -> vector<16x1xf32>
    %36 = vector.broadcast %35 : vector<16x1xf32> to vector<16x24xf32>
    %37 = arith.mulf %32, %36 : vector<16x24xf32>
    %38 = arith.truncf %37 : vector<16x24xf32> to vector<16x24xbf16>
    %cst_26 = arith.constant dense<0.000000e+00> : vector<16x32xf32>
    %39 = tpu.matmul %38, %21, %cst_26 {dimension_numbers = #tpu.dot_dimension_numbers<[1], [0], [0], [1], [0, 0, 1, 1], [], []>} : vector<16x24xbf16>, vector<24x32xbf16>, vector<16x32xf32> -> vector<16x32xf32>
    %c0_27 = arith.constant 0 : index
    %c0_28 = arith.constant 0 : index
    %40 = vector.load %arg13[%c0_27, %c0_28] : memref<16x128xf32, #tpu.memory_space<vmem>>, vector<16x128xf32>
    %41 = arith.truncf %39 : vector<16x32xf32> to vector<16x32xbf16>
    %c0_29 = arith.constant 0 : index
    %c0_30 = arith.constant 0 : index
    %c0_31 = arith.constant 0 : index
    %42 = vector.load %arg8[%c0_29, %c0_30, %c0_31] : memref<4x32x128xbf16, #tpu.memory_space<vmem>>, vector<1x32x128xbf16>
    %43 = vector.shape_cast %42 : vector<1x32x128xbf16> to vector<32x128xbf16>
    %cst_32 = arith.constant dense<0.000000e+00> : vector<16x128xf32>
    %44 = tpu.matmul %41, %43, %cst_32 {dimension_numbers = #tpu.dot_dimension_numbers<[1], [0], [0], [1], [0, 0, 1, 1], [], []>} : vector<16x32xbf16>, vector<32x128xbf16>, vector<16x128xf32> -> vector<16x128xf32>
    %45 = arith.addf %40, %44 : vector<16x128xf32>
    %c0_33 = arith.constant 0 : index
    %c0_34 = arith.constant 0 : index
    %46 = vector.load %arg13[%c0_33, %c0_34] : memref<16x128xf32, #tpu.memory_space<vmem>>, vector<16x128xf32>
    tpu.vector_store %arg13[%c0_33, %c0_34], %45 {strides = array<i32>} : memref<16x128xf32, #tpu.memory_space<vmem>>, vector<16x128xf32>,
    %c1 = arith.constant 1 : index
    %c0_35 = arith.constant 0 : index
    %c0_36 = arith.constant 0 : index
    %47 = vector.load %arg6[%c1, %c0_35, %c0_36] : memref<4x128x32xbf16, #tpu.memory_space<vmem>>, vector<1x128x32xbf16>
    %48 = vector.shape_cast %47 : vector<1x128x32xbf16> to vector<128x32xbf16>
    %cst_37 = arith.constant dense<0.000000e+00> : vector<16x32xf32>
    %49 = tpu.matmul %5, %48, %cst_37 {dimension_numbers = #tpu.dot_dimension_numbers<[1], [0], [0], [1], [0, 0, 1, 1], [], []>} : vector<16x128xbf16>, vector<128x32xbf16>, vector<16x32xf32> -> vector<16x32xf32>
    %c1_38 = arith.constant 1 : index
    %c0_39 = arith.constant 0 : index
    %c0_40 = arith.constant 0 : index
    %50 = vector.load %arg7[%c1_38, %c0_39, %c0_40] : memref<4x1x32xf32, #tpu.memory_space<vmem>>, vector<1x1x32xf32>
    %51 = vector.shape_cast %50 : vector<1x1x32xf32> to vector<1x32xf32>
    %52 = vector.broadcast %51 : vector<1x32xf32> to vector<16x32xf32>
    %53 = arith.addf %49, %52 : vector<16x32xf32>
    %c0_41 = arith.constant 0 : index
    %c1_42 = arith.constant 1 : index
    %c0_43 = arith.constant 0 : index
    %c0_44 = arith.constant 0 : index
    %54 = vector.load %arg4[%c0_41, %c1_42, %c0_43, %c0_44] : memref<1x4x24x32xbf16, #tpu.memory_space<vmem>>, vector<1x1x24x32xbf16>
    %55 = vector.shape_cast %54 : vector<1x1x24x32xbf16> to vector<24x32xbf16>
    %c0_45 = arith.constant 0 : index
    %c1_46 = arith.constant 1 : index
    %c0_47 = arith.constant 0 : index
    %c0_48 = arith.constant 0 : index
    %56 = vector.load %arg5[%c0_45, %c1_46, %c0_47, %c0_48] : memref<1x4x24x32xbf16, #tpu.memory_space<vmem>>, vector<1x1x24x32xbf16>
    %57 = vector.shape_cast %56 : vector<1x1x24x32xbf16> to vector<24x32xbf16>
    %58 = arith.truncf %53 : vector<16x32xf32> to vector<16x32xbf16>
    %cst_49 = arith.constant dense<0.000000e+00> : vector<16x24xf32>
    %59 = tpu.matmul %58, %55, %cst_49 {dimension_numbers = #tpu.dot_dimension_numbers<[1], [1], [0], [0], [0, 0, 1, 0], [], []>} : vector<16x32xbf16>, vector<24x32xbf16>, vector<16x24xf32> -> vector<16x24xf32>
    %cst_50 = arith.constant -1.000000e+30 : f32
    %60 = vector.shape_cast %8 : vector<1x24xi1> to vector<1x24xi1>
    %61 = vector.broadcast %60 : vector<1x24xi1> to vector<16x24xi1>
    %62 = vector.broadcast %cst_50 : f32 to vector<16x24xf32>
    %63 = arith.select %61, %59, %62 : vector<16x24xi1>, vector<16x24xf32>
    %cst_51 = arith.constant dense<0xFF800000> : vector<16xf32>
    %64 = vector.multi_reduction <maximumf>, %63, %cst_51 [1] : vector<16x24xf32> to vector<16xf32>
    %65 = vector.shape_cast %64 : vector<16xf32> to vector<16x1xf32>
    %66 = vector.broadcast %65 : vector<16x1xf32> to vector<16x24xf32>
    %67 = arith.subf %63, %66 : vector<16x24xf32>
    %68 = math.exp %67 : vector<16x24xf32>
    %cst_52 = arith.constant dense<0.000000e+00> : vector<16xf32>
    %69 = vector.multi_reduction <add>, %68, %cst_52 [1] : vector<16x24xf32> to vector<16xf32>
    %70 = vector.shape_cast %69 : vector<16xf32> to vector<16x1xf32>
    %71 = tpu.reciprocal %70 {approx = true} : vector<16x1xf32> -> vector<16x1xf32>
    %72 = vector.broadcast %71 : vector<16x1xf32> to vector<16x24xf32>
    %73 = arith.mulf %68, %72 : vector<16x24xf32>
    %74 = arith.truncf %73 : vector<16x24xf32> to vector<16x24xbf16>
    %cst_53 = arith.constant dense<0.000000e+00> : vector<16x32xf32>
    %75 = tpu.matmul %74, %57, %cst_53 {dimension_numbers = #tpu.dot_dimension_numbers<[1], [0], [0], [1], [0, 0, 1, 1], [], []>} : vector<16x24xbf16>, vector<24x32xbf16>, vector<16x32xf32> -> vector<16x32xf32>
    %c0_54 = arith.constant 0 : index
    %c0_55 = arith.constant 0 : index
    %76 = vector.load %arg13[%c0_54, %c0_55] : memref<16x128xf32, #tpu.memory_space<vmem>>, vector<16x128xf32>
    %77 = arith.truncf %75 : vector<16x32xf32> to vector<16x32xbf16>
    %c1_56 = arith.constant 1 : index
    %c0_57 = arith.constant 0 : index
    %c0_58 = arith.constant 0 : index
    %78 = vector.load %arg8[%c1_56, %c0_57, %c0_58] : memref<4x32x128xbf16, #tpu.memory_space<vmem>>, vector<1x32x128xbf16>
    %79 = vector.shape_cast %78 : vector<1x32x128xbf16> to vector<32x128xbf16>
    %cst_59 = arith.constant dense<0.000000e+00> : vector<16x128xf32>
    %80 = tpu.matmul %77, %79, %cst_59 {dimension_numbers = #tpu.dot_dimension_numbers<[1], [0], [0], [1], [0, 0, 1, 1], [], []>} : vector<16x32xbf16>, vector<32x128xbf16>, vector<16x128xf32> -> vector<16x128xf32>
    %81 = arith.addf %76, %80 : vector<16x128xf32>
    %c0_60 = arith.constant 0 : index
    %c0_61 = arith.constant 0 : index
    %82 = vector.load %arg13[%c0_60, %c0_61] : memref<16x128xf32, #tpu.memory_space<vmem>>, vector<16x128xf32>
    tpu.vector_store %arg13[%c0_60, %c0_61], %81 {strides = array<i32>} : memref<16x128xf32, #tpu.memory_space<vmem>>, vector<16x128xf32>,
    %c2 = arith.constant 2 : index
    %c0_62 = arith.constant 0 : index
    %c0_63 = arith.constant 0 : index
    %83 = vector.load %arg6[%c2, %c0_62, %c0_63] : memref<4x128x32xbf16, #tpu.memory_space<vmem>>, vector<1x128x32xbf16>
    %84 = vector.shape_cast %83 : vector<1x128x32xbf16> to vector<128x32xbf16>
    %cst_64 = arith.constant dense<0.000000e+00> : vector<16x32xf32>
    %85 = tpu.matmul %5, %84, %cst_64 {dimension_numbers = #tpu.dot_dimension_numbers<[1], [0], [0], [1], [0, 0, 1, 1], [], []>} : vector<16x128xbf16>, vector<128x32xbf16>, vector<16x32xf32> -> vector<16x32xf32>
    %c2_65 = arith.constant 2 : index
    %c0_66 = arith.constant 0 : index
    %c0_67 = arith.constant 0 : index
    %86 = vector.load %arg7[%c2_65, %c0_66, %c0_67] : memref<4x1x32xf32, #tpu.memory_space<vmem>>, vector<1x1x32xf32>
    %87 = vector.shape_cast %86 : vector<1x1x32xf32> to vector<1x32xf32>
    %88 = vector.broadcast %87 : vector<1x32xf32> to vector<16x32xf32>
    %89 = arith.addf %85, %88 : vector<16x32xf32>
    %c0_68 = arith.constant 0 : index
    %c2_69 = arith.constant 2 : index
    %c0_70 = arith.constant 0 : index
    %c0_71 = arith.constant 0 : index
    %90 = vector.load %arg4[%c0_68, %c2_69, %c0_70, %c0_71] : memref<1x4x24x32xbf16, #tpu.memory_space<vmem>>, vector<1x1x24x32xbf16>
    %91 = vector.shape_cast %90 : vector<1x1x24x32xbf16> to vector<24x32xbf16>
    %c0_72 = arith.constant 0 : index
    %c2_73 = arith.constant 2 : index
    %c0_74 = arith.constant 0 : index
    %c0_75 = arith.constant 0 : index
    %92 = vector.load %arg5[%c0_72, %c2_73, %c0_74, %c0_75] : memref<1x4x24x32xbf16, #tpu.memory_space<vmem>>, vector<1x1x24x32xbf16>
    %93 = vector.shape_cast %92 : vector<1x1x24x32xbf16> to vector<24x32xbf16>
    %94 = arith.truncf %89 : vector<16x32xf32> to vector<16x32xbf16>
    %cst_76 = arith.constant dense<0.000000e+00> : vector<16x24xf32>
    %95 = tpu.matmul %94, %91, %cst_76 {dimension_numbers = #tpu.dot_dimension_numbers<[1], [1], [0], [0], [0, 0, 1, 0], [], []>} : vector<16x32xbf16>, vector<24x32xbf16>, vector<16x24xf32> -> vector<16x24xf32>
    %cst_77 = arith.constant -1.000000e+30 : f32
    %96 = vector.shape_cast %8 : vector<1x24xi1> to vector<1x24xi1>
    %97 = vector.broadcast %96 : vector<1x24xi1> to vector<16x24xi1>
    %98 = vector.broadcast %cst_77 : f32 to vector<16x24xf32>
    %99 = arith.select %97, %95, %98 : vector<16x24xi1>, vector<16x24xf32>
    %cst_78 = arith.constant dense<0xFF800000> : vector<16xf32>
    %100 = vector.multi_reduction <maximumf>, %99, %cst_78 [1] : vector<16x24xf32> to vector<16xf32>
    %101 = vector.shape_cast %100 : vector<16xf32> to vector<16x1xf32>
    %102 = vector.broadcast %101 : vector<16x1xf32> to vector<16x24xf32>
    %103 = arith.subf %99, %102 : vector<16x24xf32>
    %104 = math.exp %103 : vector<16x24xf32>
    %cst_79 = arith.constant dense<0.000000e+00> : vector<16xf32>
    %105 = vector.multi_reduction <add>, %104, %cst_79 [1] : vector<16x24xf32> to vector<16xf32>
    %106 = vector.shape_cast %105 : vector<16xf32> to vector<16x1xf32>
    %107 = tpu.reciprocal %106 {approx = true} : vector<16x1xf32> -> vector<16x1xf32>
    %108 = vector.broadcast %107 : vector<16x1xf32> to vector<16x24xf32>
    %109 = arith.mulf %104, %108 : vector<16x24xf32>
    %110 = arith.truncf %109 : vector<16x24xf32> to vector<16x24xbf16>
    %cst_80 = arith.constant dense<0.000000e+00> : vector<16x32xf32>
    %111 = tpu.matmul %110, %93, %cst_80 {dimension_numbers = #tpu.dot_dimension_numbers<[1], [0], [0], [1], [0, 0, 1, 1], [], []>} : vector<16x24xbf16>, vector<24x32xbf16>, vector<16x32xf32> -> vector<16x32xf32>
    %c0_81 = arith.constant 0 : index
    %c0_82 = arith.constant 0 : index
    %112 = vector.load %arg13[%c0_81, %c0_82] : memref<16x128xf32, #tpu.memory_space<vmem>>, vector<16x128xf32>
    %113 = arith.truncf %111 : vector<16x32xf32> to vector<16x32xbf16>
    %c2_83 = arith.constant 2 : index
    %c0_84 = arith.constant 0 : index
    %c0_85 = arith.constant 0 : index
    %114 = vector.load %arg8[%c2_83, %c0_84, %c0_85] : memref<4x32x128xbf16, #tpu.memory_space<vmem>>, vector<1x32x128xbf16>
    %115 = vector.shape_cast %114 : vector<1x32x128xbf16> to vector<32x128xbf16>
    %cst_86 = arith.constant dense<0.000000e+00> : vector<16x128xf32>
    %116 = tpu.matmul %113, %115, %cst_86 {dimension_numbers = #tpu.dot_dimension_numbers<[1], [0], [0], [1], [0, 0, 1, 1], [], []>} : vector<16x32xbf16>, vector<32x128xbf16>, vector<16x128xf32> -> vector<16x128xf32>
    %117 = arith.addf %112, %116 : vector<16x128xf32>
    %c0_87 = arith.constant 0 : index
    %c0_88 = arith.constant 0 : index
    %118 = vector.load %arg13[%c0_87, %c0_88] : memref<16x128xf32, #tpu.memory_space<vmem>>, vector<16x128xf32>
    tpu.vector_store %arg13[%c0_87, %c0_88], %117 {strides = array<i32>} : memref<16x128xf32, #tpu.memory_space<vmem>>, vector<16x128xf32>,
    %c3 = arith.constant 3 : index
    %c0_89 = arith.constant 0 : index
    %c0_90 = arith.constant 0 : index
    %119 = vector.load %arg6[%c3, %c0_89, %c0_90] : memref<4x128x32xbf16, #tpu.memory_space<vmem>>, vector<1x128x32xbf16>
    %120 = vector.shape_cast %119 : vector<1x128x32xbf16> to vector<128x32xbf16>
    %cst_91 = arith.constant dense<0.000000e+00> : vector<16x32xf32>
    %121 = tpu.matmul %5, %120, %cst_91 {dimension_numbers = #tpu.dot_dimension_numbers<[1], [0], [0], [1], [0, 0, 1, 1], [], []>} : vector<16x128xbf16>, vector<128x32xbf16>, vector<16x32xf32> -> vector<16x32xf32>
    %c3_92 = arith.constant 3 : index
    %c0_93 = arith.constant 0 : index
    %c0_94 = arith.constant 0 : index
    %122 = vector.load %arg7[%c3_92, %c0_93, %c0_94] : memref<4x1x32xf32, #tpu.memory_space<vmem>>, vector<1x1x32xf32>
    %123 = vector.shape_cast %122 : vector<1x1x32xf32> to vector<1x32xf32>
    %124 = vector.broadcast %123 : vector<1x32xf32> to vector<16x32xf32>
    %125 = arith.addf %121, %124 : vector<16x32xf32>
    %c0_95 = arith.constant 0 : index
    %c3_96 = arith.constant 3 : index
    %c0_97 = arith.constant 0 : index
    %c0_98 = arith.constant 0 : index
    %126 = vector.load %arg4[%c0_95, %c3_96, %c0_97, %c0_98] : memref<1x4x24x32xbf16, #tpu.memory_space<vmem>>, vector<1x1x24x32xbf16>
    %127 = vector.shape_cast %126 : vector<1x1x24x32xbf16> to vector<24x32xbf16>
    %c0_99 = arith.constant 0 : index
    %c3_100 = arith.constant 3 : index
    %c0_101 = arith.constant 0 : index
    %c0_102 = arith.constant 0 : index
    %128 = vector.load %arg5[%c0_99, %c3_100, %c0_101, %c0_102] : memref<1x4x24x32xbf16, #tpu.memory_space<vmem>>, vector<1x1x24x32xbf16>
    %129 = vector.shape_cast %128 : vector<1x1x24x32xbf16> to vector<24x32xbf16>
    %130 = arith.truncf %125 : vector<16x32xf32> to vector<16x32xbf16>
    %cst_103 = arith.constant dense<0.000000e+00> : vector<16x24xf32>
    %131 = tpu.matmul %130, %127, %cst_103 {dimension_numbers = #tpu.dot_dimension_numbers<[1], [1], [0], [0], [0, 0, 1, 0], [], []>} : vector<16x32xbf16>, vector<24x32xbf16>, vector<16x24xf32> -> vector<16x24xf32>
    %cst_104 = arith.constant -1.000000e+30 : f32
    %132 = vector.shape_cast %8 : vector<1x24xi1> to vector<1x24xi1>
    %133 = vector.broadcast %132 : vector<1x24xi1> to vector<16x24xi1>
    %134 = vector.broadcast %cst_104 : f32 to vector<16x24xf32>
    %135 = arith.select %133, %131, %134 : vector<16x24xi1>, vector<16x24xf32>
    %cst_105 = arith.constant dense<0xFF800000> : vector<16xf32>
    %136 = vector.multi_reduction <maximumf>, %135, %cst_105 [1] : vector<16x24xf32> to vector<16xf32>
    %137 = vector.shape_cast %136 : vector<16xf32> to vector<16x1xf32>
    %138 = vector.broadcast %137 : vector<16x1xf32> to vector<16x24xf32>
    %139 = arith.subf %135, %138 : vector<16x24xf32>
    %140 = math.exp %139 : vector<16x24xf32>
    %cst_106 = arith.constant dense<0.000000e+00> : vector<16xf32>
    %141 = vector.multi_reduction <add>, %140, %cst_106 [1] : vector<16x24xf32> to vector<16xf32>
    %142 = vector.shape_cast %141 : vector<16xf32> to vector<16x1xf32>
    %143 = tpu.reciprocal %142 {approx = true} : vector<16x1xf32> -> vector<16x1xf32>
    %144 = vector.broadcast %143 : vector<16x1xf32> to vector<16x24xf32>
    %145 = arith.mulf %140, %144 : vector<16x24xf32>
    %146 = arith.truncf %145 : vector<16x24xf32> to vector<16x24xbf16>
    %cst_107 = arith.constant dense<0.000000e+00> : vector<16x32xf32>
    %147 = tpu.matmul %146, %129, %cst_107 {dimension_numbers = #tpu.dot_dimension_numbers<[1], [0], [0], [1], [0, 0, 1, 1], [], []>} : vector<16x24xbf16>, vector<24x32xbf16>, vector<16x32xf32> -> vector<16x32xf32>
    %c0_108 = arith.constant 0 : index
    %c0_109 = arith.constant 0 : index
    %148 = vector.load %arg13[%c0_108, %c0_109] : memref<16x128xf32, #tpu.memory_space<vmem>>, vector<16x128xf32>
    %149 = arith.truncf %147 : vector<16x32xf32> to vector<16x32xbf16>
    %c3_110 = arith.constant 3 : index
    %c0_111 = arith.constant 0 : index
    %c0_112 = arith.constant 0 : index
    %150 = vector.load %arg8[%c3_110, %c0_111, %c0_112] : memref<4x32x128xbf16, #tpu.memory_space<vmem>>, vector<1x32x128xbf16>
    %151 = vector.shape_cast %150 : vector<1x32x128xbf16> to vector<32x128xbf16>
    %cst_113 = arith.constant dense<0.000000e+00> : vector<16x128xf32>
    %152 = tpu.matmul %149, %151, %cst_113 {dimension_numbers = #tpu.dot_dimension_numbers<[1], [0], [0], [1], [0, 0, 1, 1], [], []>} : vector<16x32xbf16>, vector<32x128xbf16>, vector<16x128xf32> -> vector<16x128xf32>
    %153 = arith.addf %148, %152 : vector<16x128xf32>
    %c0_114 = arith.constant 0 : index
    %c0_115 = arith.constant 0 : index
    %154 = vector.load %arg13[%c0_114, %c0_115] : memref<16x128xf32, #tpu.memory_space<vmem>>, vector<16x128xf32>
    tpu.vector_store %arg13[%c0_114, %c0_115], %153 {strides = array<i32>} : memref<16x128xf32, #tpu.memory_space<vmem>>, vector<16x128xf32>,
    %c0_116 = arith.constant 0 : index
    %c0_117 = arith.constant 0 : index
    %155 = vector.load %arg13[%c0_116, %c0_117] : memref<16x128xf32, #tpu.memory_space<vmem>>, vector<16x128xf32>
    %156 = arith.addf %1, %155 : vector<16x128xf32>
    %c0_118 = arith.constant 0 : index
    %c0_119 = arith.constant 0 : index
    %157 = vector.load %arg9[%c0_118, %c0_119] : memref<1x128xf32, #tpu.memory_space<vmem>>, vector<1x128xf32>
    %158 = vector.broadcast %157 : vector<1x128xf32> to vector<16x128xf32>
    %159 = arith.addf %156, %158 : vector<16x128xf32>
    %cst_120 = arith.constant dense<0.000000e+00> : vector<16xf32>
    %160 = vector.multi_reduction <add>, %159, %cst_120 [1] : vector<16x128xf32> to vector<16xf32>
    %161 = vector.shape_cast %160 : vector<16xf32> to vector<16x1xf32>
    %cst_121 = arith.constant 1.280000e+02 : f32
    %162 = vector.broadcast %cst_121 : f32 to vector<16x1xf32>
    %163 = arith.divf %161, %162 : vector<16x1xf32>
    %164 = vector.broadcast %163 : vector<16x1xf32> to vector<16x128xf32>
    %165 = arith.subf %159, %164 : vector<16x128xf32>
    %166 = arith.mulf %165, %165 : vector<16x128xf32>
    %cst_122 = arith.constant dense<0.000000e+00> : vector<16xf32>
    %167 = vector.multi_reduction <add>, %166, %cst_122 [1] : vector<16x128xf32> to vector<16xf32>
    %168 = vector.shape_cast %167 : vector<16xf32> to vector<16x1xf32>
    %cst_123 = arith.constant 1.280000e+02 : f32
    %169 = vector.broadcast %cst_123 : f32 to vector<16x1xf32>
    %170 = arith.divf %168, %169 : vector<16x1xf32>
    %cst_124 = arith.constant 9.99999974E-6 : f32
    %171 = vector.broadcast %cst_124 : f32 to vector<16x1xf32>
    %172 = arith.addf %170, %171 : vector<16x1xf32>
    %173 = math.rsqrt %172 : vector<16x1xf32>
    %174 = vector.broadcast %173 : vector<16x1xf32> to vector<16x128xf32>
    %175 = arith.mulf %165, %174 : vector<16x128xf32>
    %c0_125 = arith.constant 0 : index
    %c0_126 = arith.constant 0 : index
    %176 = vector.load %arg10[%c0_125, %c0_126] : memref<1x128xf32, #tpu.memory_space<vmem>>, vector<1x128xf32>
    %177 = vector.broadcast %176 : vector<1x128xf32> to vector<16x128xf32>
    %178 = arith.mulf %175, %177 : vector<16x128xf32>
    %c0_127 = arith.constant 0 : index
    %c0_128 = arith.constant 0 : index
    %179 = vector.load %arg11[%c0_127, %c0_128] : memref<1x128xf32, #tpu.memory_space<vmem>>, vector<1x128xf32>
    %180 = vector.broadcast %179 : vector<1x128xf32> to vector<16x128xf32>
    %181 = arith.addf %178, %180 : vector<16x128xf32>
    %c0_129 = arith.constant 0 : index
    %c0_130 = arith.constant 0 : index
    %c0_131 = arith.constant 0 : index
    %182 = vector.load %arg12[%c0_129, %c0_130, %c0_131] : memref<1x16x128xf32, #tpu.memory_space<vmem>>, vector<1x16x128xf32>
    %183 = vector.shape_cast %182 : vector<1x16x128xf32> to vector<16x128xf32>
    %184 = vector.shape_cast %181 : vector<16x128xf32> to vector<1x16x128xf32>
    tpu.vector_store %arg12[%c0_129, %c0_130, %c0_131], %184 {strides = array<i32>} : memref<1x16x128xf32, #tpu.memory_space<vmem>>, vector<1x16x128xf32>,
    return
  }
  func.func @transform_0(%arg0: i32, %arg1: i32) -> (i32, i32, i32) {
    %c0_i32 = arith.constant 0 : i32
    %c0_i32_0 = arith.constant 0 : i32
    return %arg0, %arg1, %c0_i32 : i32, i32, i32
  }
  func.func @transform_1(%arg0: i32, %arg1: i32) -> (i32, i32, i32) {
    %c0_i32 = arith.constant 0 : i32
    %c0_i32_0 = arith.constant 0 : i32
    return %arg0, %arg1, %c0_i32 : i32, i32, i32
  }
  func.func @transform_2(%arg0: i32, %arg1: i32) -> (i32, i32, i32, i32) {
    %c0_i32 = arith.constant 0 : i32
    %c0_i32_0 = arith.constant 0 : i32
    %c0_i32_1 = arith.constant 0 : i32
    %c0_i32_2 = arith.constant 0 : i32
    return %arg0, %c0_i32, %c0_i32_0, %c0_i32_1 : i32, i32, i32, i32
  }
  func.func @transform_3(%arg0: i32, %arg1: i32) -> (i32, i32, i32, i32) {
    %c0_i32 = arith.constant 0 : i32
    %c0_i32_0 = arith.constant 0 : i32
    %c0_i32_1 = arith.constant 0 : i32
    %c0_i32_2 = arith.constant 0 : i32
    return %arg0, %c0_i32, %c0_i32_0, %c0_i32_1 : i32, i32, i32, i32
  }
  func.func @transform_4(%arg0: i32, %arg1: i32) -> (i32, i32, i32) {
    %c0_i32 = arith.constant 0 : i32
    %c0_i32_0 = arith.constant 0 : i32
    %c0_i32_1 = arith.constant 0 : i32
    %c0_i32_2 = arith.constant 0 : i32
    return %c0_i32, %c0_i32_0, %c0_i32_1 : i32, i32, i32
  }
  func.func @transform_5(%arg0: i32, %arg1: i32) -> (i32, i32, i32) {
    %c0_i32 = arith.constant 0 : i32
    %c0_i32_0 = arith.constant 0 : i32
    %c0_i32_1 = arith.constant 0 : i32
    %c0_i32_2 = arith.constant 0 : i32
    return %c0_i32, %c0_i32_0, %c0_i32_1 : i32, i32, i32
  }
  func.func @transform_6(%arg0: i32, %arg1: i32) -> (i32, i32, i32) {
    %c0_i32 = arith.constant 0 : i32
    %c0_i32_0 = arith.constant 0 : i32
    %c0_i32_1 = arith.constant 0 : i32
    %c0_i32_2 = arith.constant 0 : i32
    return %c0_i32, %c0_i32_0, %c0_i32_1 : i32, i32, i32
  }
  func.func @transform_7(%arg0: i32, %arg1: i32) -> (i32, i32) {
    %c0_i32 = arith.constant 0 : i32
    %c0_i32_0 = arith.constant 0 : i32
    %c0_i32_1 = arith.constant 0 : i32
    return %c0_i32, %c0_i32_0 : i32, i32
  }
  func.func @transform_8(%arg0: i32, %arg1: i32) -> (i32, i32) {
    %c0_i32 = arith.constant 0 : i32
    %c0_i32_0 = arith.constant 0 : i32
    %c0_i32_1 = arith.constant 0 : i32
    return %c0_i32, %c0_i32_0 : i32, i32
  }
  func.func @transform_9(%arg0: i32, %arg1: i32) -> (i32, i32) {
    %c0_i32 = arith.constant 0 : i32
    %c0_i32_0 = arith.constant 0 : i32
    %c0_i32_1 = arith.constant 0 : i32
    return %c0_i32, %c0_i32_0 : i32, i32
  }
  func.func @transform_10(%arg0: i32, %arg1: i32) -> (i32, i32, i32) {
    %c0_i32 = arith.constant 0 : i32
    %c0_i32_0 = arith.constant 0 : i32
    return %arg0, %arg1, %c0_i32 : i32, i32, i32
  }
}

module attributes {stable_mosaic.version = 11 : i64} {
  func.func @_ffn_block_kernel(%arg0: i32, %arg1: i32, %arg2: i32, %arg3: memref<1x16x128xf32, #tpu.memory_space<vmem>>, %arg4: memref<1x16x128xf32, #tpu.memory_space<vmem>>, %arg5: memref<1x16x128xf32, #tpu.memory_space<vmem>>, %arg6: memref<128x256xbf16, #tpu.memory_space<vmem>>, %arg7: memref<1x256xf32, #tpu.memory_space<vmem>>, %arg8: memref<256x128xbf16, #tpu.memory_space<vmem>>, %arg9: memref<1x128xf32, #tpu.memory_space<vmem>>, %arg10: memref<1x128xf32, #tpu.memory_space<vmem>>, %arg11: memref<1x128xf32, #tpu.memory_space<vmem>>, %arg12: memref<1x16x128xf32, #tpu.memory_space<vmem>>, %arg13: memref<16x128xf32, #tpu.memory_space<vmem>>) attributes {dimension_semantics = [#tpu.dimension_semantics<parallel>, #tpu.dimension_semantics<parallel>, #tpu.dimension_semantics<arbitrary>], iteration_bounds = array<i64: 2, 1, 1>, scalar_prefetch = 0 : i64, scratch_operands = 1 : i64, tpu.core_type = #tpu.core_type<tc>, window_params = [{transform_indices = @transform_0, window_bounds = array<i64: 1, 16, 128>}, {transform_indices = @transform_1, window_bounds = array<i64: 1, 16, 128>}, {transform_indices = @transform_2, window_bounds = array<i64: 1, 16, 128>}, {transform_indices = @transform_3, window_bounds = array<i64: 128, 256>}, {transform_indices = @transform_4, window_bounds = array<i64: 1, 256>}, {transform_indices = @transform_5, window_bounds = array<i64: 256, 128>}, {pipeline_mode = #tpu.pipeline_mode<synchronous>, transform_indices = @transform_6, window_bounds = array<i64: 1, 128>}, {pipeline_mode = #tpu.pipeline_mode<synchronous>, transform_indices = @transform_7, window_bounds = array<i64: 1, 128>}, {pipeline_mode = #tpu.pipeline_mode<synchronous>, transform_indices = @transform_8, window_bounds = array<i64: 1, 128>}, {transform_indices = @transform_9, window_bounds = array<i64: 1, 16, 128>}]} {
    %c0_i32 = arith.constant 0 : i32
    %0 = arith.cmpi eq, %arg2, %c0_i32 : i32
    %1 = arith.extui %0 : i1 to i32
    %c0_i32_0 = arith.constant 0 : i32
    %2 = arith.cmpi ne, %1, %c0_i32_0 : i32
    scf.if %2 {
      %cst_17 = arith.constant 0.000000e+00 : f32
      %22 = vector.broadcast %cst_17 : f32 to vector<16x128xf32>
      %c0_18 = arith.constant 0 : index
      %c0_19 = arith.constant 0 : index
      %23 = vector.load %arg13[%c0_18, %c0_19] : memref<16x128xf32, #tpu.memory_space<vmem>>, vector<16x128xf32>
      tpu.vector_store %arg13[%c0_18, %c0_19], %22 {strides = array<i32>} : memref<16x128xf32, #tpu.memory_space<vmem>>, vector<16x128xf32>,
    } else {
    }
    %c0 = arith.constant 0 : index
    %c0_1 = arith.constant 0 : index
    %c0_2 = arith.constant 0 : index
    %3 = vector.load %arg3[%c0, %c0_1, %c0_2] : memref<1x16x128xf32, #tpu.memory_space<vmem>>, vector<1x16x128xf32>
    %4 = vector.shape_cast %3 : vector<1x16x128xf32> to vector<16x128xf32>
    %5 = arith.truncf %4 : vector<16x128xf32> to vector<16x128xbf16>
    %c0_3 = arith.constant 0 : index
    %c0_4 = arith.constant 0 : index
    %6 = vector.load %arg6[%c0_3, %c0_4] : memref<128x256xbf16, #tpu.memory_space<vmem>>, vector<128x256xbf16>
    %cst = arith.constant dense<0.000000e+00> : vector<16x256xf32>
    %7 = tpu.matmul %5, %6, %cst {dimension_numbers = #tpu.dot_dimension_numbers<[1], [0], [0], [1], [0, 0, 1, 1], [], []>} : vector<16x128xbf16>, vector<128x256xbf16>, vector<16x256xf32> -> vector<16x256xf32>
    %c0_5 = arith.constant 0 : index
    %c0_6 = arith.constant 0 : index
    %8 = vector.load %arg7[%c0_5, %c0_6] : memref<1x256xf32, #tpu.memory_space<vmem>>, vector<1x256xf32>
    %9 = vector.broadcast %8 : vector<1x256xf32> to vector<16x256xf32>
    %10 = arith.addf %7, %9 : vector<16x256xf32>
    %cst_7 = arith.constant 0.000000e+00 : f32
    %11 = vector.broadcast %cst_7 : f32 to vector<16x256xf32>
    %12 = arith.maximumf %10, %11 : vector<16x256xf32>
    %c0_8 = arith.constant 0 : index
    %c0_9 = arith.constant 0 : index
    %13 = vector.load %arg13[%c0_8, %c0_9] : memref<16x128xf32, #tpu.memory_space<vmem>>, vector<16x128xf32>
    %14 = arith.truncf %12 : vector<16x256xf32> to vector<16x256xbf16>
    %c0_10 = arith.constant 0 : index
    %c0_11 = arith.constant 0 : index
    %15 = vector.load %arg8[%c0_10, %c0_11] : memref<256x128xbf16, #tpu.memory_space<vmem>>, vector<256x128xbf16>
    %cst_12 = arith.constant dense<0.000000e+00> : vector<16x128xf32>
    %16 = tpu.matmul %14, %15, %cst_12 {dimension_numbers = #tpu.dot_dimension_numbers<[1], [0], [0], [1], [0, 0, 1, 1], [], []>} : vector<16x256xbf16>, vector<256x128xbf16>, vector<16x128xf32> -> vector<16x128xf32>
    %17 = arith.addf %13, %16 : vector<16x128xf32>
    %c0_13 = arith.constant 0 : index
    %c0_14 = arith.constant 0 : index
    %18 = vector.load %arg13[%c0_13, %c0_14] : memref<16x128xf32, #tpu.memory_space<vmem>>, vector<16x128xf32>
    tpu.vector_store %arg13[%c0_13, %c0_14], %17 {strides = array<i32>} : memref<16x128xf32, #tpu.memory_space<vmem>>, vector<16x128xf32>,
    %c0_i32_15 = arith.constant 0 : i32
    %19 = arith.cmpi eq, %arg2, %c0_i32_15 : i32
    %20 = arith.extui %19 : i1 to i32
    %c0_i32_16 = arith.constant 0 : i32
    %21 = arith.cmpi ne, %20, %c0_i32_16 : i32
    scf.if %21 {
      %c0_17 = arith.constant 0 : index
      %c0_18 = arith.constant 0 : index
      %22 = vector.load %arg13[%c0_17, %c0_18] : memref<16x128xf32, #tpu.memory_space<vmem>>, vector<16x128xf32>
      %23 = arith.addf %4, %22 : vector<16x128xf32>
      %c0_19 = arith.constant 0 : index
      %c0_20 = arith.constant 0 : index
      %24 = vector.load %arg9[%c0_19, %c0_20] : memref<1x128xf32, #tpu.memory_space<vmem>>, vector<1x128xf32>
      %25 = vector.broadcast %24 : vector<1x128xf32> to vector<16x128xf32>
      %26 = arith.addf %23, %25 : vector<16x128xf32>
      %cst_21 = arith.constant dense<0.000000e+00> : vector<16xf32>
      %27 = vector.multi_reduction <add>, %26, %cst_21 [1] : vector<16x128xf32> to vector<16xf32>
      %28 = vector.shape_cast %27 : vector<16xf32> to vector<16x1xf32>
      %cst_22 = arith.constant 1.280000e+02 : f32
      %29 = vector.broadcast %cst_22 : f32 to vector<16x1xf32>
      %30 = arith.divf %28, %29 : vector<16x1xf32>
      %31 = vector.broadcast %30 : vector<16x1xf32> to vector<16x128xf32>
      %32 = arith.subf %26, %31 : vector<16x128xf32>
      %33 = arith.mulf %32, %32 : vector<16x128xf32>
      %cst_23 = arith.constant dense<0.000000e+00> : vector<16xf32>
      %34 = vector.multi_reduction <add>, %33, %cst_23 [1] : vector<16x128xf32> to vector<16xf32>
      %35 = vector.shape_cast %34 : vector<16xf32> to vector<16x1xf32>
      %cst_24 = arith.constant 1.280000e+02 : f32
      %36 = vector.broadcast %cst_24 : f32 to vector<16x1xf32>
      %37 = arith.divf %35, %36 : vector<16x1xf32>
      %cst_25 = arith.constant 9.99999974E-6 : f32
      %38 = vector.broadcast %cst_25 : f32 to vector<16x1xf32>
      %39 = arith.addf %37, %38 : vector<16x1xf32>
      %40 = math.rsqrt %39 : vector<16x1xf32>
      %41 = vector.broadcast %40 : vector<16x1xf32> to vector<16x128xf32>
      %42 = arith.mulf %32, %41 : vector<16x128xf32>
      %c0_26 = arith.constant 0 : index
      %c0_27 = arith.constant 0 : index
      %43 = vector.load %arg10[%c0_26, %c0_27] : memref<1x128xf32, #tpu.memory_space<vmem>>, vector<1x128xf32>
      %44 = vector.broadcast %43 : vector<1x128xf32> to vector<16x128xf32>
      %45 = arith.mulf %42, %44 : vector<16x128xf32>
      %c0_28 = arith.constant 0 : index
      %c0_29 = arith.constant 0 : index
      %46 = vector.load %arg11[%c0_28, %c0_29] : memref<1x128xf32, #tpu.memory_space<vmem>>, vector<1x128xf32>
      %47 = vector.broadcast %46 : vector<1x128xf32> to vector<16x128xf32>
      %48 = arith.addf %45, %47 : vector<16x128xf32>
      %c0_30 = arith.constant 0 : index
      %c0_31 = arith.constant 0 : index
      %c0_32 = arith.constant 0 : index
      %49 = vector.load %arg4[%c0_30, %c0_31, %c0_32] : memref<1x16x128xf32, #tpu.memory_space<vmem>>, vector<1x16x128xf32>
      %50 = vector.shape_cast %49 : vector<1x16x128xf32> to vector<16x128xf32>
      %51 = arith.addf %48, %50 : vector<16x128xf32>
      %c0_33 = arith.constant 0 : index
      %c0_34 = arith.constant 0 : index
      %c0_35 = arith.constant 0 : index
      %52 = vector.load %arg5[%c0_33, %c0_34, %c0_35] : memref<1x16x128xf32, #tpu.memory_space<vmem>>, vector<1x16x128xf32>
      %53 = vector.shape_cast %52 : vector<1x16x128xf32> to vector<16x128xf32>
      %54 = arith.addf %51, %53 : vector<16x128xf32>
      %c0_36 = arith.constant 0 : index
      %c0_37 = arith.constant 0 : index
      %c0_38 = arith.constant 0 : index
      %55 = vector.load %arg12[%c0_36, %c0_37, %c0_38] : memref<1x16x128xf32, #tpu.memory_space<vmem>>, vector<1x16x128xf32>
      %56 = vector.shape_cast %55 : vector<1x16x128xf32> to vector<16x128xf32>
      %57 = vector.shape_cast %54 : vector<16x128xf32> to vector<1x16x128xf32>
      tpu.vector_store %arg12[%c0_36, %c0_37, %c0_38], %57 {strides = array<i32>} : memref<1x16x128xf32, #tpu.memory_space<vmem>>, vector<1x16x128xf32>,
    } else {
    }
    return
  }
  func.func @transform_0(%arg0: i32, %arg1: i32, %arg2: i32) -> (i32, i32, i32) {
    %c0_i32 = arith.constant 0 : i32
    %c0_i32_0 = arith.constant 0 : i32
    return %arg0, %arg1, %c0_i32 : i32, i32, i32
  }
  func.func @transform_1(%arg0: i32, %arg1: i32, %arg2: i32) -> (i32, i32, i32) {
    %c0_i32 = arith.constant 0 : i32
    %c0_i32_0 = arith.constant 0 : i32
    return %arg0, %arg1, %c0_i32 : i32, i32, i32
  }
  func.func @transform_2(%arg0: i32, %arg1: i32, %arg2: i32) -> (i32, i32, i32) {
    %c0_i32 = arith.constant 0 : i32
    %c0_i32_0 = arith.constant 0 : i32
    return %arg0, %arg1, %c0_i32 : i32, i32, i32
  }
  func.func @transform_3(%arg0: i32, %arg1: i32, %arg2: i32) -> (i32, i32) {
    %c0_i32 = arith.constant 0 : i32
    %c0_i32_0 = arith.constant 0 : i32
    return %c0_i32, %arg2 : i32, i32
  }
  func.func @transform_4(%arg0: i32, %arg1: i32, %arg2: i32) -> (i32, i32) {
    %c0_i32 = arith.constant 0 : i32
    %c0_i32_0 = arith.constant 0 : i32
    return %c0_i32, %arg2 : i32, i32
  }
  func.func @transform_5(%arg0: i32, %arg1: i32, %arg2: i32) -> (i32, i32) {
    %c0_i32 = arith.constant 0 : i32
    %c0_i32_0 = arith.constant 0 : i32
    return %arg2, %c0_i32 : i32, i32
  }
  func.func @transform_6(%arg0: i32, %arg1: i32, %arg2: i32) -> (i32, i32) {
    %c0_i32 = arith.constant 0 : i32
    %c0_i32_0 = arith.constant 0 : i32
    %c0_i32_1 = arith.constant 0 : i32
    return %c0_i32, %c0_i32_0 : i32, i32
  }
  func.func @transform_7(%arg0: i32, %arg1: i32, %arg2: i32) -> (i32, i32) {
    %c0_i32 = arith.constant 0 : i32
    %c0_i32_0 = arith.constant 0 : i32
    %c0_i32_1 = arith.constant 0 : i32
    return %c0_i32, %c0_i32_0 : i32, i32
  }
  func.func @transform_8(%arg0: i32, %arg1: i32, %arg2: i32) -> (i32, i32) {
    %c0_i32 = arith.constant 0 : i32
    %c0_i32_0 = arith.constant 0 : i32
    %c0_i32_1 = arith.constant 0 : i32
    return %c0_i32, %c0_i32_0 : i32, i32
  }
  func.func @transform_9(%arg0: i32, %arg1: i32, %arg2: i32) -> (i32, i32, i32) {
    %c0_i32 = arith.constant 0 : i32
    %c0_i32_0 = arith.constant 0 : i32
    return %arg0, %arg1, %c0_i32 : i32, i32, i32
  }
}

</mosaic_0001>

<bundles_post_ra>
// kernel: transformer_decoder_layer.5
= control target key start
LH: loop header
LB: loop body
LE: loop exit
PB: predicated region body
PF: predicated region fallthrough
CT: control target
= control target key end

     0   :  { %s1797_s24 = smov 0   ;;  %s1799_s25 = smov 0   ;;  %s2108_s0 = inlined_call_operand.vmem [shape: f32[2,16,128], index: 0, kind: input, shape index: {}]   ;;  %s2109_s1 = inlined_call_operand.vmem [shape: f32[2,16,128], index: 1, kind: input, shape index: {}]   ;;  %s2110_s2 = inlined_call_operand.vmem [shape: bf16[4,128,32], index: 2, kind: input, shape index: {}]   ;;  %s2111_s3 = inlined_call_operand.vmem [shape: bf16[4,128,32], index: 3, kind: input, shape index: {}]   ;;  %s2112_s4 = inlined_call_operand.vmem [shape: f32[4,1,32], index: 4, kind: input, shape index: {}]   ;;  %s2113_s5 = inlined_call_operand.vmem [shape: f32[4,1,32], index: 5, kind: input, shape index: {}]   ;;  %s2114_s6 = inlined_call_operand.vmem [shape: bf16[2,4,16,32], index: 6, kind: output, shape index: {0}]   ;;  %s2115_s7 = inlined_call_operand.vmem [shape: bf16[2,4,16,32], index: 7, kind: output, shape index: {1}]  }
   0x1   :  { %s1801_s26 = smov 0  }
   0x2 LB: > { %s30_s27 = sadd.s32 1, %s1751_s25  ;;  %p1252_p0 = scmp.ge.s32.totalorder %s1755_s26, 1  ;;  %s1755_s26 = sphi %s1801_s26, %s18_s26   ;;  %s1751_s25 = sphi %s1799_s25, %s2117_s25   ;;  %s1747_s24 = sphi %s1797_s24, %s2116_s24  }
   0x3   : > { %p32_p1 = scmp.ge.s32.totalorder %s30_s27, 2  ;;  %p280_p2 = scmp.lt.s32.totalorder %s1755_s26, 3 }
   0x5   : > { %s2119_s27 = smov (%p32_p1, %s30_s27), 0  ;;  %p281_p3 = pnand %p1252_p0, %p280_p2 }
   0x6   : > { %p339_p4 = scmp.lt.s32.totalorder (!%p281_p3), %s1747_s24, 1 }
   0x7   : > { %284 = sbr.rel (%p281_p3) target bundleno = 224 (0xe0), region = 44 }
   0xc   : > { %v1644_v0 = vld [vmem:[%s2110_s2 + $0x38] sm:$0xff]  ;;  %v1643_v4 = vld [vmem:[%s2110_s2 + $0x30] sm:$0xff]  ;;  %v1642_v8 = vld [vmem:[%s2110_s2 + $0x28] sm:$0xff]  ;;  %s2121_s24 = smov (!%p339_p4, %s1747_s24), 1  ;;  %vm470_vm0 = vcmask 257024  }
   0xd   : > { %v1652_v1 = vld [vmem:[%s2111_s3 + $0x38] sm:$0xff]  ;;  %454 = vmatpush.bf16.msra.mxu0 %v1644_v0  ;;  %v1651_v5 = vld [vmem:[%s2111_s3 + $0x30] sm:$0xff]  ;;  %v1650_v9 = vld [vmem:[%s2111_s3 + $0x28] sm:$0xff]  ;;  %s1633_s30 = sshll.u32 %s2121_s24, 4  ;;  %s1635_s12 = sshll.u32 %s2121_s24, 5 }
   0xe   : > { %v1660_v2 = vld [vmem:[%s2110_s2 + $0x78] sm:$0xff]  ;;  %541 = vmatpush.bf16.msra.mxu1 %v1652_v1  ;;  %v1659_v6 = vld [vmem:[%s2110_s2 + $0x70] sm:$0xff]  ;;  %v1658_v10 = vld [vmem:[%s2110_s2 + $0x68] sm:$0xff]  ;;  %s346_s14 = scalar_lea.vmem %s2108_s0, %s1633_s30  ;;  %s356_s29 = scalar_lea.vmem %s2109_s1, %s1633_s30 }
   0xf   : > { %v1668_v3 = vld [vmem:[%s2111_s3 + $0x78] sm:$0xff]  ;;  %629 = vmatpush.bf16.msra.mxu2 %v1660_v2  ;;  %v1667_v7 = vld [vmem:[%s2111_s3 + $0x70] sm:$0xff]  ;;  %v1666_v11 = vld [vmem:[%s2111_s3 + $0x68] sm:$0xff]  ;;  %s2042_s15 = scalar_lea.vmem %s2114_s6, %s1635_s12  ;;  %s2053_s20 = scalar_lea.vmem %s2115_s7, %s1635_s12 }
  0x10   : > { %718 = vmatpush.bf16.msra.mxu3 %v1668_v3  ;;  %v1641_v12 = vld [vmem:[%s2110_s2 + $0x20] sm:$0xff]  ;;  %v1640_v16 = vld [vmem:[%s2110_s2 + $0x18] sm:$0xff]  ;;  %v1639_v20 = vld [vmem:[%s2110_s2 + $0x10] sm:$0xff] }
  0x11   : > { %455 = vmatpush.bf16.msra.mxu0 %v1643_v4  ;;  %v1649_v13 = vld [vmem:[%s2111_s3 + $0x20] sm:$0xff]  ;;  %v1648_v17 = vld [vmem:[%s2111_s3 + $0x18] sm:$0xff]  ;;  %v1647_v21 = vld [vmem:[%s2111_s3 + $0x10] sm:$0xff] }
  0x12   : > { %542 = vmatpush.bf16.msra.mxu1 %v1651_v5  ;;  %v1657_v14 = vld [vmem:[%s2110_s2 + $0x60] sm:$0xff]  ;;  %v1656_v18 = vld [vmem:[%s2110_s2 + $0x58] sm:$0xff]  ;;  %v1655_v22 = vld [vmem:[%s2110_s2 + $0x50] sm:$0xff] }
  0x13   : > { %630 = vmatpush.bf16.msra.mxu2 %v1659_v6  ;;  %v1665_v15 = vld [vmem:[%s2111_s3 + $0x60] sm:$0xff]  ;;  %v1664_v19 = vld [vmem:[%s2111_s3 + $0x58] sm:$0xff]  ;;  %v1663_v23 = vld [vmem:[%s2111_s3 + $0x50] sm:$0xff] }
  0x14   : > { %719 = vmatpush.bf16.msra.mxu3 %v1667_v7  ;;  %v1638_v24 = vld [vmem:[%s2110_s2 + $0x8] sm:$0xff]  ;;  %v378_v28 = vld [vmem:[%s346_s14] sm:$0xff]  ;;  %v1676_v38 = vld [vmem:[%s2110_s2 + $0xb8] sm:$0xff] }
  0x15   : > { %456 = vmatpush.bf16.msra.mxu0 %v1642_v8  ;;  %v1646_v25 = vld [vmem:[%s2111_s3 + $0x8] sm:$0xff]  ;;  %v380_v30 = vld [vmem:[%s356_s29] sm:$0xff]  ;;  %v1684_v39 = vld [vmem:[%s2111_s3 + $0xb8] sm:$0xff] }
  0x16   : > { %543 = vmatpush.bf16.msra.mxu1 %v1650_v9  ;;  %v1654_v26 = vld [vmem:[%s2110_s2 + $0x48] sm:$0xff]  ;;  %v1637_v32 = vld [vmem:[%s2110_s2] sm:$0xff]  ;;  %v382_v34 = vadd.f32 %v380_v30, %v378_v28  ;;  %v1692_v40 = vld [vmem:[%s2110_s2 + $0xf8] sm:$0xff] }
  0x17   : > { %631 = vmatpush.bf16.msra.mxu2 %v1658_v10  ;;  %v1662_v27 = vld [vmem:[%s2111_s3 + $0x48] sm:$0xff]  ;;  %v1645_v33 = vld [vmem:[%s2111_s3] sm:$0xff]  ;;  %v1700_v41 = vld [vmem:[%s2111_s3 + $0xf8] sm:$0xff] }
  0x18   : > { %720 = vmatpush.bf16.msra.mxu3 %v1666_v11  ;;  %v379_v29 = vld [vmem:[%s346_s14 + $0x8] sm:$0xff]  ;;  %v1653_v36 = vld [vmem:[%s2110_s2 + $0x40] sm:$0xff]  ;;  %v1675_v44 = vld [vmem:[%s2110_s2 + $0xb0] sm:$0xff] }
  0x19   : > { %457 = vmatpush.bf16.msra.mxu0 %v1641_v12  ;;  %v381_v31 = vld [vmem:[%s356_s29 + $0x8] sm:$0xff]  ;;  %v1661_v37 = vld [vmem:[%s2111_s3 + $0x40] sm:$0xff]  ;;  %v1938_v43 = vpack.c.bf16 %v379_v29, %v378_v28  ;;  %v1683_v45 = vld [vmem:[%s2111_s3 + $0xb0] sm:$0xff] }
  0x1a   : > { %544 = vmatpush.bf16.msra.mxu1 %v1649_v13  ;;  %v383_v35 = vadd.f32 %v381_v31, %v379_v29  ;;  %v1691_v46 = vld [vmem:[%s2110_s2 + $0xf0] sm:$0xff]  ;;  %v1674_v48 = vld [vmem:[%s2110_s2 + $0xa8] sm:$0xff]  ;;  %v1673_v52 = vld [vmem:[%s2110_s2 + $0xa0] sm:$0xff] }
  0x1b   : > { %632 = vmatpush.bf16.msra.mxu2 %v1657_v14  ;;  %v1699_v47 = vld [vmem:[%s2111_s3 + $0xf0] sm:$0xff]  ;;  %v1682_v49 = vld [vmem:[%s2111_s3 + $0xa8] sm:$0xff]  ;;  %v1681_v53 = vld [vmem:[%s2111_s3 + $0xa0] sm:$0xff] }
  0x1c   : > { %721 = vmatpush.bf16.msra.mxu3 %v1665_v15  ;;  %v1936_v42 = vpack.c.bf16 %v383_v35, %v382_v34  ;;  %v1690_v50 = vld [vmem:[%s2110_s2 + $0xe8] sm:$0xff]  ;;  %v1689_v54 = vld [vmem:[%s2110_s2 + $0xe0] sm:$0xff]  ;;  %v1672_v56 = vld [vmem:[%s2110_s2 + $0x98] sm:$0xff] }
  0x1d   : > { %458 = vmatpush.bf16.msra.mxu0 %v1640_v16  ;;  %v1698_v51 = vld [vmem:[%s2111_s3 + $0xe8] sm:$0xff]  ;;  %v1697_v55 = vld [vmem:[%s2111_s3 + $0xe0] sm:$0xff]  ;;  %v1680_v57 = vld [vmem:[%s2111_s3 + $0x98] sm:$0xff] }
  0x1e   : > { %545 = vmatpush.bf16.msra.mxu1 %v1648_v17  ;;  %v1688_v58 = vld [vmem:[%s2110_s2 + $0xd8] sm:$0xff]  ;;  %v1671_v60 = vld [vmem:[%s2110_s2 + $0x90] sm:$0xff]  ;;  %v1670_v0 = vld [vmem:[%s2110_s2 + $0x88] sm:$0xff] }
  0x1f   : > { %633 = vmatpush.bf16.msra.mxu2 %v1656_v18  ;;  %v1696_v59 = vld [vmem:[%s2111_s3 + $0xd8] sm:$0xff]  ;;  %v1679_v61 = vld [vmem:[%s2111_s3 + $0x90] sm:$0xff]  ;;  %v1678_v1 = vld [vmem:[%s2111_s3 + $0x88] sm:$0xff] }
  0x20   : > { %722 = vmatpush.bf16.msra.mxu3 %v1664_v19  ;;  %v1687_v62 = vld [vmem:[%s2110_s2 + $0xd0] sm:$0xff]  ;;  %v1686_v2 = vld [vmem:[%s2110_s2 + $0xc8] sm:$0xff]  ;;  %v1669_v4 = vld [vmem:[%s2110_s2 + $0x80] sm:$0xff] }
  0x21   : > { %459 = vmatpush.bf16.msra.mxu0 %v1639_v20  ;;  %v1695_v63 = vld [vmem:[%s2111_s3 + $0xd0] sm:$0xff]  ;;  %v1694_v3 = vld [vmem:[%s2111_s3 + $0xc8] sm:$0xff]  ;;  %v1677_v5 = vld [vmem:[%s2111_s3 + $0x80] sm:$0xff] }
  0x22   : > { %546 = vmatpush.bf16.msra.mxu1 %v1647_v21  ;;  %v1685_v6 = vld [vmem:[%s2110_s2 + $0xc0] sm:$0xff] }
  0x23   : > { %634 = vmatpush.bf16.msra.mxu2 %v1655_v22  ;;  %v1693_v7 = vld [vmem:[%s2111_s3 + $0xc0] sm:$0xff] }
  0x24   : > { %723 = vmatpush.bf16.msra.mxu3 %v1663_v23  ;;  %v1725_v8 = vld [vmem:[%s2112_s4] ss:$0 sm:$0xff]  ;;  %v1727_v14 = vld [vmem:[%s2112_s4 + $0x1] ss:$0 sm:$0xff] }
  0x25   : > { %460 = vmatpush.bf16.msra.mxu0 %v1638_v24  ;;  %v1726_v9 = vld [vmem:[%s2113_s5] ss:$0 sm:$0xff]  ;;  %v1728_v15 = vld [vmem:[%s2113_s5 + $0x1] ss:$0 sm:$0xff] }
  0x26   : > { %547 = vmatpush.bf16.msra.mxu1 %v1646_v25 }
  0x27   : > { %635 = vmatpush.bf16.msra.mxu2 %v1654_v26 }
  0x28   : > { %724 = vmatpush.bf16.msra.mxu3 %v1662_v27 }
  0x29   : > { %461 = vmatpush.bf16.msra.mxu0 %v1637_v32 }
  0x2a   : > { %548 = vmatpush.bf16.msra.mxu1 %v1645_v33 }
  0x2b   : > { %636 = vmatpush.bf16.msra.mxu2 %v1653_v36  ;;  %v1729_v36 = vld [vmem:[%s2112_s4 + $0x2] ss:$0 sm:$0xff] }
  0x2c   : > { %725 = vmatpush.bf16.msra.mxu3 %v1661_v37  ;;  %462 = vmatmul.bf16.vlgmr.msra.gmra.mxu0 %v1936_v42  ;;  %v1730_v37 = vld [vmem:[%s2113_s5 + $0x2] ss:$0 sm:$0xff] }
  0x2d   : > { %807 = vmatpush.bf16.msrb.mxu0 %v1676_v38  ;;  %549 = vmatmul.bf16.vlgmr.msra.gmra.mxu1 %v1938_v43 }
  0x2e   : > { %896 = vmatpush.bf16.msrb.mxu1 %v1684_v39  ;;  %637 = vmatmul.bf16.vlgmr.msra.gmra.mxu2 %v1936_v42 }
  0x2f   : > { %985 = vmatpush.bf16.msrb.mxu2 %v1692_v40  ;;  %726 = vmatmul.bf16.vlgmr.msra.gmra.mxu3 %v1938_v43 }
  0x30   : > { %1074 = vmatpush.bf16.msrb.mxu3 %v1700_v41 }
  0x31   : > { %808 = vmatpush.bf16.msrb.mxu0 %v1675_v44  ;;  %v1731_v44 = vld [vmem:[%s2112_s4 + $0x3] ss:$0 sm:$0xff] }
  0x32   : > { %897 = vmatpush.bf16.msrb.mxu1 %v1683_v45  ;;  %v1732_v45 = vld [vmem:[%s2113_s5 + $0x3] ss:$0 sm:$0xff] }
  0x33   : > { %986 = vmatpush.bf16.msrb.mxu2 %v1691_v46 }
  0x34   : > { %1075 = vmatpush.bf16.msrb.mxu3 %v1699_v47 }
  0x35   : > { %809 = vmatpush.bf16.msrb.mxu0 %v1674_v48 }
  0x36   : > { %898 = vmatpush.bf16.msrb.mxu1 %v1682_v49 }
  0x37   : > { %987 = vmatpush.bf16.msrb.mxu2 %v1690_v50 }
  0x38   : > { %1076 = vmatpush.bf16.msrb.mxu3 %v1698_v51 }
  0x39   : > { %810 = vmatpush.bf16.msrb.mxu0 %v1673_v52 }
  0x3a   : > { %899 = vmatpush.bf16.msrb.mxu1 %v1681_v53 }
  0x3b   : > { %988 = vmatpush.bf16.msrb.mxu2 %v1689_v54 }
  0x3c   : > { %1077 = vmatpush.bf16.msrb.mxu3 %v1697_v55 }
  0x3d   : > { %811 = vmatpush.bf16.msrb.mxu0 %v1672_v56 }
  0x3e   : > { %900 = vmatpush.bf16.msrb.mxu1 %v1680_v57 }
  0x3f   : > { %989 = vmatpush.bf16.msrb.mxu2 %v1688_v58 }
  0x40   : > { %1078 = vmatpush.bf16.msrb.mxu3 %v1696_v59 }
  0x41   : > { %812 = vmatpush.bf16.msrb.mxu0 %v1671_v60 }
  0x42   : > { %901 = vmatpush.bf16.msrb.mxu1 %v1679_v61 }
  0x43   : > { %990 = vmatpush.bf16.msrb.mxu2 %v1687_v62 }
  0x44   : > { %1079 = vmatpush.bf16.msrb.mxu3 %v1695_v63 }
  0x45   : > { %813 = vmatpush.bf16.msrb.mxu0 %v1670_v0 }
  0x46   : > { %902 = vmatpush.bf16.msrb.mxu1 %v1678_v1 }
  0x47   : > { %991 = vmatpush.bf16.msrb.mxu2 %v1686_v2 }
  0x48   : > { %1080 = vmatpush.bf16.msrb.mxu3 %v1694_v3 }
  0x49   : > { %814 = vmatpush.bf16.msrb.mxu0 %v1669_v4 }
  0x4a   : > { %903 = vmatpush.bf16.msrb.mxu1 %v1677_v5 }
  0x4b   : > { %992 = vmatpush.bf16.msrb.mxu2 %v1685_v6 }
  0x4c   : > { %1081 = vmatpush.bf16.msrb.mxu3 %v1693_v7  ;;  %815 = vmatmul.bf16.vlgmr.msrb.gmra.mxu0 %v1936_v42 }
  0x4d   : > { %904 = vmatmul.bf16.vlgmr.msrb.gmra.mxu1 %v1938_v43 }
  0x4e   : > { %993 = vmatmul.bf16.vlgmr.msrb.gmra.mxu2 %v1936_v42 }
  0x4f   : > { %1082 = vmatmul.bf16.vlgmr.msrb.gmra.mxu3 %v1938_v43 }
  0xa9   : > { %v463_v10 = vpop.f32.mrf.mxu0 }
  0xaa   : > { %v550_v11 = vpop.f32.mrf.mxu1  ;;  %v464_v12 = vadd.f32 %v1725_v8, %v463_v10 }
  0xab   : > { %v551_v13 = vadd.f32 %v1726_v9, %v550_v11 }
  0xac   : > { %v468_v16 = vpack.c.bf16 %v464_v12, %v464_v12 }
  0xad   : > { %v555_v17 = vpack.c.bf16 %v551_v13, %v551_v13 }
  0xae   : > { %471 = vst.msk [vmem:[%s2042_s15] sm:$0xf] %vm470_vm0, %v468_v16 }
  0xaf   : > { %557 = vst.msk [vmem:[%s2053_s20] sm:$0xf] %vm470_vm0, %v555_v17 }
  0xb1   : > { %v638_v18 = vpop.f32.mrf.mxu2  ;;  %v465_v24 = vpop.f32.mrf.mxu0 }
  0xb2   : > { %v727_v19 = vpop.f32.mrf.mxu3  ;;  %v639_v20 = vadd.f32 %v1727_v14, %v638_v18  ;;  %v552_v25 = vpop.f32.mrf.mxu1  ;;  %v466_v26 = vadd.f32 %v1725_v8, %v465_v24 }
  0xb3   : > { %v728_v21 = vadd.f32 %v1728_v15, %v727_v19  ;;  %v553_v27 = vadd.f32 %v1726_v9, %v552_v25 }
  0xb4   : > { %v643_v22 = vpack.c.bf16 %v639_v20, %v639_v20  ;;  %v469_v28 = vpack.c.bf16 %v466_v26, %v466_v26 }
  0xb5   : > { %v732_v23 = vpack.c.bf16 %v728_v21, %v728_v21  ;;  %v556_v29 = vpack.c.bf16 %v553_v27, %v553_v27 }
  0xb6   : > { %1374 = vst.msk [vmem:[%s2042_s15 + $0x8] sm:$0xf] %vm470_vm0, %v643_v22 }
  0xb7   : > { %1425 = vst.msk [vmem:[%s2053_s20 + $0x8] sm:$0xf] %vm470_vm0, %v732_v23 }
  0xb8   : > { %472 = vst.msk [vmem:[%s2042_s15 + $0x4] sm:$0xf] %vm470_vm0, %v469_v28 }
  0xb9   : > { %v640_v30 = vpop.f32.mrf.mxu2  ;;  %558 = vst.msk [vmem:[%s2053_s20 + $0x4] sm:$0xf] %vm470_vm0, %v556_v29 }
  0xba   : > { %v729_v31 = vpop.f32.mrf.mxu3  ;;  %v641_v32 = vadd.f32 %v1727_v14, %v640_v30 }
  0xbb   : > { %v730_v33 = vadd.f32 %v1728_v15, %v729_v31 }
  0xbc   : > { %v644_v34 = vpack.c.bf16 %v641_v32, %v641_v32 }
  0xbd   : > { %v733_v35 = vpack.c.bf16 %v730_v33, %v730_v33 }
  0xbe   : > { %1375 = vst.msk [vmem:[%s2042_s15 + $0xc] sm:$0xf] %vm470_vm0, %v644_v34 }
  0xbf   : > { %1426 = vst.msk [vmem:[%s2053_s20 + $0xc] sm:$0xf] %vm470_vm0, %v733_v35 }
  0xc9   : > { %v816_v38 = vpop.f32.mrf.mxu0 }
  0xca   : > { %v905_v39 = vpop.f32.mrf.mxu1  ;;  %v817_v40 = vadd.f32 %v1729_v36, %v816_v38 }
  0xcb   : > { %v906_v41 = vadd.f32 %v1730_v37, %v905_v39 }
  0xcc   : > { %v821_v42 = vpack.c.bf16 %v817_v40, %v817_v40 }
  0xcd   : > { %v910_v43 = vpack.c.bf16 %v906_v41, %v906_v41 }
  0xce   : > { %1476 = vst.msk [vmem:[%s2042_s15 + $0x10] sm:$0xf] %vm470_vm0, %v821_v42 }
  0xcf   : > { %1527 = vst.msk [vmem:[%s2053_s20 + $0x10] sm:$0xf] %vm470_vm0, %v910_v43 }
  0xd1   : > { %v994_v46 = vpop.f32.mrf.mxu2  ;;  %v818_v50 = vpop.f32.mrf.mxu0 }
  0xd2   : > { %v1083_v47 = vpop.f32.mrf.mxu3  ;;  %v995_v48 = vadd.f32 %v1731_v44, %v994_v46  ;;  %v907_v51 = vpop.f32.mrf.mxu1  ;;  %v819_v52 = vadd.f32 %v1729_v36, %v818_v50 }
  0xd3   : > { %v1084_v49 = vadd.f32 %v1732_v45, %v1083_v47  ;;  %v908_v53 = vadd.f32 %v1730_v37, %v907_v51 }
  0xd4   : > { %v999_v54 = vpack.c.bf16 %v995_v48, %v995_v48  ;;  %v822_v56 = vpack.c.bf16 %v819_v52, %v819_v52 }
  0xd5   : > { %v1088_v55 = vpack.c.bf16 %v1084_v49, %v1084_v49  ;;  %v911_v57 = vpack.c.bf16 %v908_v53, %v908_v53 }
  0xd6   : > { %1578 = vst.msk [vmem:[%s2042_s15 + $0x18] sm:$0xf] %vm470_vm0, %v999_v54 }
  0xd7   : > { %1629 = vst.msk [vmem:[%s2053_s20 + $0x18] sm:$0xf] %vm470_vm0, %v1088_v55 }
  0xd8   : > { %1477 = vst.msk [vmem:[%s2042_s15 + $0x14] sm:$0xf] %vm470_vm0, %v822_v56 }
  0xd9   : > { %1528 = vst.msk [vmem:[%s2053_s20 + $0x14] sm:$0xf] %vm470_vm0, %v911_v57  ;;  %v996_v58 = vpop.f32.mrf.mxu2 }
  0xda   : > { %v1085_v59 = vpop.f32.mrf.mxu3  ;;  %v997_v60 = vadd.f32 %v1731_v44, %v996_v58 }
  0xdb   : > { %v1086_v61 = vadd.f32 %v1732_v45, %v1085_v59 }
  0xdc   : > { %v1000_v62 = vpack.c.bf16 %v997_v60, %v997_v60 }
  0xdd   : > { %v1089_v63 = vpack.c.bf16 %v1086_v61, %v1086_v61 }
  0xde   : > { %1579 = vst.msk [vmem:[%s2042_s15 + $0x1c] sm:$0xf] %vm470_vm0, %v1000_v62 }
  0xdf   : > { %1630 = vst.msk [vmem:[%s2053_s20 + $0x1c] sm:$0xf] %vm470_vm0, %v1089_v63 }
  0xe0 PF: > { %s18_s26 = sadd.s32 1, %s1755_s26   ;;  %s2116_s24 = smov %s1751_s25 }
  0xe1   : > { %p15_p5 = scmp.ge.s32.totalorder %s18_s26, 4   ;;  %s2117_s25 = smov %s2119_s27 }
  0xe3   :  { %17 = sbr.rel (!%p15_p5) target bundleno = 2 (0x2), region = 107 }

// kernel: transformer_decoder_layer.7
= control target key start
LH: loop header
LB: loop body
LE: loop exit
PB: predicated region body
PF: predicated region fallthrough
CT: control target
= control target key end

     0   :  { %s1850_s24 = smov 0   ;;  %s1852_s25 = smov 0   ;;  %s2187_s0 = inlined_call_operand.vmem [shape: f32[2,24,128], index: 0, kind: input, shape index: {}]   ;;  %s2188_s1 = inlined_call_operand.vmem [shape: f32[2,24,128], index: 1, kind: input, shape index: {}]   ;;  %s2189_s2 = inlined_call_operand.vmem [shape: bf16[4,128,32], index: 2, kind: input, shape index: {}]   ;;  %s2190_s3 = inlined_call_operand.vmem [shape: bf16[4,128,32], index: 3, kind: input, shape index: {}]   ;;  %s2191_s4 = inlined_call_operand.vmem [shape: f32[4,1,32], index: 4, kind: input, shape index: {}]   ;;  %s2192_s5 = inlined_call_operand.vmem [shape: f32[4,1,32], index: 5, kind: input, shape index: {}]   ;;  %s2193_s6 = inlined_call_operand.vmem [shape: bf16[2,4,24,32], index: 6, kind: output, shape index: {0}]   ;;  %s2194_s7 = inlined_call_operand.vmem [shape: bf16[2,4,24,32], index: 7, kind: output, shape index: {1}]  }
   0x1   :  { %s1854_s26 = smov 0  }
   0x2 LB: > { %s30_s27 = sadd.s32 1, %s1804_s25  ;;  %p1305_p0 = scmp.ge.s32.totalorder %s1808_s26, 1  ;;  %s1808_s26 = sphi %s1854_s26, %s18_s26   ;;  %s1804_s25 = sphi %s1852_s25, %s2196_s25   ;;  %s1800_s24 = sphi %s1850_s24, %s2195_s24  }
   0x3   : > { %p32_p1 = scmp.ge.s32.totalorder %s30_s27, 2  ;;  %p280_p2 = scmp.lt.s32.totalorder %s1808_s26, 3 }
   0x5   : > { %s2198_s27 = smov (%p32_p1, %s30_s27), 0  ;;  %p281_p3 = pnand %p1305_p0, %p280_p2 }
   0x6   : > { %p339_p4 = scmp.lt.s32.totalorder (!%p281_p3), %s1800_s24, 1 }
   0x7   : > { %284 = sbr.rel (%p281_p3) target bundleno = 235 (0xeb), region = 44 }
   0xc   : > { %v1695_v0 = vld [vmem:[%s2189_s2 + $0x38] sm:$0xff]  ;;  %v1694_v4 = vld [vmem:[%s2189_s2 + $0x30] sm:$0xff]  ;;  %v1693_v8 = vld [vmem:[%s2189_s2 + $0x28] sm:$0xff]  ;;  %s2200_s24 = smov (!%p339_p4, %s1800_s24), 1  ;;  %vm480_vm0 = vcmask 257024  }
   0xd   : > { %v1703_v1 = vld [vmem:[%s2190_s3 + $0x38] sm:$0xff]  ;;  %459 = vmatpush.bf16.msra.mxu0 %v1695_v0  ;;  %v1702_v5 = vld [vmem:[%s2190_s3 + $0x30] sm:$0xff]  ;;  %v1701_v9 = vld [vmem:[%s2190_s3 + $0x28] sm:$0xff]  ;;  %s1752_s18 = smul.u32 24, %s2200_s24 }
   0xe   : > { %v1711_v2 = vld [vmem:[%s2189_s2 + $0x78] sm:$0xff]  ;;  %552 = vmatpush.bf16.msra.mxu1 %v1703_v1  ;;  %v1710_v6 = vld [vmem:[%s2189_s2 + $0x70] sm:$0xff]  ;;  %v1709_v10 = vld [vmem:[%s2189_s2 + $0x68] sm:$0xff]  ;;  %s1753_s15 = smul.u32 48, %s2200_s24 }
   0xf   : > { %v1719_v3 = vld [vmem:[%s2190_s3 + $0x78] sm:$0xff]  ;;  %646 = vmatpush.bf16.msra.mxu2 %v1711_v2  ;;  %v1718_v7 = vld [vmem:[%s2190_s3 + $0x70] sm:$0xff]  ;;  %v1717_v11 = vld [vmem:[%s2190_s3 + $0x68] sm:$0xff]  ;;  %s1938_s10 = scalar_lea.vmem %s2187_s0, %s1752_s18  ;;  %s1943_s13 = scalar_lea.vmem %s2188_s1, %s1752_s18 }
  0x10   : > { %741 = vmatpush.bf16.msra.mxu3 %v1719_v3  ;;  %v1692_v12 = vld [vmem:[%s2189_s2 + $0x20] sm:$0xff]  ;;  %v1691_v16 = vld [vmem:[%s2189_s2 + $0x18] sm:$0xff]  ;;  %v1690_v20 = vld [vmem:[%s2189_s2 + $0x10] sm:$0xff]  ;;  %s2105_s19 = scalar_lea.vmem %s2193_s6, %s1753_s15  ;;  %s2110_s21 = scalar_lea.vmem %s2194_s7, %s1753_s15 }
  0x11   : > { %460 = vmatpush.bf16.msra.mxu0 %v1694_v4  ;;  %v1700_v13 = vld [vmem:[%s2190_s3 + $0x20] sm:$0xff]  ;;  %v1699_v17 = vld [vmem:[%s2190_s3 + $0x18] sm:$0xff]  ;;  %v1698_v21 = vld [vmem:[%s2190_s3 + $0x10] sm:$0xff] }
  0x12   : > { %553 = vmatpush.bf16.msra.mxu1 %v1702_v5  ;;  %v1708_v14 = vld [vmem:[%s2189_s2 + $0x60] sm:$0xff]  ;;  %v1707_v18 = vld [vmem:[%s2189_s2 + $0x58] sm:$0xff]  ;;  %v1706_v22 = vld [vmem:[%s2189_s2 + $0x50] sm:$0xff] }
  0x13   : > { %647 = vmatpush.bf16.msra.mxu2 %v1710_v6  ;;  %v1716_v15 = vld [vmem:[%s2190_s3 + $0x60] sm:$0xff]  ;;  %v1715_v19 = vld [vmem:[%s2190_s3 + $0x58] sm:$0xff]  ;;  %v1714_v23 = vld [vmem:[%s2190_s3 + $0x50] sm:$0xff] }
  0x14   : > { %742 = vmatpush.bf16.msra.mxu3 %v1718_v7  ;;  %v1689_v24 = vld [vmem:[%s2189_s2 + $0x8] sm:$0xff]  ;;  %v378_v26 = vld [vmem:[%s1938_s10] sm:$0xff]  ;;  %v1743_v38 = vld [vmem:[%s2189_s2 + $0xf8] sm:$0xff] }
  0x15   : > { %461 = vmatpush.bf16.msra.mxu0 %v1693_v8  ;;  %v1697_v25 = vld [vmem:[%s2190_s3 + $0x8] sm:$0xff]  ;;  %v381_v28 = vld [vmem:[%s1943_s13] sm:$0xff]  ;;  %v1751_v39 = vld [vmem:[%s2190_s3 + $0xf8] sm:$0xff] }
  0x16   : > { %554 = vmatpush.bf16.msra.mxu1 %v1701_v9  ;;  %v379_v27 = vld [vmem:[%s1938_s10 + $0x8] sm:$0xff]  ;;  %v384_v32 = vadd.f32 %v381_v28, %v378_v26  ;;  %v1688_v34 = vld [vmem:[%s2189_s2] sm:$0xff]  ;;  %v1727_v42 = vld [vmem:[%s2189_s2 + $0xb8] sm:$0xff] }
  0x17   : > { %648 = vmatpush.bf16.msra.mxu2 %v1709_v10  ;;  %v382_v29 = vld [vmem:[%s1943_s13 + $0x8] sm:$0xff]  ;;  %v1696_v35 = vld [vmem:[%s2190_s3] sm:$0xff]  ;;  %v1993_v41 = vpack.c.bf16 %v379_v27, %v378_v26  ;;  %v1735_v43 = vld [vmem:[%s2190_s3 + $0xb8] sm:$0xff] }
  0x18   : > { %743 = vmatpush.bf16.msra.mxu3 %v1717_v11  ;;  %v1705_v30 = vld [vmem:[%s2189_s2 + $0x48] sm:$0xff]  ;;  %v385_v33 = vadd.f32 %v382_v29, %v379_v27  ;;  %v1704_v36 = vld [vmem:[%s2189_s2 + $0x40] sm:$0xff]  ;;  %v1742_v44 = vld [vmem:[%s2189_s2 + $0xf0] sm:$0xff] }
  0x19   : > { %462 = vmatpush.bf16.msra.mxu0 %v1692_v12  ;;  %v1713_v31 = vld [vmem:[%s2190_s3 + $0x48] sm:$0xff]  ;;  %v1712_v37 = vld [vmem:[%s2190_s3 + $0x40] sm:$0xff]  ;;  %v1750_v45 = vld [vmem:[%s2190_s3 + $0xf0] sm:$0xff] }
  0x1a   : > { %555 = vmatpush.bf16.msra.mxu1 %v1700_v13  ;;  %v1991_v40 = vpack.c.bf16 %v385_v33, %v384_v32  ;;  %v1726_v46 = vld [vmem:[%s2189_s2 + $0xb0] sm:$0xff]  ;;  %v1741_v48 = vld [vmem:[%s2189_s2 + $0xe8] sm:$0xff]  ;;  %v1740_v54 = vld [vmem:[%s2189_s2 + $0xe0] sm:$0xff] }
  0x1b   : > { %649 = vmatpush.bf16.msra.mxu2 %v1708_v14  ;;  %v1734_v47 = vld [vmem:[%s2190_s3 + $0xb0] sm:$0xff]  ;;  %v1749_v49 = vld [vmem:[%s2190_s3 + $0xe8] sm:$0xff]  ;;  %v1748_v55 = vld [vmem:[%s2190_s3 + $0xe0] sm:$0xff] }
  0x1c   : > { %744 = vmatpush.bf16.msra.mxu3 %v1716_v15  ;;  %v380_v50 = vld [vmem:[%s1938_s10 + $0x10] sm:$0xff]  ;;  %v1725_v52 = vld [vmem:[%s2189_s2 + $0xa8] sm:$0xff]  ;;  %v1724_v57 = vld [vmem:[%s2189_s2 + $0xa0] sm:$0xff] }
  0x1d   : > { %463 = vmatpush.bf16.msra.mxu0 %v1691_v16  ;;  %v383_v51 = vld [vmem:[%s1943_s13 + $0x10] sm:$0xff]  ;;  %v1733_v53 = vld [vmem:[%s2190_s3 + $0xa8] sm:$0xff]  ;;  %v1732_v58 = vld [vmem:[%s2190_s3 + $0xa0] sm:$0xff]  ;;  %v390_v62 = vpack.c.bf16 %v380_v50, %v380_v50 }
  0x1e   : > { %556 = vmatpush.bf16.msra.mxu1 %v1699_v17  ;;  %v386_v56 = vadd.f32 %v383_v51, %v380_v50  ;;  %v1739_v59 = vld [vmem:[%s2189_s2 + $0xd8] sm:$0xff]  ;;  %v1738_v1 = vld [vmem:[%s2189_s2 + $0xd0] sm:$0xff]  ;;  %v1737_v5 = vld [vmem:[%s2189_s2 + $0xc8] sm:$0xff] }
  0x1f   : > { %650 = vmatpush.bf16.msra.mxu2 %v1707_v18  ;;  %v1747_v60 = vld [vmem:[%s2190_s3 + $0xd8] sm:$0xff]  ;;  %v1746_v2 = vld [vmem:[%s2190_s3 + $0xd0] sm:$0xff]  ;;  %v1745_v6 = vld [vmem:[%s2190_s3 + $0xc8] sm:$0xff] }
  0x20   : > { %745 = vmatpush.bf16.msra.mxu3 %v1715_v19  ;;  %v388_v61 = vpack.c.bf16 %v386_v56, %v386_v56  ;;  %v1723_v63 = vld [vmem:[%s2189_s2 + $0x98] sm:$0xff]  ;;  %v1722_v3 = vld [vmem:[%s2189_s2 + $0x90] sm:$0xff]  ;;  %v1721_v7 = vld [vmem:[%s2189_s2 + $0x88] sm:$0xff] }
  0x21   : > { %464 = vmatpush.bf16.msra.mxu0 %v1690_v20  ;;  %v1731_v0 = vld [vmem:[%s2190_s3 + $0x98] sm:$0xff]  ;;  %v1730_v4 = vld [vmem:[%s2190_s3 + $0x90] sm:$0xff]  ;;  %v1729_v8 = vld [vmem:[%s2190_s3 + $0x88] sm:$0xff] }
  0x22   : > { %557 = vmatpush.bf16.msra.mxu1 %v1698_v21  ;;  %v1736_v9 = vld [vmem:[%s2189_s2 + $0xc0] sm:$0xff] }
  0x23   : > { %651 = vmatpush.bf16.msra.mxu2 %v1706_v22  ;;  %v1744_v10 = vld [vmem:[%s2190_s3 + $0xc0] sm:$0xff] }
  0x24   : > { %746 = vmatpush.bf16.msra.mxu3 %v1714_v23  ;;  %v1720_v11 = vld [vmem:[%s2189_s2 + $0x80] sm:$0xff] }
  0x25   : > { %465 = vmatpush.bf16.msra.mxu0 %v1689_v24  ;;  %v1728_v12 = vld [vmem:[%s2190_s3 + $0x80] sm:$0xff] }
  0x26   : > { %558 = vmatpush.bf16.msra.mxu1 %v1697_v25  ;;  %v1778_v13 = vld [vmem:[%s2191_s4] ss:$0 sm:$0xff]  ;;  %v1780_v21 = vld [vmem:[%s2191_s4 + $0x1] ss:$0 sm:$0xff]  ;;  %v1783_v56 = vld [vmem:[%s2192_s5 + $0x2] ss:$0 sm:$0xff] }
  0x27   : > { %652 = vmatpush.bf16.msra.mxu2 %v1705_v30  ;;  %v1779_v14 = vld [vmem:[%s2192_s5] ss:$0 sm:$0xff]  ;;  %v1781_v22 = vld [vmem:[%s2192_s5 + $0x1] ss:$0 sm:$0xff] }
  0x28   : > { %747 = vmatpush.bf16.msra.mxu3 %v1713_v31 }
  0x29   : > { %466 = vmatpush.bf16.msra.mxu0 %v1688_v34 }
  0x2a   : > { %559 = vmatpush.bf16.msra.mxu1 %v1696_v35 }
  0x2b   : > { %653 = vmatpush.bf16.msra.mxu2 %v1704_v36 }
  0x2c   : > { %748 = vmatpush.bf16.msra.mxu3 %v1712_v37  ;;  %467 = vmatmul.bf16.vlgmr.msra.gmra.mxu0 %v1991_v40 }
  0x2d   : > { %560 = vmatmul.bf16.vlgmr.msra.gmra.mxu1 %v1993_v41  ;;  %836 = vmatpush.bf16.msrb.mxu0 %v1727_v42 }
  0x2e   : > { %654 = vmatmul.bf16.vlgmr.msra.gmra.mxu2 %v1991_v40  ;;  %931 = vmatpush.bf16.msrb.mxu1 %v1735_v43 }
  0x2f   : > { %1026 = vmatpush.bf16.msrb.mxu2 %v1743_v38  ;;  %749 = vmatmul.bf16.vlgmr.msra.gmra.mxu3 %v1993_v41 }
  0x30   : > { %1121 = vmatpush.bf16.msrb.mxu3 %v1751_v39 }
  0x31   : > { %837 = vmatpush.bf16.msrb.mxu0 %v1726_v46 }
  0x32   : > { %932 = vmatpush.bf16.msrb.mxu1 %v1734_v47 }
  0x33   : > { %1027 = vmatpush.bf16.msrb.mxu2 %v1742_v44 }
  0x34   : > { %1122 = vmatpush.bf16.msrb.mxu3 %v1750_v45 }
  0x35   : > { %838 = vmatpush.bf16.msrb.mxu0 %v1725_v52 }
  0x36   : > { %933 = vmatpush.bf16.msrb.mxu1 %v1733_v53 }
  0x37   : > { %1028 = vmatpush.bf16.msrb.mxu2 %v1741_v48 }
  0x38   : > { %1123 = vmatpush.bf16.msrb.mxu3 %v1749_v49 }
  0x39   : > { %839 = vmatpush.bf16.msrb.mxu0 %v1724_v57 }
  0x3a   : > { %934 = vmatpush.bf16.msrb.mxu1 %v1732_v58 }
  0x3b   : > { %1029 = vmatpush.bf16.msrb.mxu2 %v1740_v54 }
  0x3c   : > { %1124 = vmatpush.bf16.msrb.mxu3 %v1748_v55  ;;  %472 = vmatmul.bf16.gmra.mxu0 %v388_v61  ;;  %v1782_v55 = vld [vmem:[%s2191_s4 + $0x2] ss:$0 sm:$0xff] }
  0x3d   : > { %565 = vmatmul.bf16.gmra.mxu1 %v390_v62  ;;  %840 = vmatpush.bf16.msrb.mxu0 %v1723_v63 }
  0x3e   : > { %659 = vmatmul.bf16.gmra.mxu2 %v388_v61  ;;  %935 = vmatpush.bf16.msrb.mxu1 %v1731_v0 }
  0x3f   : > { %1030 = vmatpush.bf16.msrb.mxu2 %v1739_v59  ;;  %754 = vmatmul.bf16.gmra.mxu3 %v390_v62 }
  0x40   : > { %1125 = vmatpush.bf16.msrb.mxu3 %v1747_v60 }
  0x41   : > { %841 = vmatpush.bf16.msrb.mxu0 %v1722_v3 }
  0x42   : > { %936 = vmatpush.bf16.msrb.mxu1 %v1730_v4 }
  0x43   : > { %1031 = vmatpush.bf16.msrb.mxu2 %v1738_v1  ;;  %v1784_v1 = vld [vmem:[%s2191_s4 + $0x3] ss:$0 sm:$0xff] }
  0x44   : > { %1126 = vmatpush.bf16.msrb.mxu3 %v1746_v2  ;;  %v1785_v2 = vld [vmem:[%s2192_s5 + $0x3] ss:$0 sm:$0xff] }
  0x45   : > { %842 = vmatpush.bf16.msrb.mxu0 %v1721_v7 }
  0x46   : > { %937 = vmatpush.bf16.msrb.mxu1 %v1729_v8 }
  0x47   : > { %1032 = vmatpush.bf16.msrb.mxu2 %v1737_v5 }
  0x48   : > { %1127 = vmatpush.bf16.msrb.mxu3 %v1745_v6 }
  0x49   : > { %843 = vmatpush.bf16.msrb.mxu0 %v1720_v11 }
  0x4a   : > { %938 = vmatpush.bf16.msrb.mxu1 %v1728_v12 }
  0x4b   : > { %1033 = vmatpush.bf16.msrb.mxu2 %v1736_v9 }
  0x4c   : > { %1128 = vmatpush.bf16.msrb.mxu3 %v1744_v10  ;;  %844 = vmatmul.bf16.vlgmr.msrb.gmra.mxu0 %v1991_v40 }
  0x4d   : > { %939 = vmatmul.bf16.vlgmr.msrb.gmra.mxu1 %v1993_v41 }
  0x4e   : > { %1034 = vmatmul.bf16.vlgmr.msrb.gmra.mxu2 %v1991_v40 }
  0x4f   : > { %1129 = vmatmul.bf16.vlgmr.msrb.gmra.mxu3 %v1993_v41 }
  0x5c   : > { %849 = vmatmul.bf16.gmra.mxu0 %v388_v61 }
  0x5d   : > { %944 = vmatmul.bf16.gmra.mxu1 %v390_v62 }
  0x5e   : > { %1039 = vmatmul.bf16.gmra.mxu2 %v388_v61 }
  0x5f   : > { %1134 = vmatmul.bf16.gmra.mxu3 %v390_v62 }
  0xa9   : > { %v468_v15 = vpop.f32.mrf.mxu0 }
  0xaa   : > { %v561_v16 = vpop.f32.mrf.mxu1  ;;  %v469_v17 = vadd.f32 %v1778_v13, %v468_v15 }
  0xab   : > { %v562_v18 = vadd.f32 %v1779_v14, %v561_v16 }
  0xac   : > { %v477_v19 = vpack.c.bf16 %v469_v17, %v469_v17 }
  0xad   : > { %v570_v20 = vpack.c.bf16 %v562_v18, %v562_v18 }
  0xae   : > { %481 = vst.msk [vmem:[%s2105_s19] sm:$0xf] %vm480_vm0, %v477_v19 }
  0xaf   : > { %573 = vst.msk [vmem:[%s2110_s21] sm:$0xf] %vm480_vm0, %v570_v20 }
  0xb1   : > { %v655_v23 = vpop.f32.mrf.mxu2  ;;  %v470_v27 = vpop.f32.mrf.mxu0 }
  0xb2   : > { %v750_v24 = vpop.f32.mrf.mxu3  ;;  %v656_v25 = vadd.f32 %v1780_v21, %v655_v23  ;;  %v563_v28 = vpop.f32.mrf.mxu1  ;;  %v471_v29 = vadd.f32 %v1778_v13, %v470_v27 }
  0xb3   : > { %v751_v26 = vadd.f32 %v1781_v22, %v750_v24  ;;  %v564_v30 = vadd.f32 %v1779_v14, %v563_v28 }
  0xb4   : > { %v664_v31 = vpack.c.bf16 %v656_v25, %v656_v25  ;;  %v478_v33 = vpack.c.bf16 %v471_v29, %v471_v29 }
  0xb5   : > { %v759_v32 = vpack.c.bf16 %v751_v26, %v751_v26  ;;  %v571_v34 = vpack.c.bf16 %v564_v30, %v564_v30 }
  0xb6   : > { %1423 = vst.msk [vmem:[%s2105_s19 + $0xc] sm:$0xf] %vm480_vm0, %v664_v31 }
  0xb7   : > { %1475 = vst.msk [vmem:[%s2110_s21 + $0xc] sm:$0xf] %vm480_vm0, %v759_v32 }
  0xb8   : > { %482 = vst.msk [vmem:[%s2105_s19 + $0x4] sm:$0xf] %vm480_vm0, %v478_v33 }
  0xb9   : > { %574 = vst.msk [vmem:[%s2110_s21 + $0x4] sm:$0xf] %vm480_vm0, %v571_v34  ;;  %v657_v35 = vpop.f32.mrf.mxu2  ;;  %v473_v39 = vpop.f32.mrf.mxu0 }
  0xba   : > { %v752_v36 = vpop.f32.mrf.mxu3  ;;  %v658_v37 = vadd.f32 %v1780_v21, %v657_v35  ;;  %v566_v40 = vpop.f32.mrf.mxu1  ;;  %v474_v41 = vadd.f32 %v1778_v13, %v473_v39 }
  0xbb   : > { %v753_v38 = vadd.f32 %v1781_v22, %v752_v36  ;;  %v567_v42 = vadd.f32 %v1779_v14, %v566_v40 }
  0xbc   : > { %v665_v43 = vpack.c.bf16 %v658_v37, %v658_v37  ;;  %v479_v45 = vpack.c.bf16 %v474_v41, %v474_v41 }
  0xbd   : > { %v760_v44 = vpack.c.bf16 %v753_v38, %v753_v38  ;;  %v572_v46 = vpack.c.bf16 %v567_v42, %v567_v42 }
  0xbe   : > { %1424 = vst.msk [vmem:[%s2105_s19 + $0x10] sm:$0xf] %vm480_vm0, %v665_v43 }
  0xbf   : > { %1476 = vst.msk [vmem:[%s2110_s21 + $0x10] sm:$0xf] %vm480_vm0, %v760_v44 }
  0xc0   : > { %483 = vst.msk [vmem:[%s2105_s19 + $0x8] sm:$0xf] %vm480_vm0, %v479_v45 }
  0xc1   : > { %575 = vst.msk [vmem:[%s2110_s21 + $0x8] sm:$0xf] %vm480_vm0, %v572_v46  ;;  %v660_v47 = vpop.f32.mrf.mxu2  ;;  %v475_v51 = vpop.f32.mrf.mxu0 }
  0xc2   : > { %v755_v48 = vpop.f32.mrf.mxu3  ;;  %v661_v49 = vadd.f32 %v1780_v21, %v660_v47  ;;  %v568_v52 = vpop.f32.mrf.mxu1 }
  0xc3   : > { %v756_v50 = vadd.f32 %v1781_v22, %v755_v48 }
  0xc4   : > { %v666_v53 = vpack.c.bf16 %v661_v49, %v661_v49 }
  0xc5   : > { %v761_v54 = vpack.c.bf16 %v756_v50, %v756_v50 }
  0xc6   : > { %1425 = vst.msk [vmem:[%s2105_s19 + $0x14] sm:$0xf] %vm480_vm0, %v666_v53 }
  0xc7   : > { %1477 = vst.msk [vmem:[%s2110_s21 + $0x14] sm:$0xf] %vm480_vm0, %v761_v54 }
  0xc9   : > { %v662_v57 = vpop.f32.mrf.mxu2  ;;  %v845_v59 = vpop.f32.mrf.mxu0 }
  0xca   : > { %v757_v58 = vpop.f32.mrf.mxu3  ;;  %v940_v60 = vpop.f32.mrf.mxu1  ;;  %v846_v61 = vadd.f32 %v1782_v55, %v845_v59 }
  0xcb   : > { %v941_v62 = vadd.f32 %v1783_v56, %v940_v60 }
  0xcc   : > { %v854_v63 = vpack.c.bf16 %v846_v61, %v846_v61 }
  0xcd   : > { %v949_v0 = vpack.c.bf16 %v941_v62, %v941_v62 }
  0xce   : > { %1527 = vst.msk [vmem:[%s2105_s19 + $0x18] sm:$0xf] %vm480_vm0, %v854_v63 }
  0xcf   : > { %1579 = vst.msk [vmem:[%s2110_s21 + $0x18] sm:$0xf] %vm480_vm0, %v949_v0 }
  0xd1   : > { %v1035_v3 = vpop.f32.mrf.mxu2  ;;  %v847_v7 = vpop.f32.mrf.mxu0 }
  0xd2   : > { %v1130_v4 = vpop.f32.mrf.mxu3  ;;  %v1036_v5 = vadd.f32 %v1784_v1, %v1035_v3  ;;  %v942_v8 = vpop.f32.mrf.mxu1  ;;  %v848_v9 = vadd.f32 %v1782_v55, %v847_v7 }
  0xd3   : > { %v1131_v6 = vadd.f32 %v1785_v2, %v1130_v4  ;;  %v943_v10 = vadd.f32 %v1783_v56, %v942_v8 }
  0xd4   : > { %v1044_v11 = vpack.c.bf16 %v1036_v5, %v1036_v5  ;;  %v855_v13 = vpack.c.bf16 %v848_v9, %v848_v9 }
  0xd5   : > { %v1139_v12 = vpack.c.bf16 %v1131_v6, %v1131_v6  ;;  %v950_v14 = vpack.c.bf16 %v943_v10, %v943_v10 }
  0xd6   : > { %1631 = vst.msk [vmem:[%s2105_s19 + $0x24] sm:$0xf] %vm480_vm0, %v1044_v11 }
  0xd7   : > { %1683 = vst.msk [vmem:[%s2110_s21 + $0x24] sm:$0xf] %vm480_vm0, %v1139_v12 }
  0xd8   : > { %1528 = vst.msk [vmem:[%s2105_s19 + $0x1c] sm:$0xf] %vm480_vm0, %v855_v13 }
  0xd9   : > { %1580 = vst.msk [vmem:[%s2110_s21 + $0x1c] sm:$0xf] %vm480_vm0, %v950_v14  ;;  %v1037_v15 = vpop.f32.mrf.mxu2  ;;  %v850_v19 = vpop.f32.mrf.mxu0 }
  0xda   : > { %v1132_v16 = vpop.f32.mrf.mxu3  ;;  %v1038_v17 = vadd.f32 %v1784_v1, %v1037_v15  ;;  %v945_v20 = vpop.f32.mrf.mxu1  ;;  %v851_v21 = vadd.f32 %v1782_v55, %v850_v19 }
  0xdb   : > { %v1133_v18 = vadd.f32 %v1785_v2, %v1132_v16  ;;  %v946_v22 = vadd.f32 %v1783_v56, %v945_v20 }
  0xdc   : > { %v1045_v23 = vpack.c.bf16 %v1038_v17, %v1038_v17  ;;  %v856_v25 = vpack.c.bf16 %v851_v21, %v851_v21 }
  0xdd   : > { %v1140_v24 = vpack.c.bf16 %v1133_v18, %v1133_v18  ;;  %v951_v26 = vpack.c.bf16 %v946_v22, %v946_v22 }
  0xde   : > { %1632 = vst.msk [vmem:[%s2105_s19 + $0x28] sm:$0xf] %vm480_vm0, %v1045_v23 }
  0xdf   : > { %1684 = vst.msk [vmem:[%s2110_s21 + $0x28] sm:$0xf] %vm480_vm0, %v1140_v24 }
  0xe0   : > { %1529 = vst.msk [vmem:[%s2105_s19 + $0x20] sm:$0xf] %vm480_vm0, %v856_v25 }
  0xe1   : > { %1581 = vst.msk [vmem:[%s2110_s21 + $0x20] sm:$0xf] %vm480_vm0, %v951_v26  ;;  %v1040_v27 = vpop.f32.mrf.mxu2  ;;  %v852_v31 = vpop.f32.mrf.mxu0 }
  0xe2   : > { %v1135_v28 = vpop.f32.mrf.mxu3  ;;  %v1041_v29 = vadd.f32 %v1784_v1, %v1040_v27  ;;  %v947_v32 = vpop.f32.mrf.mxu1 }
  0xe3   : > { %v1136_v30 = vadd.f32 %v1785_v2, %v1135_v28 }
  0xe4   : > { %v1046_v33 = vpack.c.bf16 %v1041_v29, %v1041_v29 }
  0xe5   : > { %v1141_v34 = vpack.c.bf16 %v1136_v30, %v1136_v30 }
  0xe6   : > { %1633 = vst.msk [vmem:[%s2105_s19 + $0x2c] sm:$0xf] %vm480_vm0, %v1046_v33 }
  0xe7   : > { %1685 = vst.msk [vmem:[%s2110_s21 + $0x2c] sm:$0xf] %vm480_vm0, %v1141_v34 }
  0xe9   : > { %v1042_v35 = vpop.f32.mrf.mxu2 }
  0xea   : > { %v1137_v36 = vpop.f32.mrf.mxu3 }
  0xeb PF: > { %s18_s26 = sadd.s32 1, %s1808_s26   ;;  %s2195_s24 = smov %s1804_s25 }
  0xec   : > { %p15_p5 = scmp.ge.s32.totalorder %s18_s26, 4   ;;  %s2196_s25 = smov %s2198_s27 }
  0xee   :  { %17 = sbr.rel (!%p15_p5) target bundleno = 2 (0x2), region = 107 }

// kernel: transformer_decoder_layer.6
= control target key start
LH: loop header
LB: loop body
LE: loop exit
PB: predicated region body
PF: predicated region fallthrough
CT: control target
= control target key end

     0   :  { %s2006_s13 = smov 0   ;;  %s2008_s14 = smov 0   ;;  %s2285_s0 = inlined_call_operand.vmem [shape: f32[2,16,128], index: 0, kind: input, shape index: {}]   ;;  %s2286_s1 = inlined_call_operand.vmem [shape: f32[2,16,128], index: 1, kind: input, shape index: {}]   ;;  %s2287_s2 = inlined_call_operand.vmem [shape: bf16[2,4,16,32], index: 2, kind: input, shape index: {}]   ;;  %s2288_s3 = inlined_call_operand.vmem [shape: bf16[2,4,16,32], index: 3, kind: input, shape index: {}]   ;;  %s2289_s4 = inlined_call_operand.vmem [shape: bf16[4,128,32], index: 4, kind: input, shape index: {}]   ;;  %s2290_s5 = inlined_call_operand.vmem [shape: f32[4,1,32], index: 5, kind: input, shape index: {}]   ;;  %s2291_s6 = inlined_call_operand.vmem [shape: bf16[4,32,128], index: 6, kind: input, shape index: {}]   ;;  %s2292_s7 = inlined_call_operand.vmem [shape: f32[1,128], index: 7, kind: input, shape index: {}]   ;;  %s2293_s8 = inlined_call_operand.vmem [shape: f32[1,128], index: 8, kind: input, shape index: {}]   ;;  %s2294_s9 = inlined_call_operand.vmem [shape: f32[1,128], index: 9, kind: input, shape index: {}]   ;;  %s2295_s10 = inlined_call_operand.vmem [shape: f32[2,16,128], index: 10, kind: output, shape index: {}]  }
   0x1   :  { %s2010_s15 = smov 0  }
   0x2 LB: > { %s32_s16 = sadd.s32 1, %s1944_s14  ;;  %p1511_p0 = scmp.ge.s32.totalorder %s1948_s15, 1  ;;  %s1948_s15 = sphi %s2010_s15, %s20_s15   ;;  %s1944_s14 = sphi %s2008_s14, %s2297_s14   ;;  %s1940_s13 = sphi %s2006_s13, %s2296_s13  }
   0x3   : > { %p34_p1 = scmp.ge.s32.totalorder %s32_s16, 2  ;;  %p370_p2 = scmp.lt.s32.totalorder %s1948_s15, 3 }
   0x5   : > { %s2299_s16 = smov (%p34_p1, %s32_s16), 0  ;;  %p371_p3 = pnand %p1511_p0, %p370_p2 }
   0x6   : > { %p436_p4 = scmp.lt.s32.totalorder (!%p371_p3), %s1940_s13, 1 }
   0x7   : > { %374 = sbr.rel (%p371_p3) target bundleno = 2637 (0xa4d), region = 60 }
   0xc   : > { %v1815_v0 = vld [vmem:[%s2289_s4 + $0x38] sm:$0xff]  ;;  %v1814_v1 = vld [vmem:[%s2289_s4 + $0x30] sm:$0xff]  ;;  %v1813_v2 = vld [vmem:[%s2289_s4 + $0x28] sm:$0xff]  ;;  %s2301_s13 = smov (!%p436_p4, %s1940_s13), 1  ;;  %vm580_vm0 = vcmask 261120   ;;  %v483_v23 = vlaneseq  ;;  %vm605_vm2 = vcmask 130048  }
   0xd   : > { %556 = vmatpush.bf16.msra.mxu0 %v1815_v0  ;;  %v1812_v3 = vld [vmem:[%s2289_s4 + $0x20] sm:$0xff]  ;;  %v1811_v4 = vld [vmem:[%s2289_s4 + $0x18] sm:$0xff]  ;;  %s2042_s27 = sshll.u32 %s2301_s13, 4  ;;  %v1810_v5 = vld [vmem:[%s2289_s4 + $0x10] sm:$0xff]  ;;  %s1805_s24 = sshll.u32 %s2301_s13, 5 }
   0xe   : > { %s443_s12 = scalar_lea.vmem %s2285_s0, %s2042_s27  ;;  %s453_s19 = scalar_lea.vmem %s2286_s1, %s2042_s27  ;;  %v1809_v6 = vld [vmem:[%s2289_s4 + $0x8] sm:$0xff]  ;;  %v1808_v13 = vld [vmem:[%s2289_s4] sm:$0xff]  ;;  %v2084_v24 = vand.u32 127, %v483_v23  ;;  %v1827_v42 = vld [vmem:[%s2289_s4 + $0x78] sm:$0xff] }
   0xf   : > { %v2058_v7 = vld [vmem:[%s443_s12] sm:$0xff]  ;;  %v2060_v8 = vld [vmem:[%s443_s12 + $0x8] sm:$0xff]  ;;  %s2076_s28 = scalar_lea.vmem %s2287_s2, %s1805_s24  ;;  %s2100_s17 = scalar_lea.vmem %s2288_s3, %s1805_s24  ;;  %v1826_v43 = vld [vmem:[%s2289_s4 + $0x70] sm:$0xff] }
  0x10   : > { %v478_v9 = vld [vmem:[%s453_s19] sm:$0xff]  ;;  %v479_v10 = vld [vmem:[%s453_s19 + $0x8] sm:$0xff]  ;;  %vm485_vm1 = vcmp.lt.s32.totalorder %v2084_v24, 12  ;;  %v1823_v46 = vld [vmem:[%s2289_s4 + $0x58] sm:$0xff] }
  0x11   : > { %557 = vmatpush.bf16.msra.mxu0 %v1814_v1  ;;  %v480_v11 = vadd.f32 %v478_v9, %v2058_v7  ;;  %v481_v12 = vadd.f32 %v479_v10, %v2060_v8  ;;  %v1816_v15 = vld [vmem:[%s2076_s28] sm:$0xff]  ;;  %v1825_v44 = vld [vmem:[%s2289_s4 + $0x68] sm:$0xff]  ;;  %v1822_v47 = vld [vmem:[%s2289_s4 + $0x50] sm:$0xff] }
  0x12   : > { %v585_v16 = vsel %vm580_vm0, %v1816_v15, 0  ;;  %v1881_v18 = vld [vmem:[%s2290_s5] ss:$0 sm:$0xff]  ;;  %v1821_v48 = vld [vmem:[%s2289_s4 + $0x48] sm:$0xff]  ;;  %v1882_v1 = vld [vmem:[%s2290_s5 + $0x1] ss:$0 sm:$0xff] }
  0x13   : > { %v2067_v14 = vpack.c.bf16 %v481_v12, %v480_v11  ;;  %594 = vmatpush.bf16.xpose.msra.mxu1 %v585_v16  ;;  %v1817_v41 = vld [vmem:[%s2100_s17] sm:$0xff]  ;;  %v1819_v57 = vld [vmem:[%s2291_s6 + $0x8] sm:$0xff] }
  0x14   : > { %645 = vmatpush.bf16.msra.mxu2 %v1817_v41  ;;  %v1824_v45 = vld [vmem:[%s2289_s4 + $0x60] sm:$0xff]  ;;  %680 = vmatpush.bf16.msra.mxu3 %v1819_v57  ;;  %v1828_v59 = vld [vmem:[%s2076_s28 + $0x8] sm:$0xff]  ;;  %v1851_v57 = vld [vmem:[%s2289_s4 + $0xf8] sm:$0xff] }
  0x15   : > { %558 = vmatpush.bf16.msra.mxu0 %v1813_v2  ;;  %v1820_v49 = vld [vmem:[%s2289_s4 + $0x40] sm:$0xff]  ;;  %v792_v60 = vsel %vm580_vm0, %v1828_v59, 0  ;;  %v1849_v59 = vld [vmem:[%s2289_s4 + $0xe8] sm:$0xff] }
  0x16   : > { %v1818_v58 = vld [vmem:[%s2291_s6] sm:$0xff] }
  0x18   : > { %762 = vmatpush.bf16.msrb.mxu2 %v1827_v42  ;;  %681 = vmatpush.bf16.msra.mxu3 %v1818_v58  ;;  %v1831_v42 = vld [vmem:[%s2291_s6 + $0x18] sm:$0xff]  ;;  %v1850_v58 = vld [vmem:[%s2289_s4 + $0xf0] sm:$0xff] }
  0x19   : > { %559 = vmatpush.bf16.msra.mxu0 %v1812_v3 }
  0x1b   : > { %801 = vmatpush.bf16.xpose.msrb.mxu1 %v792_v60  ;;  %v1848_v60 = vld [vmem:[%s2289_s4 + $0xe0] sm:$0xff] }
  0x1c   : > { %763 = vmatpush.bf16.msrb.mxu2 %v1826_v43  ;;  %v1830_v43 = vld [vmem:[%s2291_s6 + $0x10] sm:$0xff] }
  0x1d   : > { %560 = vmatpush.bf16.msra.mxu0 %v1811_v4 }
  0x20   : > { %764 = vmatpush.bf16.msrb.mxu2 %v1825_v44  ;;  %v1840_v44 = vld [vmem:[%s2076_s28 + $0x10] sm:$0xff] }
  0x21   : > { %561 = vmatpush.bf16.msra.mxu0 %v1810_v5 }
  0x24   : > { %765 = vmatpush.bf16.msrb.mxu2 %v1824_v45  ;;  %v997_v45 = vsel %vm580_vm0, %v1840_v44, 0 }
  0x25   : > { %562 = vmatpush.bf16.msra.mxu0 %v1809_v6 }
  0x28   : > { %766 = vmatpush.bf16.msrb.mxu2 %v1823_v46 }
  0x29   : > { %563 = vmatpush.bf16.msra.mxu0 %v1808_v13 }
  0x2c   : > { %564 = vmatmul.bf16.vlgmr.msra.gmra.mxu0 %v2067_v14  ;;  %767 = vmatpush.bf16.msrb.mxu2 %v1822_v47 }
  0x2d   : > { %1006 = vmatpush.bf16.xpose.msrb.mxu0 %v997_v45 }
  0x30   : > { %768 = vmatpush.bf16.msrb.mxu2 %v1821_v48 }
  0x34   : > { %769 = vmatpush.bf16.msrb.mxu2 %v1820_v49 }
  0x35   : > { %1172 = vmatpush.bf16.msra.mxu0 %v1851_v57 }
  0x39   : > { %1173 = vmatpush.bf16.msra.mxu0 %v1850_v58 }
  0x3d   : > { %1174 = vmatpush.bf16.msra.mxu0 %v1849_v59 }
  0x41   : > { %1175 = vmatpush.bf16.msra.mxu0 %v1848_v60 }
  0xa9   : > { %v565_v17 = vpop.f32.mrf.mxu0 }
  0xaa   : > { %v566_v20 = vadd.f32 %v1881_v18, %v565_v17 }
  0xb1   : > { %v567_v19 = vpop.f32.mrf.mxu0 }
  0xb2   : > { %v568_v21 = vadd.f32 %v1881_v18, %v567_v19 }
  0xb4   : > { %v574_v22 = vpack.c.bf16 %v568_v21, %v566_v20 }
  0xb6   : > { %1558 = vmatmul.msk.bf16.vlgmr.msra.gmra.mxu1 %vm580_vm0, %v574_v22 }
  0xb7   : > { %885 = vmatpush.bf16.msra.mxu1 %v1831_v42 }
  0xbb   : > { %886 = vmatpush.bf16.msra.mxu1 %v1830_v43 }
 0x133   : > { %v596_v25 = vpop.f32.mrf.mxu1 }
 0x134   : > { %v603_v26 = vsel %vm485_vm1, %v596_v25, -1e+30 }
 0x135   : > { %v606_v27 = vsel %vm605_vm2, %v603_v26, -inf }
 0x136   : > { %607 = vmax.xlane.f32.xlu0 %v606_v27  ;;  %v1839_v27 = vld [vmem:[%s2289_s4 + $0xb8] sm:$0xff] }
 0x13b   : > { %v598_v28 = vpop.f32.mrf.mxu1 }
 0x13c   : > { %v604_v29 = vsel %vm485_vm1, %v598_v28, -1e+30  ;;  %v1838_v28 = vld [vmem:[%s2289_s4 + $0xb0] sm:$0xff] }
 0x13d   : > { %v609_v30 = vsel %vm605_vm2, %v604_v29, -inf }
 0x13e   : > { %610 = vmax.xlane.f32.xlu0 %v609_v30  ;;  %v1836_v30 = vld [vmem:[%s2289_s4 + $0xa0] sm:$0xff] }
 0x1a9   : > { %v608_v31 = vpop.xlane.xlu0 %607 }
 0x1aa   : > { %v612_v32 = vsub.f32 %v603_v26, %v608_v31  ;;  %v1829_v26 = vld [vmem:[%s2100_s17 + $0x8] sm:$0xff]  ;;  %v1835_v31 = vld [vmem:[%s2289_s4 + $0x98] sm:$0xff] }
 0x1ab   : > { %849 = vmatpush.bf16.msrb.mxu3 %v1829_v26 }
 0x1ac   : > { %v614_v33 = vmul.f32 1.442695, %v612_v32  ;;  %v1834_v32 = vld [vmem:[%s2289_s4 + $0x90] sm:$0xff] }
 0x1ae   : > { %1888 = vpow2.f32 %v614_v33  ;;  %v1833_v33 = vld [vmem:[%s2289_s4 + $0x88] sm:$0xff] }
 0x1b1   : > { %v611_v34 = vpop.xlane.xlu0 %610 }
 0x1b2   : > { %v613_v35 = vsub.f32 %v604_v29, %v611_v34  ;;  %v1837_v29 = vld [vmem:[%s2289_s4 + $0xa8] sm:$0xff]  ;;  %v1832_v34 = vld [vmem:[%s2289_s4 + $0x80] sm:$0xff] }
 0x1b4   : > { %v1889_v36 = vpop.eup %1888  ;;  %v616_v37 = vmul.f32 1.442695, %v613_v35 }
 0x1b5   : > { %v618_v38 = vsel %vm605_vm2, %v1889_v36, 0.0 }
 0x1b6   : > { %1890 = vpow2.f32 %v616_v37  ;;  %619 = vadd.xlane.f32.xlu1 %v618_v38 }
 0x1bc   : > { %v1891_v39 = vpop.eup %1890 }
 0x1bd   : > { %v621_v40 = vsel %vm605_vm2, %v1891_v39, 0.0 }
 0x1be   : > { %622 = vadd.xlane.f32.xlu1 %v621_v40 }
 0x229   : > { %v620_v50 = vpop.xlane.xlu1 %619 }
 0x22a   : > { %1892 = vrcp.f32 %v620_v50 }
 0x230   : > { %v1893_v52 = vpop.eup %1892 }
 0x231   : > { %v623_v51 = vpop.xlane.xlu1 %622  ;;  %v626_v54 = vmul.f32 %v1893_v52, %v1889_v36  ;;  %v1883_v52 = vld [vmem:[%s2290_s5 + $0x2] ss:$0 sm:$0xff] }
 0x232   : > { %1894 = vrcp.f32 %v623_v51 }
 0x238   : > { %v1895_v53 = vpop.eup %1894 }
 0x239   : > { %v627_v55 = vmul.f32 %v1895_v53, %v1891_v39 }
 0x23b   : > { %v628_v56 = vpack.c.bf16 %v627_v55, %v626_v54 }
 0x23d   : > { %1563 = vmatmul.msk.bf16.vlgmr.msra.gmra.mxu2 %vm605_vm2, %v628_v56 }
 0x24d   : > { %770 = vmatmul.bf16.vlgmr.msrb.gmra.mxu2 %v2067_v14 }
 0x2c0   : > { %v647_v61 = vpop.f32.mrf.mxu2 }
 0x2c8   : > { %v649_v62 = vpop.f32.mrf.mxu2 }
 0x2c9   : > { %v654_v63 = vpack.c.bf16 %v649_v62, %v647_v61 }
 0x2cb   : > { %1572 = vmatmul.msk.bf16.vlgmr.msra.gmra.mxu3 %vm580_vm0, %v654_v63 }
 0x2cc   : > { %967 = vmatpush.bf16.msra.mxu3 %v1839_v27 }
 0x2d0   : > { %v771_v0 = vpop.f32.mrf.mxu2  ;;  %968 = vmatpush.bf16.msra.mxu3 %v1838_v28 }
 0x2d1   : > { %v772_v3 = vadd.f32 %v1882_v1, %v771_v0 }
 0x2d4   : > { %969 = vmatpush.bf16.msra.mxu3 %v1837_v29 }
 0x2d8   : > { %v773_v2 = vpop.f32.mrf.mxu2  ;;  %970 = vmatpush.bf16.msra.mxu3 %v1836_v30 }
 0x2d9   : > { %v774_v4 = vadd.f32 %v1882_v1, %v773_v2 }
 0x2db   : > { %v782_v5 = vpack.c.bf16 %v774_v4, %v772_v3  ;;  %v1847_v3 = vld [vmem:[%s2289_s4 + $0xd8] sm:$0xff]  ;;  %v1846_v4 = vld [vmem:[%s2289_s4 + $0xd0] sm:$0xff] }
 0x2dc   : > { %971 = vmatpush.bf16.msra.mxu3 %v1835_v31  ;;  %1176 = vmatpush.bf16.msra.mxu0 %v1847_v3  ;;  %v1884_v31 = vld [vmem:[%s2290_s5 + $0x3] ss:$0 sm:$0xff] }
 0x2dd   : > { %1630 = vmatmul.msk.bf16.vlgmr.msrb.gmra.mxu1 %vm580_vm0, %v782_v5  ;;  %v1845_v5 = vld [vmem:[%s2289_s4 + $0xc8] sm:$0xff] }
 0x2e0   : > { %972 = vmatpush.bf16.msra.mxu3 %v1834_v32  ;;  %1177 = vmatpush.bf16.msra.mxu0 %v1846_v4 }
 0x2e4   : > { %973 = vmatpush.bf16.msra.mxu3 %v1833_v33  ;;  %1178 = vmatpush.bf16.msra.mxu0 %v1845_v5 }
 0x2e8   : > { %974 = vmatpush.bf16.msra.mxu3 %v1832_v34 }
 0x34e   : > { %v2185_v46 = vpop.f32.mrf.mxu3 }
 0x356   : > { %v2187_v47 = vpop.f32.mrf.mxu3 }
 0x35a   : > { %v803_v6 = vpop.f32.mrf.mxu1 }
 0x35b   : > { %v808_v9 = vsel %vm485_vm1, %v803_v6, -1e+30  ;;  %v1844_v6 = vld [vmem:[%s2289_s4 + $0xc0] sm:$0xff] }
 0x35c   : > { %v810_v10 = vsel %vm605_vm2, %v808_v9, -inf  ;;  %1179 = vmatpush.bf16.msra.mxu0 %v1844_v6 }
 0x35d   : > { %811 = vmax.xlane.f32.xlu2 %v810_v10 }
 0x362   : > { %v805_v11 = vpop.f32.mrf.mxu1 }
 0x363   : > { %v809_v12 = vsel %vm485_vm1, %v805_v11, -1e+30 }
 0x364   : > { %v813_v13 = vsel %vm605_vm2, %v809_v12, -inf }
 0x365   : > { %814 = vmax.xlane.f32.xlu2 %v813_v13 }
 0x3d0   : > { %v812_v15 = vpop.xlane.xlu2 %811 }
 0x3d1   : > { %v816_v16 = vsub.f32 %v808_v9, %v812_v15 }
 0x3d3   : > { %v818_v17 = vmul.f32 1.442695, %v816_v16 }
 0x3d5   : > { %1896 = vpow2.f32 %v818_v17 }
 0x3d8   : > { %v815_v18 = vpop.xlane.xlu2 %814 }
 0x3d9   : > { %v817_v19 = vsub.f32 %v809_v12, %v815_v18 }
 0x3db   : > { %v1897_v20 = vpop.eup %1896  ;;  %v820_v21 = vmul.f32 1.442695, %v817_v19 }
 0x3dc   : > { %v822_v22 = vsel %vm605_vm2, %v1897_v20, 0.0 }
 0x3dd   : > { %1898 = vpow2.f32 %v820_v21  ;;  %823 = vadd.xlane.f32.xlu0 %v822_v22 }
 0x3e3   : > { %v1899_v23 = vpop.eup %1898 }
 0x3e4   : > { %v825_v25 = vsel %vm605_vm2, %v1899_v23, 0.0 }
 0x3e5   : > { %826 = vadd.xlane.f32.xlu1 %v825_v25 }
 0x450   : > { %v824_v35 = vpop.xlane.xlu0 %823 }
 0x451   : > { %1900 = vrcp.f32 %v824_v35 }
 0x457   : > { %v1901_v37 = vpop.eup %1900 }
 0x458   : > { %v827_v36 = vpop.xlane.xlu1 %826  ;;  %v830_v39 = vmul.f32 %v1901_v37, %v1897_v20  ;;  %v1841_v20 = vld [vmem:[%s2100_s17 + $0x10] sm:$0xff]  ;;  %v1842_v37 = vld [vmem:[%s2291_s6 + $0x20] sm:$0xff] }
 0x459   : > { %1902 = vrcp.f32 %v827_v36  ;;  %1054 = vmatpush.bf16.msra.mxu2 %v1841_v20  ;;  %v1843_v36 = vld [vmem:[%s2291_s6 + $0x28] sm:$0xff] }
 0x45a   : > { %1090 = vmatpush.bf16.msrb.mxu1 %v1843_v36 }
 0x45e   : > { %1091 = vmatpush.bf16.msrb.mxu1 %v1842_v37 }
 0x45f   : > { %v1903_v38 = vpop.eup %1902 }
 0x460   : > { %v831_v40 = vmul.f32 %v1903_v38, %v1899_v23 }
 0x462   : > { %v832_v41 = vpack.c.bf16 %v831_v40, %v830_v39 }
 0x464   : > { %1635 = vmatmul.msk.bf16.vlgmr.msrb.gmra.mxu3 %vm605_vm2, %v832_v41 }
 0x474   : > { %975 = vmatmul.bf16.vlgmr.msra.gmra.mxu3 %v2067_v14 }
 0x4e7   : > { %v851_v48 = vpop.f32.mrf.mxu3 }
 0x4ef   : > { %v853_v49 = vpop.f32.mrf.mxu3 }
 0x4f0   : > { %v858_v50 = vpack.c.bf16 %v853_v49, %v851_v48 }
 0x4f2   : > { %1648 = vmatmul.msk.bf16.vlgmr.msra.gmra.mxu1 %vm580_vm0, %v858_v50 }
 0x4f7   : > { %v976_v51 = vpop.f32.mrf.mxu3 }
 0x4f8   : > { %v977_v54 = vadd.f32 %v1883_v52, %v976_v51 }
 0x4ff   : > { %v978_v53 = vpop.f32.mrf.mxu3 }
 0x500   : > { %v979_v55 = vadd.f32 %v1883_v52, %v978_v53 }
 0x502   : > { %v987_v56 = vpack.c.bf16 %v979_v55, %v977_v54 }
 0x504   : > { %1706 = vmatmul.msk.bf16.vlgmr.msrb.gmra.mxu0 %vm580_vm0, %v987_v56 }
 0x514   : > { %1180 = vmatmul.bf16.vlgmr.msra.gmra.mxu0 %v2067_v14  ;;  %v1852_v14 = vld [vmem:[%s2076_s28 + $0x18] sm:$0xff]  ;;  %s473_s28 = scalar_lea.vmem %s2295_s10, %s2042_s27 }
 0x515   : > { %v1202_v21 = vsel %vm580_vm0, %v1852_v14, 0 }
 0x516   : > { %1211 = vmatpush.bf16.xpose.msrb.mxu2 %v1202_v21 }
 0x56f   : > { %v888_v49 = vpop.f32.mrf.mxu1 }
 0x570   : > { %v893_v52 = vadd.f32 %v888_v49, %v2185_v46  ;;  %v1855_v46 = vld [vmem:[%s2291_s6 + $0x38] sm:$0xff] }
 0x571   : > { %1295 = vmatpush.bf16.msrb.mxu3 %v1855_v46 }
 0x577   : > { %v890_v50 = vpop.f32.mrf.mxu1 }
 0x581   : > { %v1008_v61 = vpop.f32.mrf.mxu0 }
 0x582   : > { %v1013_v62 = vsel %vm485_vm1, %v1008_v61, -1e+30 }
 0x583   : > { %v1015_v63 = vsel %vm605_vm2, %v1013_v62, -inf }
 0x584   : > { %1016 = vmax.xlane.f32.xlu2 %v1015_v63  ;;  %v1853_v63 = vld [vmem:[%s2100_s17 + $0x18] sm:$0xff] }
 0x585   : > { %1259 = vmatpush.bf16.msra.mxu1 %v1853_v63 }
 0x589   : > { %v1010_v0 = vpop.f32.mrf.mxu0 }
 0x58a   : > { %v1014_v1 = vsel %vm485_vm1, %v1010_v0, -1e+30 }
 0x58b   : > { %v1018_v2 = vsel %vm605_vm2, %v1014_v1, -inf }
 0x58c   : > { %1019 = vmax.xlane.f32.xlu0 %v1018_v2 }
 0x591   : > { %v1181_v29 = vpop.f32.mrf.mxu0 }
 0x592   : > { %v1182_v33 = vadd.f32 %v1884_v31, %v1181_v29 }
 0x599   : > { %v1183_v32 = vpop.f32.mrf.mxu0 }
 0x59a   : > { %v1184_v34 = vadd.f32 %v1884_v31, %v1183_v32 }
 0x59c   : > { %v1192_v35 = vpack.c.bf16 %v1184_v34, %v1182_v33 }
 0x5f7   : > { %v1017_v9 = vpop.xlane.xlu2 %1016 }
 0x5f8   : > { %v1021_v10 = vsub.f32 %v1013_v62, %v1017_v9  ;;  %v1854_v9 = vld [vmem:[%s2291_s6 + $0x30] sm:$0xff] }
 0x5f9   : > { %1296 = vmatpush.bf16.msrb.mxu3 %v1854_v9 }
 0x5fa   : > { %v1023_v11 = vmul.f32 1.442695, %v1021_v10 }
 0x5fc   : > { %1904 = vpow2.f32 %v1023_v11 }
 0x5ff   : > { %v1020_v12 = vpop.xlane.xlu0 %1019 }
 0x600   : > { %v1022_v13 = vsub.f32 %v1014_v1, %v1020_v12 }
 0x602   : > { %v1905_v15 = vpop.eup %1904  ;;  %v1025_v16 = vmul.f32 1.442695, %v1022_v13 }
 0x603   : > { %v1027_v17 = vsel %vm605_vm2, %v1905_v15, 0.0 }
 0x604   : > { %1906 = vpow2.f32 %v1025_v16  ;;  %1028 = vadd.xlane.f32.xlu1 %v1027_v17  ;;  %v1885_v17 = vld [vmem:[%s2292_s7] ss:$0 sm:$0xff] }
 0x60a   : > { %v1907_v18 = vpop.eup %1906 }
 0x60b   : > { %v1030_v19 = vsel %vm605_vm2, %v1907_v18, 0.0 }
 0x60c   : > { %1031 = vadd.xlane.f32.xlu2 %v1030_v19  ;;  %v894_v19 = vadd.f32 %v890_v50, %v2187_v47 }
 0x677   : > { %v1029_v22 = vpop.xlane.xlu1 %1028 }
 0x678   : > { %1908 = vrcp.f32 %v1029_v22 }
 0x67e   : > { %v1909_v25 = vpop.eup %1908 }
 0x67f   : > { %v1032_v23 = vpop.xlane.xlu2 %1031  ;;  %v1035_v27 = vmul.f32 %v1909_v25, %v1905_v15 }
 0x680   : > { %1910 = vrcp.f32 %v1032_v23 }
 0x686   : > { %v1911_v26 = vpop.eup %1910 }
 0x687   : > { %v1036_v28 = vmul.f32 %v1911_v26, %v1907_v18  ;;  %v1950_v26 = vmov 128.0  }
 0x689   : > { %v1037_v30 = vpack.c.bf16 %v1036_v28, %v1035_v27 }
 0x68b   : > { %1711 = vmatmul.msk.bf16.vlgmr.msra.gmra.mxu2 %vm605_vm2, %v1037_v30 }
 0x69b   : > { %1782 = vmatmul.msk.bf16.vlgmr.msrb.gmra.mxu2 %vm580_vm0, %v1192_v35 }
 0x70e   : > { %v1056_v38 = vpop.f32.mrf.mxu2 }
 0x716   : > { %v1058_v39 = vpop.f32.mrf.mxu2 }
 0x717   : > { %v1063_v40 = vpack.c.bf16 %v1058_v39, %v1056_v38 }
 0x719   : > { %1724 = vmatmul.msk.bf16.vlgmr.msrb.gmra.mxu1 %vm580_vm0, %v1063_v40 }
 0x71e   : > { %v1213_v41 = vpop.f32.mrf.mxu2 }
 0x71f   : > { %v1218_v42 = vsel %vm485_vm1, %v1213_v41, -1e+30 }
 0x720   : > { %v1220_v43 = vsel %vm605_vm2, %v1218_v42, -inf }
 0x721   : > { %1221 = vmax.xlane.f32.xlu0 %v1220_v43 }
 0x726   : > { %v1215_v44 = vpop.f32.mrf.mxu2 }
 0x727   : > { %v1219_v45 = vsel %vm485_vm1, %v1215_v44, -1e+30 }
 0x728   : > { %v1223_v48 = vsel %vm605_vm2, %v1219_v45, -inf }
 0x729   : > { %1224 = vmax.xlane.f32.xlu1 %v1223_v48 }
 0x794   : > { %v1222_v51 = vpop.xlane.xlu0 %1221 }
 0x795   : > { %v1226_v53 = vsub.f32 %v1218_v42, %v1222_v51 }
 0x796   : > { %v1093_v54 = vpop.f32.mrf.mxu1 }
 0x797   : > { %v1228_v55 = vmul.f32 1.442695, %v1226_v53  ;;  %v1098_v56 = vadd.f32 %v1093_v54, %v893_v52  ;;  %v1886_v54 = vld [vmem:[%s2293_s8] ss:$0 sm:$0xff] }
 0x799   : > { %1912 = vpow2.f32 %v1228_v55 }
 0x79c   : > { %v1225_v57 = vpop.xlane.xlu1 %1224 }
 0x79d   : > { %v1227_v58 = vsub.f32 %v1219_v45, %v1225_v57  ;;  %v1887_v57 = vld [vmem:[%s2294_s9] ss:$0 sm:$0xff] }
 0x79e   : > { %v1095_v10 = vpop.f32.mrf.mxu1 }
 0x79f   : > { %v1913_v59 = vpop.eup %1912  ;;  %v1230_v60 = vmul.f32 1.442695, %v1227_v58  ;;  %v1099_v14 = vadd.f32 %v1095_v10, %v894_v19 }
 0x7a0   : > { %v1232_v24 = vsel %vm605_vm2, %v1913_v59, 0.0 }
 0x7a1   : > { %1914 = vpow2.f32 %v1230_v60  ;;  %1233 = vadd.xlane.f32.xlu2 %v1232_v24 }
 0x7a7   : > { %v1915_v61 = vpop.eup %1914 }
 0x7a8   : > { %v1235_v62 = vsel %vm605_vm2, %v1915_v61, 0.0 }
 0x7a9   : > { %1236 = vadd.xlane.f32.xlu0 %v1235_v62 }
 0x814   : > { %v1234_v0 = vpop.xlane.xlu2 %1233 }
 0x815   : > { %1916 = vrcp.f32 %v1234_v0 }
 0x81b   : > { %v1917_v2 = vpop.eup %1916 }
 0x81c   : > { %v1237_v1 = vpop.xlane.xlu0 %1236  ;;  %v1240_v4 = vmul.f32 %v1917_v2, %v1913_v59 }
 0x81d   : > { %1918 = vrcp.f32 %v1237_v1 }
 0x81e   : > { %1920 = vrcp.f32 %v1950_v26 }
 0x823   : > { %v1919_v3 = vpop.eup %1918 }
 0x824   : > { %v1241_v5 = vmul.f32 %v1919_v3, %v1915_v61  ;;  %v1921_v27 = vpop.eup %1920 }
 0x825   : > { %v1322_v28 = vmul.f32 128.0, %v1921_v27  ;;  %vm1326_vm3 = vweird.f32 %v1921_v27 }
 0x826   : > { %v1242_v6 = vpack.c.bf16 %v1241_v5, %v1240_v4 }
 0x827   : > { %v1323_v29 = vsub.f32 1.0, %v1322_v28 }
 0x828   : > { %1787 = vmatmul.msk.bf16.vlgmr.msra.gmra.mxu1 %vm605_vm2, %v1242_v6 }
 0x829   : > { %v1324_v30 = vmul.f32 %v1921_v27, %v1323_v29 }
 0x82b   : > { %v1325_v31 = vadd.f32 %v1921_v27, %v1324_v30 }
 0x8a5   : > { %v1261_v11 = vpop.f32.mrf.mxu1 }
 0x8ad   : > { %v1263_v12 = vpop.f32.mrf.mxu1 }
 0x8ae   : > { %v1268_v13 = vpack.c.bf16 %v1263_v12, %v1261_v11 }
 0x8b0   : > { %1800 = vmatmul.msk.bf16.vlgmr.msrb.gmra.mxu3 %vm580_vm0, %v1268_v13 }
 0x933   : > { %v1298_v15 = vpop.f32.mrf.mxu3 }
 0x934   : > { %v1303_v16 = vadd.f32 %v1298_v15, %v1098_v56 }
 0x936   : > { %v1309_v18 = vadd.f32 %v1303_v16, %v2058_v7  ;;  %v1327_v7 = vsel %vm1326_vm3, %v1921_v27, %v1325_v31 }
 0x938   : > { %v1315_v20 = vadd.f32 %v1885_v17, %v1309_v18 }
 0x93a   : > { %1317 = vadd.xlane.f32.xlu1 %v1315_v20 }
 0x93b   : > { %v1300_v21 = vpop.f32.mrf.mxu3 }
 0x93c   : > { %v1304_v22 = vadd.f32 %v1300_v21, %v1099_v14 }
 0x93e   : > { %v1310_v23 = vadd.f32 %v1304_v22, %v2060_v8 }
 0x940   : > { %v1316_v25 = vadd.f32 %v1885_v17, %v1310_v23 }
 0x942   : > { %1319 = vadd.xlane.f32.xlu2 %v1316_v25 }
 0x9ad   : > { %v1318_v32 = vpop.xlane.xlu1 %1317 }
 0x9ae   : > { %v1328_v47 = vmul.f32 %v1327_v7, %v1318_v32 }
 0x9b0   : > { %v1330_v33 = vsub.f32 %v1315_v20, %v1328_v47 }
 0x9b2   : > { %v1332_v34 = vmul.f32 %v1330_v33, %v1330_v33 }
 0x9b4   : > { %1334 = vadd.xlane.f32.xlu0 %v1332_v34 }
 0x9b5   : > { %v1320_v35 = vpop.xlane.xlu2 %1319 }
 0x9b6   : > { %v1329_v36 = vmul.f32 %v1327_v7, %v1320_v35 }
 0x9b8   : > { %v1331_v37 = vsub.f32 %v1316_v25, %v1329_v36 }
 0x9ba   : > { %v1333_v8 = vmul.f32 %v1331_v37, %v1331_v37 }
 0x9bc   : > { %1336 = vadd.xlane.f32.xlu1 %v1333_v8 }
 0xa27   : > { %v1335_v38 = vpop.xlane.xlu0 %1334 }
 0xa28   : > { %v1338_v39 = vmul.f32 %v1335_v38, %v1327_v7 }
 0xa2a   : > { %v1340_v40 = vadd.f32 1e-05, %v1338_v39 }
 0xa2c   : > { %1922 = vrsqrt.f32 %v1340_v40  ;;  %vm1348_vm5 = vweird.f32 %v1340_v40 }
 0xa2f   : > { %v1337_v41 = vpop.xlane.xlu1 %1336 }
 0xa30   : > { %v1339_v42 = vmul.f32 %v1337_v41, %v1327_v7 }
 0xa32   : > { %v1923_v43 = vpop.eup %1922  ;;  %v1341_v44 = vadd.f32 1e-05, %v1339_v42 }
 0xa33   : > { %v1343_v45 = vmul.f32 %v1923_v43, %v1340_v40  ;;  %vm1349_vm4 = vweird.f32 %v1923_v43 }
 0xa34   : > { %1924 = vrsqrt.f32 %v1341_v44  ;;  %vm1350_vm6 = vmor %vm1348_vm5, %vm1349_vm4  ;;  %vm1358_vm8 = vweird.f32 %v1341_v44 }
 0xa35   : > { %v1344_v48 = vmul.f32 %v1923_v43, %v1343_v45 }
 0xa37   : > { %v1345_v49 = vmul.f32 0.5, %v1344_v48 }
 0xa39   : > { %v1346_v50 = vsub.f32 1.5, %v1345_v49 }
 0xa3a   : > { %v1925_v51 = vpop.eup %1924 }
 0xa3b   : > { %v1347_v52 = vmul.f32 %v1923_v43, %v1346_v50  ;;  %v1353_v53 = vmul.f32 %v1925_v51, %v1341_v44  ;;  %vm1359_vm7 = vweird.f32 %v1925_v51 }
 0xa3c   : > { %vm1360_vm9 = vmor %vm1358_vm8, %vm1359_vm7 }
 0xa3d   : > { %v1351_v55 = vsel %vm1350_vm6, %v1923_v43, %v1347_v52  ;;  %v1354_v56 = vmul.f32 %v1925_v51, %v1353_v53 }
 0xa3e   : > { %v1362_v58 = vmul.f32 %v1351_v55, %v1330_v33 }
 0xa3f   : > { %v1355_v59 = vmul.f32 0.5, %v1354_v56 }
 0xa40   : > { %v1368_v60 = vmul.f32 %v1886_v54, %v1362_v58 }
 0xa41   : > { %v1356_v24 = vsub.f32 1.5, %v1355_v59 }
 0xa42   : > { %v1374_v61 = vadd.f32 %v1887_v57, %v1368_v60 }
 0xa43   : > { %v1357_v62 = vmul.f32 %v1925_v51, %v1356_v24 }
 0xa44   : > { %1376 = vst [vmem:[%s473_s28] sm:$0xff] %v1374_v61 }
 0xa45   : > { %v1361_v63 = vsel %vm1360_vm9, %v1925_v51, %v1357_v62 }
 0xa46   : > { %v1363_v46 = vmul.f32 %v1361_v63, %v1331_v37 }
 0xa48   : > { %v1369_v0 = vmul.f32 %v1886_v54, %v1363_v46 }
 0xa4a   : > { %v1375_v1 = vadd.f32 %v1887_v57, %v1369_v0 }
 0xa4c   : > { %1377 = vst [vmem:[%s473_s28 + $0x8] sm:$0xff] %v1375_v1 }
 0xa4d PF: > { %s20_s15 = sadd.s32 1, %s1948_s15   ;;  %s2296_s13 = smov %s1944_s14 }
 0xa4e   : > { %p17_p5 = scmp.ge.s32.totalorder %s20_s15, 4   ;;  %s2297_s14 = smov %s2299_s16 }
 0xa50   :  { %19 = sbr.rel (!%p17_p5) target bundleno = 2 (0x2), region = 114 }

// kernel: transformer_decoder_layer.8
= control target key start
LH: loop header
LB: loop body
LE: loop exit
PB: predicated region body
PF: predicated region fallthrough
CT: control target
= control target key end

     0   :  { %s2066_s13 = smov 0   ;;  %s2068_s14 = smov 0   ;;  %s2361_s0 = inlined_call_operand.vmem [shape: f32[2,16,128], index: 0, kind: input, shape index: {}]   ;;  %s2362_s1 = inlined_call_operand.vmem [shape: f32[2,16,128], index: 1, kind: input, shape index: {}]   ;;  %s2363_s2 = inlined_call_operand.vmem [shape: bf16[2,4,24,32], index: 2, kind: input, shape index: {}]   ;;  %s2364_s3 = inlined_call_operand.vmem [shape: bf16[2,4,24,32], index: 3, kind: input, shape index: {}]   ;;  %s2365_s4 = inlined_call_operand.vmem [shape: bf16[4,128,32], index: 4, kind: input, shape index: {}]   ;;  %s2366_s5 = inlined_call_operand.vmem [shape: f32[4,1,32], index: 5, kind: input, shape index: {}]   ;;  %s2367_s6 = inlined_call_operand.vmem [shape: bf16[4,32,128], index: 6, kind: input, shape index: {}]   ;;  %s2368_s7 = inlined_call_operand.vmem [shape: f32[1,128], index: 7, kind: input, shape index: {}]   ;;  %s2369_s8 = inlined_call_operand.vmem [shape: f32[1,128], index: 8, kind: input, shape index: {}]   ;;  %s2370_s9 = inlined_call_operand.vmem [shape: f32[1,128], index: 9, kind: input, shape index: {}]   ;;  %s2371_s10 = inlined_call_operand.vmem [shape: f32[2,16,128], index: 10, kind: output, shape index: {}]  }
   0x1   :  { %s2070_s15 = smov 0  }
   0x2 LB: > { %s32_s16 = sadd.s32 1, %s2004_s14  ;;  %p1568_p0 = scmp.ge.s32.totalorder %s2008_s15, 1  ;;  %s2008_s15 = sphi %s2070_s15, %s20_s15   ;;  %s2004_s14 = sphi %s2068_s14, %s2373_s14   ;;  %s2000_s13 = sphi %s2066_s13, %s2372_s13  }
   0x3   : > { %p34_p1 = scmp.ge.s32.totalorder %s32_s16, 2  ;;  %p370_p2 = scmp.lt.s32.totalorder %s2008_s15, 3 }
   0x5   : > { %s2375_s16 = smov (%p34_p1, %s32_s16), 0  ;;  %p371_p3 = pnand %p1568_p0, %p370_p2 }
   0x6   : > { %p436_p4 = scmp.lt.s32.totalorder (!%p371_p3), %s2000_s13, 1 }
   0x7   : > { %374 = sbr.rel (%p371_p3) target bundleno = 2499 (0x9c3), region = 60 }
   0xc   : > { %v1874_v0 = vld [vmem:[%s2365_s4 + $0x38] sm:$0xff]  ;;  %v1873_v1 = vld [vmem:[%s2365_s4 + $0x30] sm:$0xff]  ;;  %s2377_s13 = smov (!%p436_p4, %s2000_s13), 1  ;;  %v1872_v2 = vld [vmem:[%s2365_s4 + $0x28] sm:$0xff]  ;;  %vm585_vm0 = vcmask 261120   ;;  %v483_v27 = vlaneseq  ;;  %vm613_vm2 = vcmask 195584  }
   0xd   : > { %556 = vmatpush.bf16.msra.mxu0 %v1874_v0  ;;  %s1915_s21 = smul.u32 48, %s2377_s13  ;;  %v1871_v5 = vld [vmem:[%s2365_s4 + $0x20] sm:$0xff]  ;;  %v1870_v8 = vld [vmem:[%s2365_s4 + $0x18] sm:$0xff]  ;;  %s2112_s11 = sshll.u32 %s2377_s13, 4  ;;  %v1869_v9 = vld [vmem:[%s2365_s4 + $0x10] sm:$0xff]  ;;  %vm649_vm3 = vcmask 1043456  }
   0xe   : > { %s443_s20 = scalar_lea.vmem %s2361_s0, %s2112_s11  ;;  %s453_s24 = scalar_lea.vmem %s2362_s1, %s2112_s11  ;;  %v1868_v10 = vld [vmem:[%s2365_s4 + $0x8] sm:$0xff]  ;;  %v1867_v17 = vld [vmem:[%s2365_s4] sm:$0xff]  ;;  %v2146_v28 = vand.u32 127, %v483_v27  ;;  %v1886_v50 = vld [vmem:[%s2365_s4 + $0x78] sm:$0xff] }
   0xf   : > { %s2101_s26 = scalar_lea.vmem %s2363_s2, %s1915_s21  ;;  %v2128_v11 = vld [vmem:[%s443_s20] sm:$0xff]  ;;  %v2130_v12 = vld [vmem:[%s443_s20 + $0x8] sm:$0xff]  ;;  %s2160_s19 = scalar_lea.vmem %s2364_s3, %s1915_s21  ;;  %v1885_v51 = vld [vmem:[%s2365_s4 + $0x70] sm:$0xff] }
  0x10   : > { %v572_v3 = vld [vmem:[%s2101_s26 + $0x8] sm:$0xf]  ;;  %v478_v13 = vld [vmem:[%s453_s24] sm:$0xff]  ;;  %vm485_vm1 = vcmp.lt.s32.totalorder %v2146_v28, 20  ;;  %v1882_v54 = vld [vmem:[%s2365_s4 + $0x58] sm:$0xff] }
  0x11   : > { %557 = vmatpush.bf16.msra.mxu0 %v1873_v1  ;;  %v582_v4 = vunpack.c.l.b16 %v572_v3  ;;  %v479_v14 = vld [vmem:[%s453_s24 + $0x8] sm:$0xff]  ;;  %v480_v15 = vadd.f32 %v478_v13, %v2128_v11  ;;  %v1875_v19 = vld [vmem:[%s2101_s26] sm:$0xff]  ;;  %v1881_v55 = vld [vmem:[%s2365_s4 + $0x50] sm:$0xff] }
  0x12   : > { %v481_v16 = vadd.f32 %v479_v14, %v2130_v12  ;;  %v590_v20 = vsel %vm585_vm0, %v1875_v19, 0  ;;  %v1941_v22 = vld [vmem:[%s2366_s5] ss:$0 sm:$0xff]  ;;  %v575_v35 = vld [vmem:[%s2160_s19 + $0x8] sm:$0xf] }
  0x13   : > { %v584_v6 = vpack.c.b16 %v582_v4, %v582_v4  ;;  %v642_v36 = vunpack.c.l.b16 %v575_v35  ;;  %v1876_v49 = vld [vmem:[%s2160_s19] sm:$0xff]  ;;  %v1884_v52 = vld [vmem:[%s2365_s4 + $0x68] sm:$0xff]  ;;  %v1679_v3 = vld [vmem:[%s2101_s26 + $0x14] sm:$0xf] }
  0x14   : > { %v2137_v18 = vpack.c.bf16 %v481_v16, %v480_v15  ;;  %v1883_v53 = vld [vmem:[%s2365_s4 + $0x60] sm:$0xff]  ;;  %v1880_v56 = vld [vmem:[%s2365_s4 + $0x48] sm:$0xff]  ;;  %v805_v4 = vunpack.c.l.b16 %v1679_v3  ;;  %v1893_v35 = vld [vmem:[%s2365_s4 + $0x90] sm:$0xff] }
  0x15   : > { %558 = vmatpush.bf16.msra.mxu0 %v1872_v2  ;;  %v593_v7 = vsel %vm585_vm0, %v584_v6, 0  ;;  %v644_v37 = vpack.c.b16 %v642_v36, %v642_v36  ;;  %v1879_v57 = vld [vmem:[%s2365_s4 + $0x40] sm:$0xff]  ;;  %v1878_v1 = vld [vmem:[%s2367_s6 + $0x8] sm:$0xff] }
  0x16   : > { %601 = vmatpush.bf16.xpose.msra.mxu1 %v593_v7  ;;  %695 = vmatpush.bf16.msra.mxu3 %v1878_v1  ;;  %v1877_v2 = vld [vmem:[%s2367_s6] sm:$0xff]  ;;  %v1887_v7 = vld [vmem:[%s2101_s26 + $0xc] sm:$0xff] }
  0x17   : > { %v651_v38 = vsel %vm649_vm3, %v644_v37, 0  ;;  %v1942_v15 = vld [vmem:[%s2366_s5 + $0x1] ss:$0 sm:$0xff]  ;;  %v1892_v36 = vld [vmem:[%s2365_s4 + $0x88] sm:$0xff]  ;;  %v1943_v3 = vld [vmem:[%s2366_s5 + $0x2] ss:$0 sm:$0xff] }
  0x18   : > { %659 = vmatpush.bf16.msra.mxu2 %v651_v38  ;;  %v1891_v37 = vld [vmem:[%s2365_s4 + $0x80] sm:$0xff] }
  0x19   : > { %559 = vmatpush.bf16.msra.mxu0 %v1871_v5  ;;  %v807_v5 = vpack.c.b16 %v805_v4, %v805_v4 }
  0x1a   : > { %696 = vmatpush.bf16.msra.mxu3 %v1877_v2 }
  0x1b   : > { %v815_v6 = vsel %vm585_vm0, %v807_v5, 0 }
  0x1c   : > { %660 = vmatpush.bf16.msra.mxu2 %v1876_v49 }
  0x1d   : > { %560 = vmatpush.bf16.msra.mxu0 %v1870_v8  ;;  %v812_v8 = vsel %vm585_vm0, %v1887_v7, 0 }
  0x1e   : > { %602 = vmatpush.bf16.xpose.msra.mxu1 %v590_v20  ;;  %823 = vmatpush.bf16.xpose.msrb.mxu3 %v815_v6 }
  0x20   : > { %777 = vmatpush.bf16.msrb.mxu2 %v1886_v50 }
  0x21   : > { %561 = vmatpush.bf16.msra.mxu0 %v1869_v9 }
  0x24   : > { %778 = vmatpush.bf16.msrb.mxu2 %v1885_v51 }
  0x25   : > { %562 = vmatpush.bf16.msra.mxu0 %v1868_v10 }
  0x26   : > { %824 = vmatpush.bf16.xpose.msrb.mxu3 %v812_v8  ;;  %v1890_v8 = vld [vmem:[%s2367_s6 + $0x18] sm:$0xff] }
  0x28   : > { %779 = vmatpush.bf16.msrb.mxu2 %v1884_v52  ;;  %v1888_v52 = vld [vmem:[%s2160_s19 + $0xc] sm:$0xff] }
  0x29   : > { %563 = vmatpush.bf16.msra.mxu0 %v1867_v17 }
  0x2c   : > { %564 = vmatmul.bf16.vlgmr.msra.gmra.mxu0 %v2137_v18  ;;  %780 = vmatpush.bf16.msrb.mxu2 %v1883_v53  ;;  %v1757_v53 = vld [vmem:[%s2101_s26 + $0x20] sm:$0xf] }
  0x30   : > { %781 = vmatpush.bf16.msrb.mxu2 %v1882_v54  ;;  %v1024_v54 = vunpack.c.l.b16 %v1757_v53 }
  0x34   : > { %782 = vmatpush.bf16.msrb.mxu2 %v1881_v55  ;;  %v1026_v55 = vpack.c.b16 %v1024_v54, %v1024_v54 }
  0x38   : > { %783 = vmatpush.bf16.msrb.mxu2 %v1880_v56  ;;  %v1034_v56 = vsel %vm585_vm0, %v1026_v55, 0 }
  0x3c   : > { %784 = vmatpush.bf16.msrb.mxu2 %v1879_v57  ;;  %v1899_v57 = vld [vmem:[%s2101_s26 + $0x18] sm:$0xff] }
  0xa9   : > { %v565_v21 = vpop.f32.mrf.mxu0 }
  0xaa   : > { %v566_v24 = vadd.f32 %v1941_v22, %v565_v21  ;;  %v1898_v21 = vld [vmem:[%s2365_s4 + $0xb8] sm:$0xff] }
  0xab   : > { %996 = vmatpush.bf16.msrb.mxu0 %v1898_v21 }
  0xb1   : > { %v567_v23 = vpop.f32.mrf.mxu0 }
  0xb2   : > { %v568_v25 = vadd.f32 %v1941_v22, %v567_v23  ;;  %v1897_v22 = vld [vmem:[%s2365_s4 + $0xb0] sm:$0xff] }
  0xb3   : > { %997 = vmatpush.bf16.msrb.mxu0 %v1897_v22 }
  0xb4   : > { %v576_v26 = vpack.c.bf16 %v568_v25, %v566_v24  ;;  %v1896_v24 = vld [vmem:[%s2365_s4 + $0xa8] sm:$0xff]  ;;  %v1895_v25 = vld [vmem:[%s2365_s4 + $0xa0] sm:$0xff] }
  0xb6   : > { %1613 = vmatmul.msk.bf16.vlgmr.msra.gmra.mxu1 %vm585_vm0, %v576_v26 }
  0xb7   : > { %998 = vmatpush.bf16.msrb.mxu0 %v1896_v24 }
  0xbb   : > { %999 = vmatpush.bf16.msrb.mxu0 %v1895_v25 }
 0x133   : > { %v604_v29 = vpop.f32.mrf.mxu1 }
 0x134   : > { %v611_v30 = vsel %vm485_vm1, %v604_v29, -1e+30 }
 0x135   : > { %v614_v31 = vsel %vm613_vm2, %v611_v30, -inf }
 0x136   : > { %615 = vmax.xlane.f32.xlu0 %v614_v31 }
 0x13b   : > { %v606_v32 = vpop.f32.mrf.mxu1 }
 0x13c   : > { %v612_v33 = vsel %vm485_vm1, %v606_v32, -1e+30 }
 0x13d   : > { %v617_v34 = vsel %vm613_vm2, %v612_v33, -inf }
 0x13e   : > { %618 = vmax.xlane.f32.xlu0 %v617_v34  ;;  %v1894_v34 = vld [vmem:[%s2365_s4 + $0x98] sm:$0xff] }
 0x13f   : > { %1000 = vmatpush.bf16.msrb.mxu0 %v1894_v34 }
 0x143   : > { %1001 = vmatpush.bf16.msrb.mxu0 %v1893_v35 }
 0x147   : > { %1002 = vmatpush.bf16.msrb.mxu0 %v1892_v36 }
 0x14b   : > { %1003 = vmatpush.bf16.msrb.mxu0 %v1891_v37 }
 0x14e   : > { %1004 = vmatmul.bf16.vlgmr.msrb.gmra.mxu0 %v2137_v18 }
 0x1a9   : > { %v616_v39 = vpop.xlane.xlu0 %615 }
 0x1aa   : > { %v620_v40 = vsub.f32 %v611_v30, %v616_v39 }
 0x1ac   : > { %v622_v41 = vmul.f32 1.442695, %v620_v40 }
 0x1ae   : > { %1948 = vpow2.f32 %v622_v41 }
 0x1b1   : > { %v619_v42 = vpop.xlane.xlu0 %618 }
 0x1b2   : > { %v621_v43 = vsub.f32 %v612_v33, %v619_v42 }
 0x1b4   : > { %v1949_v44 = vpop.eup %1948  ;;  %v624_v45 = vmul.f32 1.442695, %v621_v43 }
 0x1b5   : > { %v626_v46 = vsel %vm613_vm2, %v1949_v44, 0.0 }
 0x1b6   : > { %1950 = vpow2.f32 %v624_v45  ;;  %627 = vadd.xlane.f32.xlu1 %v626_v46 }
 0x1bc   : > { %v1951_v47 = vpop.eup %1950 }
 0x1bd   : > { %v629_v48 = vsel %vm613_vm2, %v1951_v47, 0.0 }
 0x1be   : > { %630 = vadd.xlane.f32.xlu1 %v629_v48  ;;  %v1682_v48 = vld [vmem:[%s2160_s19 + $0x14] sm:$0xf] }
 0x1bf   : > { %v861_v49 = vunpack.c.l.b16 %v1682_v48 }
 0x1c1   : > { %v863_v50 = vpack.c.b16 %v861_v49, %v861_v49 }
 0x1c3   : > { %v869_v51 = vsel %vm649_vm3, %v863_v50, 0 }
 0x1c4   : > { %877 = vmatpush.bf16.msrb.mxu1 %v869_v51  ;;  %v1911_v51 = vld [vmem:[%s2101_s26 + $0x24] sm:$0xff] }
 0x1c8   : > { %878 = vmatpush.bf16.msrb.mxu1 %v1888_v52  ;;  %v1250_v52 = vsel %vm585_vm0, %v1911_v51, 0  ;;  %v1945_v51 = vld [vmem:[%s2368_s7] ss:$0 sm:$0xff] }
 0x1cb   : > { %v1005_v1 = vpop.f32.mrf.mxu0 }
 0x1cc   : > { %1042 = vmatpush.bf16.xpose.msra.mxu1 %v1034_v56  ;;  %v1006_v5 = vadd.f32 %v1943_v3, %v1005_v1 }
 0x1d3   : > { %v1007_v4 = vpop.f32.mrf.mxu0 }
 0x1d4   : > { %v1008_v6 = vadd.f32 %v1943_v3, %v1007_v4  ;;  %v1901_v3 = vld [vmem:[%s2367_s6 + $0x20] sm:$0xff] }
 0x1d6   : > { %v1018_v7 = vpack.c.bf16 %v1008_v6, %v1006_v5 }
 0x229   : > { %v628_v58 = vpop.xlane.xlu1 %627 }
 0x22a   : > { %1952 = vrcp.f32 %v628_v58  ;;  %v1031_v58 = vsel %vm585_vm0, %v1899_v57, 0 }
 0x22b   : > { %1043 = vmatpush.bf16.xpose.msra.mxu1 %v1031_v58 }
 0x230   : > { %v1953_v60 = vpop.eup %1952 }
 0x231   : > { %v631_v59 = vpop.xlane.xlu1 %630  ;;  %v634_v62 = vmul.f32 %v1953_v60, %v1949_v44 }
 0x232   : > { %1954 = vrcp.f32 %v631_v59 }
 0x238   : > { %v1955_v61 = vpop.eup %1954 }
 0x239   : > { %v635_v63 = vmul.f32 %v1955_v61, %v1951_v47 }
 0x23b   : > { %v636_v0 = vpack.c.bf16 %v635_v63, %v634_v62 }
 0x23d   : > { %1618 = vmatmul.msk.bf16.vlgmr.msra.gmra.mxu2 %vm613_vm2, %v636_v0 }
 0x24d   : > { %785 = vmatmul.bf16.vlgmr.msrb.gmra.mxu2 %v2137_v18 }
 0x2c0   : > { %v662_v9 = vpop.f32.mrf.mxu2 }
 0x2c8   : > { %v664_v10 = vpop.f32.mrf.mxu2 }
 0x2c9   : > { %v669_v13 = vpack.c.bf16 %v664_v10, %v662_v9  ;;  %v1889_v9 = vld [vmem:[%s2367_s6 + $0x10] sm:$0xff]  ;;  %v1910_v10 = vld [vmem:[%s2365_s4 + $0xf8] sm:$0xff] }
 0x2cb   : > { %1627 = vmatmul.msk.bf16.vlgmr.msra.gmra.mxu3 %vm585_vm0, %v669_v13  ;;  %v1909_v13 = vld [vmem:[%s2365_s4 + $0xf0] sm:$0xff] }
 0x2cc   : > { %914 = vmatpush.bf16.msra.mxu3 %v1890_v8 }
 0x2d0   : > { %v786_v14 = vpop.f32.mrf.mxu2  ;;  %915 = vmatpush.bf16.msra.mxu3 %v1889_v9 }
 0x2d1   : > { %v787_v17 = vadd.f32 %v1942_v15, %v786_v14 }
 0x2d8   : > { %v788_v16 = vpop.f32.mrf.mxu2 }
 0x2d9   : > { %v789_v19 = vadd.f32 %v1942_v15, %v788_v16  ;;  %v1908_v15 = vld [vmem:[%s2365_s4 + $0xe8] sm:$0xff]  ;;  %v1907_v16 = vld [vmem:[%s2365_s4 + $0xe0] sm:$0xff] }
 0x2db   : > { %v799_v20 = vpack.c.bf16 %v789_v19, %v787_v17 }
 0x2dd   : > { %1687 = vmatmul.msk.bf16.vlgmr.msrb.gmra.mxu3 %vm585_vm0, %v799_v20 }
 0x34e   : > { %v2214_v23 = vpop.f32.mrf.mxu3 }
 0x356   : > { %v2222_v26 = vpop.f32.mrf.mxu3 }
 0x360   : > { %v826_v27 = vpop.f32.mrf.mxu3 }
 0x361   : > { %v831_v29 = vsel %vm485_vm1, %v826_v27, -1e+30 }
 0x362   : > { %v833_v30 = vsel %vm613_vm2, %v831_v29, -inf }
 0x363   : > { %834 = vmax.xlane.f32.xlu2 %v833_v30  ;;  %v1905_v30 = vld [vmem:[%s2365_s4 + $0xd0] sm:$0xff] }
 0x368   : > { %v828_v31 = vpop.f32.mrf.mxu3 }
 0x369   : > { %v832_v32 = vsel %vm485_vm1, %v828_v31, -1e+30  ;;  %v1904_v31 = vld [vmem:[%s2365_s4 + $0xc8] sm:$0xff] }
 0x36a   : > { %v836_v33 = vsel %vm613_vm2, %v832_v32, -inf }
 0x36b   : > { %837 = vmax.xlane.f32.xlu2 %v836_v33 }
 0x3d6   : > { %v835_v38 = vpop.xlane.xlu2 %834 }
 0x3d7   : > { %v839_v39 = vsub.f32 %v831_v29, %v835_v38  ;;  %v1906_v29 = vld [vmem:[%s2365_s4 + $0xd8] sm:$0xff] }
 0x3d9   : > { %v841_v40 = vmul.f32 1.442695, %v839_v39 }
 0x3db   : > { %1956 = vpow2.f32 %v841_v40 }
 0x3de   : > { %v838_v41 = vpop.xlane.xlu2 %837 }
 0x3df   : > { %v840_v42 = vsub.f32 %v832_v32, %v838_v41  ;;  %v1903_v32 = vld [vmem:[%s2365_s4 + $0xc0] sm:$0xff] }
 0x3e1   : > { %v1957_v43 = vpop.eup %1956  ;;  %v843_v44 = vmul.f32 1.442695, %v840_v42 }
 0x3e2   : > { %v845_v45 = vsel %vm613_vm2, %v1957_v43, 0.0 }
 0x3e3   : > { %1958 = vpow2.f32 %v843_v44  ;;  %846 = vadd.xlane.f32.xlu0 %v845_v45 }
 0x3e9   : > { %v1959_v46 = vpop.eup %1958 }
 0x3ea   : > { %v848_v47 = vsel %vm613_vm2, %v1959_v46, 0.0 }
 0x3eb   : > { %849 = vadd.xlane.f32.xlu1 %v848_v47  ;;  %v1835_v47 = vld [vmem:[%s2101_s26 + $0x2c] sm:$0xf]  ;;  %s473_s26 = scalar_lea.vmem %s2371_s10, %s2112_s11 }
 0x3ec   : > { %v1243_v48 = vunpack.c.l.b16 %v1835_v47 }
 0x3ee   : > { %v1245_v49 = vpack.c.b16 %v1243_v48, %v1243_v48 }
 0x3f0   : > { %v1253_v50 = vsel %vm585_vm0, %v1245_v49, 0 }
 0x456   : > { %v847_v59 = vpop.xlane.xlu0 %846 }
 0x457   : > { %1960 = vrcp.f32 %v847_v59 }
 0x45d   : > { %v1961_v61 = vpop.eup %1960 }
 0x45e   : > { %v850_v60 = vpop.xlane.xlu1 %849  ;;  %v853_v63 = vmul.f32 %v1961_v61, %v1957_v43  ;;  %v1944_v61 = vld [vmem:[%s2366_s5 + $0x3] ss:$0 sm:$0xff] }
 0x45f   : > { %1962 = vrcp.f32 %v850_v60 }
 0x465   : > { %v1963_v62 = vpop.eup %1962 }
 0x466   : > { %v854_v0 = vmul.f32 %v1963_v62, %v1959_v46  ;;  %v1900_v46 = vld [vmem:[%s2160_s19 + $0x18] sm:$0xff] }
 0x468   : > { %v855_v2 = vpack.c.bf16 %v854_v0, %v853_v63 }
 0x46a   : > { %1692 = vmatmul.msk.bf16.vlgmr.msrb.gmra.mxu1 %vm613_vm2, %v855_v2  ;;  %v1902_v2 = vld [vmem:[%s2367_s6 + $0x28] sm:$0xff] }
 0x46b   : > { %1215 = vmatpush.bf16.msrb.mxu1 %v1910_v10  ;;  %1133 = vmatpush.bf16.msrb.mxu3 %v1902_v2 }
 0x46f   : > { %1216 = vmatpush.bf16.msrb.mxu1 %v1909_v13  ;;  %1134 = vmatpush.bf16.msrb.mxu3 %v1901_v3 }
 0x473   : > { %1217 = vmatpush.bf16.msrb.mxu1 %v1908_v15 }
 0x477   : > { %1218 = vmatpush.bf16.msrb.mxu1 %v1907_v16 }
 0x47a   : > { %1765 = vmatmul.msk.bf16.vlgmr.msra.gmra.mxu1 %vm585_vm0, %v1018_v7 }
 0x47b   : > { %1219 = vmatpush.bf16.msrb.mxu1 %v1906_v29 }
 0x47f   : > { %1220 = vmatpush.bf16.msrb.mxu1 %v1905_v30 }
 0x483   : > { %1221 = vmatpush.bf16.msrb.mxu1 %v1904_v31 }
 0x487   : > { %1222 = vmatpush.bf16.msrb.mxu1 %v1903_v32 }
 0x48a   : > { %1223 = vmatmul.bf16.vlgmr.msrb.gmra.mxu1 %v2137_v18  ;;  %v1760_v18 = vld [vmem:[%s2160_s19 + $0x20] sm:$0xf] }
 0x48b   : > { %v1080_v43 = vunpack.c.l.b16 %v1760_v18 }
 0x48d   : > { %v1082_v44 = vpack.c.b16 %v1080_v43, %v1080_v43 }
 0x48f   : > { %v1088_v45 = vsel %vm649_vm3, %v1082_v44, 0  ;;  %v1913_v44 = vld [vmem:[%s2367_s6 + $0x30] sm:$0xff] }
 0x490   : > { %1096 = vmatpush.bf16.msra.mxu2 %v1088_v45 }
 0x494   : > { %1097 = vmatpush.bf16.msra.mxu2 %v1900_v46 }
 0x498   : > { %1261 = vmatpush.bf16.xpose.msrb.mxu2 %v1253_v50 }
 0x4a0   : > { %1262 = vmatpush.bf16.xpose.msrb.mxu2 %v1250_v52 }
 0x4e7   : > { %v880_v14 = vpop.f32.mrf.mxu1 }
 0x4ef   : > { %v882_v17 = vpop.f32.mrf.mxu1 }
 0x4f0   : > { %v887_v19 = vpack.c.bf16 %v882_v17, %v880_v14 }
 0x4f2   : > { %1705 = vmatmul.msk.bf16.vlgmr.msra.gmra.mxu3 %vm585_vm0, %v887_v19 }
 0x4f7   : > { %v1045_v20 = vpop.f32.mrf.mxu1 }
 0x4f8   : > { %v1050_v21 = vsel %vm485_vm1, %v1045_v20, -1e+30 }
 0x4f9   : > { %v1052_v22 = vsel %vm613_vm2, %v1050_v21, -inf }
 0x4fa   : > { %1053 = vmax.xlane.f32.xlu2 %v1052_v22 }
 0x4ff   : > { %v1047_v24 = vpop.f32.mrf.mxu1 }
 0x500   : > { %v1051_v25 = vsel %vm485_vm1, %v1047_v24, -1e+30 }
 0x501   : > { %v1055_v27 = vsel %vm613_vm2, %v1051_v25, -inf }
 0x502   : > { %1056 = vmax.xlane.f32.xlu0 %v1055_v27 }
 0x507   : > { %v1224_v59 = vpop.f32.mrf.mxu1 }
 0x508   : > { %v1225_v63 = vadd.f32 %v1944_v61, %v1224_v59 }
 0x50f   : > { %v1226_v62 = vpop.f32.mrf.mxu1 }
 0x510   : > { %v1227_v0 = vadd.f32 %v1944_v61, %v1226_v62 }
 0x512   : > { %v1237_v1 = vpack.c.bf16 %v1227_v0, %v1225_v63 }
 0x56d   : > { %v1054_v33 = vpop.xlane.xlu2 %1053 }
 0x56e   : > { %v1058_v34 = vsub.f32 %v1050_v21, %v1054_v33  ;;  %v1838_v33 = vld [vmem:[%s2160_s19 + $0x2c] sm:$0xf] }
 0x570   : > { %v1060_v35 = vmul.f32 1.442695, %v1058_v34  ;;  %v1299_v34 = vunpack.c.l.b16 %v1838_v33 }
 0x572   : > { %1964 = vpow2.f32 %v1060_v35  ;;  %v1301_v35 = vpack.c.b16 %v1299_v34, %v1299_v34 }
 0x575   : > { %v1057_v36 = vpop.xlane.xlu0 %1056  ;;  %v917_v15 = vpop.f32.mrf.mxu3 }
 0x576   : > { %v1059_v37 = vsub.f32 %v1051_v25, %v1057_v36  ;;  %v922_v21 = vadd.f32 %v917_v15, %v2214_v23  ;;  %v1307_v23 = vsel %vm649_vm3, %v1301_v35, 0  ;;  %v1912_v36 = vld [vmem:[%s2160_s19 + $0x24] sm:$0xff] }
 0x577   : > { %1315 = vmatpush.bf16.msra.mxu3 %v1307_v23 }
 0x578   : > { %v1965_v38 = vpop.eup %1964  ;;  %v1062_v39 = vmul.f32 1.442695, %v1059_v37  ;;  %v1914_v37 = vld [vmem:[%s2367_s6 + $0x38] sm:$0xff] }
 0x579   : > { %v1064_v40 = vsel %vm613_vm2, %v1965_v38, 0.0  ;;  %1352 = vmatpush.bf16.msra.mxu0 %v1914_v37 }
 0x57a   : > { %1966 = vpow2.f32 %v1062_v39  ;;  %1065 = vadd.xlane.f32.xlu1 %v1064_v40 }
 0x57b   : > { %1316 = vmatpush.bf16.msra.mxu3 %v1912_v36 }
 0x57d   : > { %v919_v16 = vpop.f32.mrf.mxu3  ;;  %1353 = vmatpush.bf16.msra.mxu0 %v1913_v44 }
 0x580   : > { %v1967_v41 = vpop.eup %1966 }
 0x581   : > { %v1067_v42 = vsel %vm613_vm2, %v1967_v41, 0.0 }
 0x582   : > { %1068 = vadd.xlane.f32.xlu2 %v1067_v42 }
 0x5ed   : > { %v1066_v53 = vpop.xlane.xlu1 %1065 }
 0x5ee   : > { %1968 = vrcp.f32 %v1066_v53  ;;  %v923_v53 = vadd.f32 %v919_v16, %v2222_v26 }
 0x5f4   : > { %v1969_v55 = vpop.eup %1968 }
 0x5f5   : > { %v1069_v54 = vpop.xlane.xlu2 %1068  ;;  %v1072_v57 = vmul.f32 %v1969_v55, %v1965_v38 }
 0x5f6   : > { %1970 = vrcp.f32 %v1069_v54 }
 0x5fc   : > { %v1971_v56 = vpop.eup %1970 }
 0x5fd   : > { %v1073_v58 = vmul.f32 %v1971_v56, %v1967_v41 }
 0x5ff   : > { %v1074_v60 = vpack.c.bf16 %v1073_v58, %v1072_v57 }
 0x601   : > { %1770 = vmatmul.msk.bf16.vlgmr.msra.gmra.mxu2 %vm613_vm2, %v1074_v60  ;;  %v2010_v60 = vmov 128.0  }
 0x611   : > { %1843 = vmatmul.msk.bf16.vlgmr.msrb.gmra.mxu2 %vm585_vm0, %v1237_v1 }
 0x684   : > { %v1099_v4 = vpop.f32.mrf.mxu2 }
 0x68c   : > { %v1101_v5 = vpop.f32.mrf.mxu2 }
 0x68d   : > { %v1106_v6 = vpack.c.bf16 %v1101_v5, %v1099_v4 }
 0x68f   : > { %1783 = vmatmul.msk.bf16.vlgmr.msrb.gmra.mxu3 %vm585_vm0, %v1106_v6 }
 0x694   : > { %v1264_v7 = vpop.f32.mrf.mxu2 }
 0x695   : > { %v1269_v8 = vsel %vm485_vm1, %v1264_v7, -1e+30 }
 0x696   : > { %v1271_v9 = vsel %vm613_vm2, %v1269_v8, -inf }
 0x697   : > { %1272 = vmax.xlane.f32.xlu0 %v1271_v9 }
 0x69c   : > { %v1266_v10 = vpop.f32.mrf.mxu2 }
 0x69d   : > { %v1270_v13 = vsel %vm485_vm1, %v1266_v10, -1e+30 }
 0x69e   : > { %v1274_v14 = vsel %vm613_vm2, %v1270_v13, -inf }
 0x69f   : > { %1275 = vmax.xlane.f32.xlu1 %v1274_v14 }
 0x70a   : > { %v1273_v17 = vpop.xlane.xlu0 %1272 }
 0x70b   : > { %v1277_v19 = vsub.f32 %v1269_v8, %v1273_v17 }
 0x70d   : > { %v1279_v20 = vmul.f32 1.442695, %v1277_v19 }
 0x70f   : > { %1972 = vpow2.f32 %v1279_v20 }
 0x712   : > { %v1276_v22 = vpop.xlane.xlu1 %1275  ;;  %v1136_v24 = vpop.f32.mrf.mxu3 }
 0x713   : > { %v1278_v25 = vsub.f32 %v1270_v13, %v1276_v22  ;;  %v1141_v27 = vadd.f32 %v1136_v24, %v922_v21 }
 0x715   : > { %v1973_v29 = vpop.eup %1972  ;;  %v1281_v28 = vmul.f32 1.442695, %v1278_v25 }
 0x716   : > { %v1283_v30 = vsel %vm613_vm2, %v1973_v29, 0.0 }
 0x717   : > { %1974 = vpow2.f32 %v1281_v28  ;;  %1284 = vadd.xlane.f32.xlu2 %v1283_v30  ;;  %v1947_v30 = vld [vmem:[%s2370_s9] ss:$0 sm:$0xff] }
 0x71a   : > { %v1138_v45 = vpop.f32.mrf.mxu3 }
 0x71b   : > { %v1142_v55 = vadd.f32 %v1138_v45, %v923_v53 }
 0x71d   : > { %v1975_v31 = vpop.eup %1974 }
 0x71e   : > { %v1286_v32 = vsel %vm613_vm2, %v1975_v31, 0.0 }
 0x71f   : > { %1287 = vadd.xlane.f32.xlu0 %v1286_v32 }
 0x78a   : > { %v1285_v38 = vpop.xlane.xlu2 %1284 }
 0x78b   : > { %1976 = vrcp.f32 %v1285_v38 }
 0x791   : > { %v1977_v40 = vpop.eup %1976 }
 0x792   : > { %v1288_v39 = vpop.xlane.xlu0 %1287  ;;  %v1291_v42 = vmul.f32 %v1977_v40, %v1973_v29 }
 0x793   : > { %1978 = vrcp.f32 %v1288_v39 }
 0x794   : > { %1980 = vrcp.f32 %v2010_v60 }
 0x799   : > { %v1979_v41 = vpop.eup %1978 }
 0x79a   : > { %v1292_v18 = vmul.f32 %v1979_v41, %v1975_v31  ;;  %v1981_v61 = vpop.eup %1980 }
 0x79b   : > { %v1379_v62 = vmul.f32 128.0, %v1981_v61  ;;  %vm1383_vm4 = vweird.f32 %v1981_v61 }
 0x79c   : > { %v1293_v43 = vpack.c.bf16 %v1292_v18, %v1291_v42 }
 0x79d   : > { %v1380_v63 = vsub.f32 1.0, %v1379_v62 }
 0x79e   : > { %1848 = vmatmul.msk.bf16.vlgmr.msra.gmra.mxu3 %vm613_vm2, %v1293_v43 }
 0x79f   : > { %v1381_v0 = vmul.f32 %v1981_v61, %v1380_v63 }
 0x7a1   : > { %v1382_v1 = vadd.f32 %v1981_v61, %v1381_v0 }
 0x821   : > { %v1318_v46 = vpop.f32.mrf.mxu3 }
 0x829   : > { %v1320_v47 = vpop.f32.mrf.mxu3 }
 0x82a   : > { %v1325_v48 = vpack.c.bf16 %v1320_v47, %v1318_v46 }
 0x82c   : > { %1861 = vmatmul.msk.bf16.vlgmr.msra.gmra.mxu0 %vm585_vm0, %v1325_v48 }
 0x8a9   : > { %v1355_v49 = vpop.f32.mrf.mxu0 }
 0x8aa   : > { %v1360_v50 = vadd.f32 %v1355_v49, %v1141_v27  ;;  %v1946_v27 = vld [vmem:[%s2369_s8] ss:$0 sm:$0xff] }
 0x8ac   : > { %v1366_v52 = vadd.f32 %v1360_v50, %v2128_v11  ;;  %v1384_v11 = vsel %vm1383_vm4, %v1981_v61, %v1382_v1 }
 0x8ae   : > { %v1372_v54 = vadd.f32 %v1945_v51, %v1366_v52 }
 0x8b0   : > { %1374 = vadd.xlane.f32.xlu1 %v1372_v54 }
 0x8b1   : > { %v1357_v56 = vpop.f32.mrf.mxu0 }
 0x8b2   : > { %v1361_v57 = vadd.f32 %v1357_v56, %v1142_v55 }
 0x8b4   : > { %v1367_v58 = vadd.f32 %v1361_v57, %v2130_v12 }
 0x8b6   : > { %v1373_v59 = vadd.f32 %v1945_v51, %v1367_v58 }
 0x8b8   : > { %1376 = vadd.xlane.f32.xlu2 %v1373_v59 }
 0x923   : > { %v1375_v2 = vpop.xlane.xlu1 %1374 }
 0x924   : > { %v1385_v26 = vmul.f32 %v1384_v11, %v1375_v2 }
 0x926   : > { %v1387_v3 = vsub.f32 %v1372_v54, %v1385_v26 }
 0x928   : > { %v1389_v4 = vmul.f32 %v1387_v3, %v1387_v3 }
 0x92a   : > { %1391 = vadd.xlane.f32.xlu0 %v1389_v4 }
 0x92b   : > { %v1377_v5 = vpop.xlane.xlu2 %1376 }
 0x92c   : > { %v1386_v6 = vmul.f32 %v1384_v11, %v1377_v5 }
 0x92e   : > { %v1388_v7 = vsub.f32 %v1373_v59, %v1386_v6 }
 0x930   : > { %v1390_v12 = vmul.f32 %v1388_v7, %v1388_v7 }
 0x932   : > { %1393 = vadd.xlane.f32.xlu1 %v1390_v12 }
 0x99d   : > { %v1392_v8 = vpop.xlane.xlu0 %1391 }
 0x99e   : > { %v1395_v9 = vmul.f32 %v1392_v8, %v1384_v11 }
 0x9a0   : > { %v1397_v10 = vadd.f32 1e-05, %v1395_v9 }
 0x9a2   : > { %1982 = vrsqrt.f32 %v1397_v10  ;;  %vm1405_vm6 = vweird.f32 %v1397_v10 }
 0x9a5   : > { %v1394_v13 = vpop.xlane.xlu1 %1393 }
 0x9a6   : > { %v1396_v14 = vmul.f32 %v1394_v13, %v1384_v11 }
 0x9a8   : > { %v1983_v15 = vpop.eup %1982  ;;  %v1398_v16 = vadd.f32 1e-05, %v1396_v14 }
 0x9a9   : > { %v1400_v17 = vmul.f32 %v1983_v15, %v1397_v10  ;;  %vm1406_vm5 = vweird.f32 %v1983_v15 }
 0x9aa   : > { %1984 = vrsqrt.f32 %v1398_v16  ;;  %vm1407_vm7 = vmor %vm1405_vm6, %vm1406_vm5  ;;  %vm1415_vm9 = vweird.f32 %v1398_v16 }
 0x9ab   : > { %v1401_v19 = vmul.f32 %v1983_v15, %v1400_v17 }
 0x9ad   : > { %v1402_v20 = vmul.f32 0.5, %v1401_v19 }
 0x9af   : > { %v1403_v21 = vsub.f32 1.5, %v1402_v20 }
 0x9b0   : > { %v1985_v22 = vpop.eup %1984 }
 0x9b1   : > { %v1404_v24 = vmul.f32 %v1983_v15, %v1403_v21  ;;  %v1410_v25 = vmul.f32 %v1985_v22, %v1398_v16  ;;  %vm1416_vm8 = vweird.f32 %v1985_v22 }
 0x9b2   : > { %vm1417_vm10 = vmor %vm1415_vm9, %vm1416_vm8 }
 0x9b3   : > { %v1408_v29 = vsel %vm1407_vm7, %v1983_v15, %v1404_v24  ;;  %v1411_v28 = vmul.f32 %v1985_v22, %v1410_v25 }
 0x9b4   : > { %v1419_v31 = vmul.f32 %v1408_v29, %v1387_v3 }
 0x9b5   : > { %v1412_v32 = vmul.f32 0.5, %v1411_v28 }
 0x9b6   : > { %v1425_v33 = vmul.f32 %v1946_v27, %v1419_v31 }
 0x9b7   : > { %v1413_v34 = vsub.f32 1.5, %v1412_v32 }
 0x9b8   : > { %v1431_v35 = vadd.f32 %v1947_v30, %v1425_v33 }
 0x9b9   : > { %v1414_v23 = vmul.f32 %v1985_v22, %v1413_v34 }
 0x9ba   : > { %1433 = vst [vmem:[%s473_s26] sm:$0xff] %v1431_v35 }
 0x9bb   : > { %v1418_v36 = vsel %vm1417_vm10, %v1985_v22, %v1414_v23 }
 0x9bc   : > { %v1420_v37 = vmul.f32 %v1418_v36, %v1388_v7 }
 0x9be   : > { %v1426_v38 = vmul.f32 %v1946_v27, %v1420_v37 }
 0x9c0   : > { %v1432_v39 = vadd.f32 %v1947_v30, %v1426_v38 }
 0x9c2   : > { %1434 = vst [vmem:[%s473_s26 + $0x8] sm:$0xff] %v1432_v39 }
 0x9c3 PF: > { %s20_s15 = sadd.s32 1, %s2008_s15   ;;  %s2372_s13 = smov %s2004_s14 }
 0x9c4   : > { %p17_p5 = scmp.ge.s32.totalorder %s20_s15, 4   ;;  %s2373_s14 = smov %s2375_s16 }
 0x9c6   :  { %19 = sbr.rel (!%p17_p5) target bundleno = 2 (0x2), region = 114 }

// kernel: transformer_decoder_layer.9
= control target key start
LH: loop header
LB: loop body
LE: loop exit
PB: predicated region body
PF: predicated region fallthrough
CT: control target
= control target key end

     0   :  { %s1362_s30 = smov 0   ;;  %s1364_s10 = smov 0   ;;  %s1567_s0 = inlined_call_operand.vmem [shape: f32[2,16,128], index: 0, kind: input, shape index: {}]   ;;  %s1568_s1 = inlined_call_operand.vmem [shape: f32[2,16,128], index: 1, kind: input, shape index: {}]   ;;  %s1569_s2 = inlined_call_operand.vmem [shape: f32[2,16,128], index: 2, kind: input, shape index: {}]   ;;  %s1570_s3 = inlined_call_operand.vmem [shape: bf16[128,256], index: 3, kind: input, shape index: {}]   ;;  %s1571_s4 = inlined_call_operand.vmem [shape: f32[1,256], index: 4, kind: input, shape index: {}]   ;;  %s1572_s5 = inlined_call_operand.vmem [shape: bf16[256,128], index: 5, kind: input, shape index: {}]   ;;  %s1573_s6 = inlined_call_operand.vmem [shape: f32[1,128], index: 6, kind: input, shape index: {}]   ;;  %s1574_s7 = inlined_call_operand.vmem [shape: f32[1,128], index: 7, kind: input, shape index: {}]   ;;  %s1575_s8 = inlined_call_operand.vmem [shape: f32[1,128], index: 8, kind: input, shape index: {}]   ;;  %s1576_s9 = inlined_call_operand.vmem [shape: f32[2,16,128], index: 9, kind: output, shape index: {}]  }
   0x1   :  { %s1366_s11 = smov 0  }
   0x2 LB: > { %s38_s12 = sadd.s32 1, %s1305_s10  ;;  %p1078_p0 = scmp.ge.s32.totalorder %s1309_s11, 1  ;;  %s1309_s11 = sphi %s1366_s11, %s19_s11   ;;  %s1305_s10 = sphi %s1364_s10, %s1578_s10   ;;  %s1301_s30 = sphi %s1362_s30, %s1577_s30  }
   0x3   : > { %p40_p1 = scmp.ge.s32.totalorder %s38_s12, 2  ;;  %p381_p2 = scmp.lt.s32.totalorder %s1309_s11, 3 }
   0x5   : > { %s1580_s12 = smov (%p40_p1, %s38_s12), 0  ;;  %p382_p3 = pnand %p1078_p0, %p381_p2 }
   0x6   : > { %p458_p4 = scmp.lt.s32.totalorder (!%p382_p3), %s1301_s30, 1 }
   0x7   : > { %385 = sbr.rel (%p382_p3) target bundleno = 604 (0x25c), region = 56 }
   0xc   : > { %v1145_v0 = vld [vmem:[%s1570_s3 + $0x70] sm:$0xf]  ;;  %v1236_v1 = vld [vmem:[%s1570_s3 + $0x74] sm:$0xf0]  ;;  %v1235_v2 = vld [vmem:[%s1570_s3 + $0x74] sm:$0xf] }
   0xd   : > { %v1146_v3 = vor.u32 %v1236_v1, %v1145_v0  ;;  %v1147_v4 = vld [vmem:[%s1570_s3 + $0x78] sm:$0xf0]  ;;  %v1137_v5 = vld [vmem:[%s1570_s3 + $0x60] sm:$0xf]  ;;  %v1234_v6 = vld [vmem:[%s1570_s3 + $0x64] sm:$0xf0] }
   0xe   : > { %v1150_v7 = vor.u32 %v1235_v2, %v1147_v4  ;;  %v1233_v8 = vld [vmem:[%s1570_s3 + $0x64] sm:$0xf]  ;;  %v1139_v9 = vld [vmem:[%s1570_s3 + $0x68] sm:$0xf0]  ;;  %v1138_v10 = vor.u32 %v1234_v6, %v1137_v5  ;;  %v1129_v12 = vld [vmem:[%s1570_s3 + $0x50] sm:$0xf] }
   0xf   : > { %625 = vmatpush.bf16.msra.mxu0 %v1146_v3  ;;  %v1142_v11 = vor.u32 %v1233_v8, %v1139_v9  ;;  %v1232_v13 = vld [vmem:[%s1570_s3 + $0x54] sm:$0xf0]  ;;  %v1231_v14 = vld [vmem:[%s1570_s3 + $0x54] sm:$0xf]  ;;  %v1131_v15 = vld [vmem:[%s1570_s3 + $0x58] sm:$0xf0] }
  0x10   : > { %639 = vmatpush.bf16.msra.mxu1 %v1150_v7  ;;  %v1130_v16 = vor.u32 %v1232_v13, %v1129_v12  ;;  %v1134_v17 = vor.u32 %v1231_v14, %v1131_v15  ;;  %v1121_v18 = vld [vmem:[%s1570_s3 + $0x40] sm:$0xf]  ;;  %v1230_v19 = vld [vmem:[%s1570_s3 + $0x44] sm:$0xf0]  ;;  %v1229_v20 = vld [vmem:[%s1570_s3 + $0x44] sm:$0xf] }
  0x11   : > { %v1123_v21 = vld [vmem:[%s1570_s3 + $0x48] sm:$0xf0]  ;;  %v1244_v22 = vld [vmem:[%s1572_s5 + $0x38] sm:$0xff]  ;;  %v1122_v23 = vor.u32 %v1230_v19, %v1121_v18  ;;  %v1113_v24 = vld [vmem:[%s1570_s3 + $0x30] sm:$0xf]  ;;  %s1582_s30 = smov (!%p458_p4, %s1301_s30), 1 }
  0x12   : > { %v1252_v25 = vld [vmem:[%s1572_s5 + $0x78] sm:$0xff]  ;;  %v1126_v26 = vor.u32 %v1229_v20, %v1123_v21  ;;  %v1227_v28 = vld [vmem:[%s1570_s3 + $0x34] sm:$0xf]  ;;  %789 = vmatpush.bf16.msra.mxu2 %v1244_v22  ;;  %v1105_v34 = vld [vmem:[%s1570_s3 + $0x20] sm:$0xf]  ;;  %s1489_s15 = sshll.u32 %s1582_s30, 4 }
  0x13   : > { %626 = vmatpush.bf16.msra.mxu0 %v1138_v10  ;;  %v1228_v27 = vld [vmem:[%s1570_s3 + $0x34] sm:$0xf0]  ;;  %v1243_v29 = vld [vmem:[%s1572_s5 + $0x30] sm:$0xff]  ;;  %v1115_v30 = vld [vmem:[%s1570_s3 + $0x38] sm:$0xf0]  ;;  %803 = vmatpush.bf16.msra.mxu3 %v1252_v25  ;;  %s465_s23 = scalar_lea.vmem %s1567_s0, %s1489_s15  ;;  %s475_s19 = scalar_lea.vmem %s1568_s1, %s1489_s15 }
  0x14   : > { %640 = vmatpush.bf16.msra.mxu1 %v1142_v11  ;;  %v1251_v31 = vld [vmem:[%s1572_s5 + $0x70] sm:$0xff]  ;;  %v1114_v32 = vor.u32 %v1228_v27, %v1113_v24  ;;  %v1118_v33 = vor.u32 %v1227_v28, %v1115_v30  ;;  %v1226_v35 = vld [vmem:[%s1570_s3 + $0x24] sm:$0xf0]  ;;  %v1225_v37 = vld [vmem:[%s1570_s3 + $0x24] sm:$0xf]  ;;  %s512_s26 = scalar_lea.vmem %s1576_s9, %s1489_s15 }
  0x15   : > { %v1242_v36 = vld [vmem:[%s1572_s5 + $0x28] sm:$0xff]  ;;  %v1106_v40 = vor.u32 %v1226_v35, %v1105_v34  ;;  %v1097_v42 = vld [vmem:[%s1570_s3 + $0x10] sm:$0xf]  ;;  %v1224_v43 = vld [vmem:[%s1570_s3 + $0x14] sm:$0xf0] }
  0x16   : > { %790 = vmatpush.bf16.msra.mxu2 %v1243_v29  ;;  %v1107_v38 = vld [vmem:[%s1570_s3 + $0x28] sm:$0xf0]  ;;  %v1241_v44 = vld [vmem:[%s1572_s5 + $0x20] sm:$0xff]  ;;  %v1223_v45 = vld [vmem:[%s1570_s3 + $0x14] sm:$0xf]  ;;  %v1098_v48 = vor.u32 %v1224_v43, %v1097_v42 }
  0x17   : > { %627 = vmatpush.bf16.msra.mxu0 %v1130_v16  ;;  %804 = vmatpush.bf16.msra.mxu3 %v1251_v31  ;;  %v1250_v39 = vld [vmem:[%s1572_s5 + $0x68] sm:$0xff]  ;;  %v1110_v41 = vor.u32 %v1225_v37, %v1107_v38  ;;  %v1099_v46 = vld [vmem:[%s1570_s3 + $0x18] sm:$0xf0]  ;;  %v1249_v47 = vld [vmem:[%s1572_s5 + $0x60] sm:$0xff]  ;;  %v1311_v31 = vmov 128.0  }
  0x18   : > { %641 = vmatpush.bf16.msra.mxu1 %v1134_v17  ;;  %v1102_v49 = vor.u32 %v1223_v45, %v1099_v46  ;;  %v1089_v50 = vld [vmem:[%s1570_s3] sm:$0xf]  ;;  %v1222_v51 = vld [vmem:[%s1570_s3 + $0x4] sm:$0xf0]  ;;  %v1221_v52 = vld [vmem:[%s1570_s3 + $0x4] sm:$0xf]  ;;  %1281 = vrcp.f32 %v1311_v31 }
  0x19   : > { %v1091_v53 = vld [vmem:[%s1570_s3 + $0x8] sm:$0xf0]  ;;  %v1090_v54 = vor.u32 %v1222_v51, %v1089_v50  ;;  %v520_v55 = vld [vmem:[%s465_s23] sm:$0xff]  ;;  %v1240_v59 = vld [vmem:[%s1572_s5 + $0x18] sm:$0xff] }
  0x1a   : > { %791 = vmatpush.bf16.msra.mxu2 %v1242_v36  ;;  %v521_v56 = vld [vmem:[%s465_s23 + $0x8] sm:$0xff]  ;;  %v1094_v57 = vor.u32 %v1221_v52, %v1091_v53  ;;  %v1248_v60 = vld [vmem:[%s1572_s5 + $0x58] sm:$0xff]  ;;  %v1239_v61 = vld [vmem:[%s1572_s5 + $0x10] sm:$0xff]  ;;  %s485_s23 = scalar_lea.vmem %s1569_s2, %s1489_s15 }
  0x1b   : > { %628 = vmatpush.bf16.msra.mxu0 %v1122_v23  ;;  %805 = vmatpush.bf16.msra.mxu3 %v1250_v39  ;;  %v522_v58 = vpack.c.bf16 %v521_v56, %v520_v55  ;;  %v1247_v62 = vld [vmem:[%s1572_s5 + $0x50] sm:$0xff]  ;;  %v1238_v63 = vld [vmem:[%s1572_s5 + $0x8] sm:$0xff]  ;;  %v1237_v1 = vld [vmem:[%s1572_s5] sm:$0xff] }
  0x1c   : > { %642 = vmatpush.bf16.msra.mxu1 %v1126_v26  ;;  %v1246_v0 = vld [vmem:[%s1572_s5 + $0x48] sm:$0xff]  ;;  %v1245_v2 = vld [vmem:[%s1572_s5 + $0x40] sm:$0xff] }
  0x1d   : > { %v539_v3 = vld [vmem:[%s1571_s4] sm:$0x3] }
  0x1e   : > { %792 = vmatpush.bf16.msra.mxu2 %v1241_v44  ;;  %v541_v6 = vperm.slane %v539_v3, 0  ;;  %v542_v7 = vperm.slane %v539_v3, 1  ;;  %v1278_v23 = vld [vmem:[%s1573_s6] ss:$0 sm:$0xff] }
  0x1f   : > { %629 = vmatpush.bf16.msra.mxu0 %v1114_v32  ;;  %806 = vmatpush.bf16.msra.mxu3 %v1249_v47  ;;  %v1282_v32 = vpop.eup %1281  ;;  %v893_v3 = vld [vmem:[%s475_s19] sm:$0xff] }
  0x20   : > { %643 = vmatpush.bf16.msra.mxu1 %v1118_v33  ;;  %v839_v33 = vmul.f32 128.0, %v1282_v32  ;;  %vm843_vm0 = vweird.f32 %v1282_v32 }
  0x22   : > { %793 = vmatpush.bf16.msra.mxu2 %v1240_v59  ;;  %v840_v34 = vsub.f32 1.0, %v839_v33 }
  0x23   : > { %630 = vmatpush.bf16.msra.mxu0 %v1106_v40  ;;  %807 = vmatpush.bf16.msra.mxu3 %v1248_v60  ;;  %v1279_v60 = vld [vmem:[%s1574_s7] ss:$0 sm:$0xff] }
  0x24   : > { %644 = vmatpush.bf16.msra.mxu1 %v1110_v41  ;;  %v841_v35 = vmul.f32 %v1282_v32, %v840_v34 }
  0x26   : > { %794 = vmatpush.bf16.msra.mxu2 %v1239_v61  ;;  %v842_v36 = vadd.f32 %v1282_v32, %v841_v35 }
  0x27   : > { %631 = vmatpush.bf16.msra.mxu0 %v1098_v48  ;;  %808 = vmatpush.bf16.msra.mxu3 %v1247_v62 }
  0x28   : > { %645 = vmatpush.bf16.msra.mxu1 %v1102_v49  ;;  %v844_v37 = vsel %vm843_vm0, %v1282_v32, %v842_v36 }
  0x2a   : > { %795 = vmatpush.bf16.msra.mxu2 %v1238_v63  ;;  %v1280_v63 = vld [vmem:[%s1575_s8] ss:$0 sm:$0xff] }
  0x2b   : > { %632 = vmatpush.bf16.msra.mxu0 %v1090_v54  ;;  %809 = vmatpush.bf16.msra.mxu3 %v1246_v0 }
  0x2c   : > { %646 = vmatpush.bf16.msra.mxu1 %v1094_v57 }
  0x2e   : > { %633 = vmatmul.bf16.vlgmr.msra.gmra.mxu0 %v522_v58  ;;  %796 = vmatpush.bf16.msra.mxu2 %v1237_v1 }
  0x2f   : > { %647 = vmatmul.bf16.vlgmr.msra.gmra.mxu1 %v522_v58  ;;  %810 = vmatpush.bf16.msra.mxu3 %v1245_v2 }
  0xab   : > { %v634_v4 = vpop.f32.mrf.mxu0 }
  0xac   : > { %v648_v5 = vpop.f32.mrf.mxu1  ;;  %v635_v8 = vadd.f32 %v634_v4, %v541_v6 }
  0xad   : > { %v649_v9 = vadd.f32 %v648_v5, %v542_v7 }
  0xae   : > { %v653_v14 = vmax.f32 %v635_v8, 0.0 }
  0xaf   : > { %v654_v16 = vmax.f32 %v649_v9, 0.0 }
  0xb3   : > { %v636_v10 = vpop.f32.mrf.mxu0 }
  0xb4   : > { %v637_v11 = vadd.f32 %v636_v10, %v541_v6  ;;  %v650_v12 = vpop.f32.mrf.mxu1  ;;  %v897_v6 = vld [vmem:[%s485_s23] sm:$0xff] }
  0xb5   : > { %v651_v13 = vadd.f32 %v650_v12, %v542_v7 }
  0xb6   : > { %v655_v15 = vmax.f32 %v637_v11, 0.0 }
  0xb7   : > { %v656_v17 = vmax.f32 %v651_v13, 0.0  ;;  %v894_v13 = vld [vmem:[%s475_s19 + $0x8] sm:$0xff] }
  0xb8   : > { %v659_v18 = vpack.c.bf16 %v655_v15, %v653_v14  ;;  %v898_v15 = vld [vmem:[%s485_s23 + $0x8] sm:$0xff] }
  0xb9   : > { %v660_v19 = vpack.c.bf16 %v656_v17, %v654_v16 }
  0xba   : > { %797 = vmatmul.bf16.vlgmr.msra.gmra.mxu2 %v659_v18 }
  0xbb   : > { %811 = vmatmul.bf16.vlgmr.msra.gmra.mxu3 %v660_v19 }
 0x13d   : > { %v798_v20 = vpop.f32.mrf.mxu2 }
 0x13e   : > { %v812_v21 = vpop.f32.mrf.mxu3 }
 0x13f   : > { %v813_v22 = vadd.f32 %v812_v21, %v798_v20 }
 0x141   : > { %v826_v24 = vadd.f32 %v813_v22, %v520_v55 }
 0x143   : > { %v832_v25 = vadd.f32 %v1278_v23, %v826_v24 }
 0x145   : > { %834 = vadd.xlane.f32.xlu0 %v832_v25  ;;  %v800_v26 = vpop.f32.mrf.mxu2 }
 0x146   : > { %v814_v27 = vpop.f32.mrf.mxu3 }
 0x147   : > { %v815_v28 = vadd.f32 %v814_v27, %v800_v26 }
 0x149   : > { %v827_v29 = vadd.f32 %v815_v28, %v521_v56 }
 0x14b   : > { %v833_v30 = vadd.f32 %v1278_v23, %v827_v29 }
 0x14d   : > { %836 = vadd.xlane.f32.xlu0 %v833_v30 }
 0x1b8   : > { %v835_v38 = vpop.xlane.xlu0 %834 }
 0x1b9   : > { %v845_v39 = vmul.f32 %v844_v37, %v835_v38 }
 0x1bb   : > { %v847_v40 = vsub.f32 %v832_v25, %v845_v39 }
 0x1bd   : > { %v849_v41 = vmul.f32 %v847_v40, %v847_v40 }
 0x1bf   : > { %851 = vadd.xlane.f32.xlu1 %v849_v41 }
 0x1c0   : > { %v837_v42 = vpop.xlane.xlu0 %836 }
 0x1c1   : > { %v846_v43 = vmul.f32 %v844_v37, %v837_v42 }
 0x1c3   : > { %v848_v44 = vsub.f32 %v833_v30, %v846_v43 }
 0x1c5   : > { %v850_v45 = vmul.f32 %v848_v44, %v848_v44 }
 0x1c7   : > { %853 = vadd.xlane.f32.xlu1 %v850_v45 }
 0x232   : > { %v852_v46 = vpop.xlane.xlu1 %851 }
 0x233   : > { %v855_v47 = vmul.f32 %v852_v46, %v844_v37 }
 0x235   : > { %v857_v48 = vadd.f32 1e-05, %v855_v47 }
 0x237   : > { %1283 = vrsqrt.f32 %v857_v48  ;;  %vm865_vm2 = vweird.f32 %v857_v48 }
 0x23a   : > { %v854_v49 = vpop.xlane.xlu1 %853 }
 0x23b   : > { %v856_v50 = vmul.f32 %v854_v49, %v844_v37 }
 0x23d   : > { %v1284_v51 = vpop.eup %1283  ;;  %v858_v52 = vadd.f32 1e-05, %v856_v50 }
 0x23e   : > { %v860_v53 = vmul.f32 %v1284_v51, %v857_v48  ;;  %vm866_vm1 = vweird.f32 %v1284_v51 }
 0x23f   : > { %1285 = vrsqrt.f32 %v858_v52  ;;  %vm867_vm3 = vmor %vm865_vm2, %vm866_vm1  ;;  %vm875_vm5 = vweird.f32 %v858_v52 }
 0x240   : > { %v861_v54 = vmul.f32 %v1284_v51, %v860_v53 }
 0x242   : > { %v862_v55 = vmul.f32 0.5, %v861_v54 }
 0x244   : > { %v863_v56 = vsub.f32 1.5, %v862_v55 }
 0x245   : > { %v1286_v57 = vpop.eup %1285 }
 0x246   : > { %v864_v58 = vmul.f32 %v1284_v51, %v863_v56  ;;  %v870_v59 = vmul.f32 %v1286_v57, %v858_v52  ;;  %vm876_vm4 = vweird.f32 %v1286_v57 }
 0x247   : > { %vm877_vm6 = vmor %vm875_vm5, %vm876_vm4 }
 0x248   : > { %v868_v61 = vsel %vm867_vm3, %v1284_v51, %v864_v58  ;;  %v871_v62 = vmul.f32 %v1286_v57, %v870_v59 }
 0x249   : > { %v879_v0 = vmul.f32 %v868_v61, %v847_v40 }
 0x24a   : > { %v872_v1 = vmul.f32 0.5, %v871_v62 }
 0x24b   : > { %v885_v2 = vmul.f32 %v1279_v60, %v879_v0 }
 0x24c   : > { %v873_v4 = vsub.f32 1.5, %v872_v1 }
 0x24d   : > { %v891_v5 = vadd.f32 %v1280_v63, %v885_v2 }
 0x24e   : > { %v874_v7 = vmul.f32 %v1286_v57, %v873_v4 }
 0x24f   : > { %v895_v8 = vadd.f32 %v893_v3, %v891_v5 }
 0x250   : > { %v878_v9 = vsel %vm877_vm6, %v1286_v57, %v874_v7 }
 0x251   : > { %v899_v10 = vadd.f32 %v897_v6, %v895_v8  ;;  %v880_v11 = vmul.f32 %v878_v9, %v848_v44 }
 0x253   : > { %901 = vst [vmem:[%s512_s26] sm:$0xff] %v899_v10  ;;  %v886_v12 = vmul.f32 %v1279_v60, %v880_v11 }
 0x255   : > { %v892_v14 = vadd.f32 %v1280_v63, %v886_v12 }
 0x257   : > { %v896_v16 = vadd.f32 %v894_v13, %v892_v14 }
 0x259   : > { %v900_v17 = vadd.f32 %v898_v15, %v896_v16 }
 0x25b   : > { %902 = vst [vmem:[%s512_s26 + $0x8] sm:$0xff] %v900_v17 }
 0x25c PF: > { %s19_s11 = sadd.s32 1, %s1309_s11   ;;  %s1577_s30 = smov %s1305_s10 }
 0x25d   : > { %p16_p5 = scmp.ge.s32.totalorder %s19_s11, 4   ;;  %s1578_s10 = smov %s1580_s12 }
 0x25f   :  { %18 = sbr.rel (!%p16_p5) target bundleno = 2 (0x2), region = 109 }

</bundles_post_ra>
